<compile_context>
chip_gen: v7x
topology: tpu7x:2x2x1
jax: 0.10.0
libtpu: 0.0.40
codegen_flags: <defaults>
</compile_context>

<pallas_src>
import jax
import jax.numpy as jnp
from jax.experimental import pallas as pl
from jax.experimental.pallas import tpu as pltpu

N_RAYS = 512         # number of rays
N_SAMPLES = 128      # fixed samples per ray (128 -> one full sublane-tile axis)
TILE_RAYS = 256      # rays per grid step (lane-dense tiles, grid of 2)
GRID_RES = 16        # dense voxel grid resolution (stands in for the sparse grid)
VOXEL_SIZE = 0.25    # cell_size
EMB_DIM = 5          # [sdf, r, g, b, weight]


# ----------------------------------------------------------------------------
# Pallas kernel: SDF->sigma, volume-rendering weights, per-ray accumulations.
# ----------------------------------------------------------------------------
def _render_kernel(invb_ref, trow_ref, sdf_ref, chans_ref, out_ref):
    """Block shapes (S = N_SAMPLES on sublanes, T = TILE_RAYS on lanes):

      invb_ref   (1, 1)     f32   SMEM   1 / (min_beta + |beta|)
      trow_ref   (S, 2)     f32   VMEM   col 0 = t_mid, col 1 = dt (shared)
      sdf_ref    (S, T)     f32   VMEM   (+1e4 at out-of-bounds samples)
      chans_ref  (6, S, T)  bf16  VMEM   [r, g, b, gx, gy, gz] (SoA, lane-dense)
      out_ref    (8, T)     f32   VMEM   rows [r, g, b, depth, nx, ny, nz, acc]
    """
    inv_beta = invb_ref[0, 0]

    sdf = sdf_ref[...]                                   # [S, T] f32
    t_mid = trow_ref[:, 0:1]                             # [S, 1] broadcast col
    dt = trow_ref[:, 1:2]                                # [S, 1]

    # SDFToDensity (Laplace-CDF form, identical to 0.5 + 0.5*sign*expm1(-|s|/b)):
    e = jnp.exp(-jnp.abs(sdf) * inv_beta)
    sigma = inv_beta * jnp.where(sdf > 0.0, 0.5 * e, 1.0 - 0.5 * e)

    # nerfacc.render_weight_from_density (fixed samples per ray):
    #   w = (1 - exp(-sigma*dt)) * exp(-sum_{prev} sigma*dt)
    # Exclusive prefix sum over samples (sublane axis) via two bf16 MXU matmuls
    # against an in-kernel strict-lower-triangular 0/1 mask; tau is split into
    # a bf16-exact hi part plus the bf16 residual so the sum stays ~f32
    # accurate at one MXU pass per dot.
    tau = sigma * dt                                     # [S, T]
    tau_hi = tau.astype(jnp.bfloat16)
    tau_lo = (tau - tau_hi.astype(jnp.float32)).astype(jnp.bfloat16)

    s = tau.shape[0]
    row = jax.lax.broadcasted_iota(jnp.int32, (s, s), 0)
    col = jax.lax.broadcasted_iota(jnp.int32, (s, s), 1)
    lmask = (col < row).astype(jnp.float32).astype(jnp.bfloat16)  # L[k,j]=1 iff j<k

    cum_prev = (jnp.dot(lmask, tau_hi, preferred_element_type=jnp.float32)
                + jnp.dot(lmask, tau_lo, preferred_element_type=jnp.float32))
    w = (1.0 - jnp.exp(-tau)) * jnp.exp(-cum_prev)       # [S, T]

    # Lane-dense SoA channels: bf16 in HBM, f32 math in-kernel.
    r = chans_ref[0].astype(jnp.float32)
    g = chans_ref[1].astype(jnp.float32)
    b = chans_ref[2].astype(jnp.float32)
    gx = chans_ref[3].astype(jnp.float32)
    gy = chans_ref[4].astype(jnp.float32)
    gz = chans_ref[5].astype(jnp.float32)

    # normals = F.normalize(sdf_grads): fold 1/|g| into the weight (EUP rsqrt).
    wn = w * jax.lax.rsqrt(jnp.maximum(gx * gx + gy * gy + gz * gz, 1e-24))

    def _colsum(v):                                      # [S, T] -> [1, T]
        return jnp.sum(v, axis=0, keepdims=True)

    # accumulate_along_rays: one lane-dense [8, T] slab, single unmasked store.
    out_ref[...] = jnp.concatenate(
        [_colsum(w * r), _colsum(w * g), _colsum(w * b),
         _colsum(w * t_mid),                              # raw depth (scaled later)
         _colsum(wn * gx), _colsum(wn * gy), _colsum(wn * gz),
         _colsum(w)], axis=0)


def _render_pallas(inv_beta, trow, sdf_t, chans):
    s, n = sdf_t.shape
    t = min(TILE_RAYS, n)
    assert n % t == 0 and s % 128 == 0 and t % 128 == 0

    return pl.pallas_call(
        _render_kernel,
        grid=(n // t,),
        in_specs=[
            pl.BlockSpec(memory_space=pltpu.MemorySpace.SMEM),  # 1/beta (1,1)
            pl.BlockSpec((s, 2), lambda i: (0, 0)),             # t_mid / dt cols
            pl.BlockSpec((s, t), lambda i: (0, i)),             # sdf       f32
            pl.BlockSpec((6, s, t), lambda i: (0, 0, i)),       # channels  bf16
        ],
        out_specs=pl.BlockSpec((8, t), lambda i: (0, i)),
        out_shape=jax.ShapeDtypeStruct((8, n), jnp.float32),
        compiler_params=pltpu.CompilerParams(
            dimension_semantics=("parallel",)),
    )(inv_beta, trow, sdf_t, chans)


# ----------------------------------------------------------------------------
# Plain-JAX glue: dense-grid trilerp + closed-form SDF gradient.
# ----------------------------------------------------------------------------
def _trilerp_and_grad(grid_emb, pts):
    """Trilinear interp of a dense [G,G,G,C] grid at pts [P,3] + analytic sdf grad."""
    gdim = grid_emb.shape[0]
    u = pts / VOXEL_SIZE
    u0 = jnp.floor(u)
    f = u - u0
    i0 = u0.astype(jnp.int32)
    in_bounds = jnp.all((i0 >= 0) & (i0 <= gdim - 2), axis=-1)
    i0 = jnp.clip(i0, 0, gdim - 2)
    fx, fy, fz = f[:, 0], f[:, 1], f[:, 2]
    ix, iy, iz = i0[:, 0], i0[:, 1], i0[:, 2]

    emb = jnp.zeros((pts.shape[0], grid_emb.shape[-1]), grid_emb.dtype)
    gx = jnp.zeros((pts.shape[0],), grid_emb.dtype)
    gy = jnp.zeros_like(gx)
    gz = jnp.zeros_like(gx)
    for dx in (0, 1):
        wx = fx if dx else 1.0 - fx
        sx = 1.0 if dx else -1.0
        for dy in (0, 1):
            wy = fy if dy else 1.0 - fy
            sy = 1.0 if dy else -1.0
            for dz in (0, 1):
                wz = fz if dz else 1.0 - fz
                sz = 1.0 if dz else -1.0
                corner = grid_emb[ix + dx, iy + dy, iz + dz]   # [P, C] gather
                emb = emb + (wx * wy * wz)[:, None] * corner
                sdf_c = corner[:, 0]
                gx = gx + sx * wy * wz * sdf_c
                gy = gy + wx * sy * wz * sdf_c
                gz = gz + wx * wy * sz * sdf_c
    grad = jnp.stack([gx, gy, gz], axis=-1) / VOXEL_SIZE       # d sdf / d x
    return emb, grad, in_bounds


def _prepare_inputs(params, rays_o, rays_d, rays_d_norm, near, far):
    n, s = rays_o.shape[0], N_SAMPLES
    # TODO(synk): sparse hash-grid ray_find_near_far / ray_sample (variable
    # samples per ray + prefix_sum_ray_samples) replaced by fixed-count uniform
    # sampling in [near, far] over a dense voxel grid.
    edges = jnp.linspace(near, far, s + 1, dtype=jnp.float32)
    t_mid = 0.5 * (edges[:-1] + edges[1:])                     # [S]
    dt = edges[1:] - edges[:-1]                                # [S]
    trow = jnp.stack([t_mid, dt], axis=1)                      # [S, 2] shared cols

    x = rays_o[:, None, :] + t_mid[None, :, None] * rays_d[:, None, :]  # [N,S,3]
    emb, grads, in_b = _trilerp_and_grad(params["grid_embeddings"],
                                         x.reshape(-1, 3))

    sdfs = emb[:, 0].reshape(n, s)
    in_b = in_b.reshape(n, s)
    # Out-of-bounds samples -> huge positive SDF -> sigma (and weight) == 0,
    # replacing the explicit int8 hit-mask stream of the previous version.
    sdfs = jnp.where(in_b, sdfs, 1e4).astype(jnp.float32)
    sdf_t = sdfs.T                                             # [S, N] sample-major

    rgbs = emb[:, 1:4].reshape(n, s, 3)
    g3 = grads.reshape(n, s, 3)
    # SoA channel-major [6, S, N] in bf16: lane-dense tiles, half the HBM bytes.
    chans = jnp.transpose(jnp.concatenate([rgbs, g3], axis=-1), (2, 1, 0))
    chans = chans.astype(jnp.bfloat16)

    # SDFToDensity parameters: beta = min_beta + |beta|, min_beta = voxel_size.
    inv_beta = (1.0 / (VOXEL_SIZE + jnp.abs(params["beta"][0])))
    inv_beta = inv_beta.reshape(1, 1).astype(jnp.float32)
    inv_dnorm = (1.0 / rays_d_norm).astype(jnp.float32)        # [N, 1] (post-scale)

    return inv_beta, trow, sdf_t, chans, inv_dnorm, grads


def plain_voxels_forward(params, rays_o, rays_d, rays_d_norm, near, far):
    n = rays_o.shape[0]
    (inv_beta, trow, sdf_t, chans,
     inv_dnorm, sdf_grads) = _prepare_inputs(params, rays_o, rays_d,
                                             rays_d_norm, near, far)
    packed = _render_pallas(inv_beta, trow, sdf_t, chans)      # [8, N]
    pk = packed.T                                              # [N, 8]
    rays_near = jnp.full((n, 1), near, jnp.float32) / rays_d_norm
    rays_far = jnp.full((n, 1), far, jnp.float32) / rays_d_norm
    return {"rgb": pk[:, 0:3],
            "depth": pk[:, 3:4] * inv_dnorm,                   # depth / rays_d_norm
            "normal": pk[:, 4:7],
            "weights": pk[:, 7:8],
            "sdf_grads": sdf_grads, "near": rays_near, "far": rays_far}


# ----------------------------------------------------------------------------
# Pure-JAX reference of the kernel math (for the correctness check).
# ----------------------------------------------------------------------------
def _render_ref(inv_beta, trow, sdf_t, chans):
    ib = inv_beta[0, 0]
    t_mid = trow[:, 0:1]
    dt = trow[:, 1:2]
    e = jnp.exp(-jnp.abs(sdf_t) * ib)
    sigma = ib * jnp.where(sdf_t > 0.0, 0.5 * e, 1.0 - 0.5 * e)
    tau = sigma * dt
    cum_prev = jnp.cumsum(tau, axis=0) - tau
    w = (1.0 - jnp.exp(-tau)) * jnp.exp(-cum_prev)
    ch = chans.astype(jnp.float32)
    r, g, b, gx, gy, gz = ch[0], ch[1], ch[2], ch[3], ch[4], ch[5]
    wn = w * jax.lax.rsqrt(jnp.maximum(gx * gx + gy * gy + gz * gz, 1e-24))
    rows = [jnp.sum(w * r, 0), jnp.sum(w * g, 0), jnp.sum(w * b, 0),
            jnp.sum(w * t_mid, 0),
            jnp.sum(wn * gx, 0), jnp.sum(wn * gy, 0), jnp.sum(wn * gz, 0),
            jnp.sum(w, 0)]
    return jnp.stack(rows, axis=0)


if __name__ == "__main__":
    key = jax.random.PRNGKey(0)
    k_grid, k_o, k_d = jax.random.split(key, 3)

    # Deterministic synthetic parameters (module __init__ shapes):
    #   grid embeddings: [G, G, G, 5] (sdf, r, g, b, weight), beta: [1]
    params = {
        "grid_embeddings": 0.1 * jax.random.normal(
            k_grid, (GRID_RES, GRID_RES, GRID_RES, EMB_DIM), jnp.float32),
        "beta": jnp.array([2.0 * VOXEL_SIZE], jnp.float32),
    }

    # Rays inside the dense grid (grid spans [0, (GRID_RES-1) * VOXEL_SIZE]).
    rays_o = 1.5 + jax.random.uniform(k_o, (N_RAYS, 3), jnp.float32)
    rays_d = jax.random.normal(k_d, (N_RAYS, 3), jnp.float32)
    rays_d_norm = jnp.linalg.norm(rays_d, axis=-1, keepdims=True)
    rays_d = rays_d / rays_d_norm          # unit directions for sampling
    near, far = 0.1, 1.2

    out = jax.jit(plain_voxels_forward, static_argnums=(4, 5))(
        params, rays_o, rays_d, rays_d_norm, near, far)
    jax.block_until_ready(out)

    # Cross-check the Pallas kernel against the pure-JAX reference on the
    # exact same (bf16-quantized) kernel inputs.
    (inv_beta, trow, sdf_t, chans,
     inv_dnorm, _) = _prepare_inputs(params, rays_o, rays_d, rays_d_norm,
                                     near, far)
    got = _render_pallas(inv_beta, trow, sdf_t, chans)
    ref = _render_ref(inv_beta, trow, sdf_t, chans)
    jax.block_until_ready((got, ref))
    if not jnp.allclose(got, ref, rtol=1e-3, atol=1e-3):
        max_err = jnp.max(jnp.abs(got - ref))
        raise AssertionError(
            f"Pallas kernel mismatch vs reference (max abs err = {max_err})")

    print("KERNEL_OK")
</pallas_src>

<mosaic_0001>
module attributes {stable_mosaic.version = 11 : i64} {
  func.func @_render_kernel(%arg0: i32, %arg1: memref<1x1xf32, #tpu.memory_space<smem>>, %arg2: memref<128x2xf32, #tpu.memory_space<vmem>>, %arg3: memref<128x256xf32, #tpu.memory_space<vmem>>, %arg4: memref<6x128x256xbf16, #tpu.memory_space<vmem>>, %arg5: memref<8x256xf32, #tpu.memory_space<vmem>>) attributes {dimension_semantics = [#tpu.dimension_semantics<parallel>], iteration_bounds = array<i64: 2>, scalar_prefetch = 0 : i64, scratch_operands = 0 : i64, tpu.core_type = #tpu.core_type<tc>, window_params = [{transform_indices = @transform_0, window_bounds = array<i64: 1, 1>}, {pipeline_mode = #tpu.pipeline_mode<synchronous>, transform_indices = @transform_1, window_bounds = array<i64: 128, 2>}, {transform_indices = @transform_2, window_bounds = array<i64: 128, 256>}, {transform_indices = @transform_3, window_bounds = array<i64: 6, 128, 256>}, {transform_indices = @transform_4, window_bounds = array<i64: 8, 256>}]} {
    %c0 = arith.constant 0 : index
    %c0_0 = arith.constant 0 : index
    %0 = memref.load %arg1[%c0, %c0_0] : memref<1x1xf32, #tpu.memory_space<smem>>
    %c0_1 = arith.constant 0 : index
    %c0_2 = arith.constant 0 : index
    %1 = vector.load %arg3[%c0_1, %c0_2] : memref<128x256xf32, #tpu.memory_space<vmem>>, vector<128x256xf32>
    %c0_3 = arith.constant 0 : index
    %c0_4 = arith.constant 0 : index
    %2 = vector.load %arg2[%c0_3, %c0_4] : memref<128x2xf32, #tpu.memory_space<vmem>>, vector<128x1xf32>
    %c0_5 = arith.constant 0 : index
    %c1 = arith.constant 1 : index
    %3 = vector.load %arg2[%c0_5, %c1] : memref<128x2xf32, #tpu.memory_space<vmem>>, vector<128x1xf32>
    %4 = math.absf %1 : vector<128x256xf32>
    %cst = arith.constant 0.000000e+00 : f32
    %5 = vector.broadcast %cst : f32 to vector<128x256xf32>
    %6 = arith.subf %5, %4 : vector<128x256xf32>
    %7 = vector.broadcast %0 : f32 to vector<128x256xf32>
    %8 = arith.mulf %6, %7 : vector<128x256xf32>
    %9 = math.exp %8 : vector<128x256xf32>
    %cst_6 = arith.constant 0.000000e+00 : f32
    %10 = vector.broadcast %cst_6 : f32 to vector<128x256xf32>
    %11 = arith.cmpf ogt, %1, %10 : vector<128x256xf32>
    %cst_7 = arith.constant 5.000000e-01 : f32
    %12 = vector.broadcast %cst_7 : f32 to vector<128x256xf32>
    %13 = arith.mulf %12, %9 : vector<128x256xf32>
    %cst_8 = arith.constant 5.000000e-01 : f32
    %14 = vector.broadcast %cst_8 : f32 to vector<128x256xf32>
    %15 = arith.mulf %14, %9 : vector<128x256xf32>
    %cst_9 = arith.constant 1.000000e+00 : f32
    %16 = vector.broadcast %cst_9 : f32 to vector<128x256xf32>
    %17 = arith.subf %16, %15 : vector<128x256xf32>
    %18 = arith.select %11, %13, %17 : vector<128x256xi1>, vector<128x256xf32>
    %19 = vector.broadcast %0 : f32 to vector<128x256xf32>
    %20 = arith.mulf %19, %18 : vector<128x256xf32>
    %21 = vector.broadcast %3 : vector<128x1xf32> to vector<128x256xf32>
    %22 = arith.mulf %20, %21 : vector<128x256xf32>
    %23 = arith.truncf %22 : vector<128x256xf32> to vector<128x256xbf16>
    %24 = arith.extf %23 : vector<128x256xbf16> to vector<128x256xf32>
    %25 = arith.subf %22, %24 : vector<128x256xf32>
    %26 = arith.truncf %25 : vector<128x256xf32> to vector<128x256xbf16>
    %27 = tpu.iota {dimensions = array<i32: 0>} : vector<128x128xi32>
    %28 = tpu.iota {dimensions = array<i32: 1>} : vector<128x128xi32>
    %29 = arith.cmpi slt, %28, %27 : vector<128x128xi32>
    %30 = arith.extui %29 : vector<128x128xi1> to vector<128x128xi32>
    %31 = arith.sitofp %30 : vector<128x128xi32> to vector<128x128xf32>
    %32 = arith.truncf %31 : vector<128x128xf32> to vector<128x128xbf16>
    %cst_10 = arith.constant dense<0.000000e+00> : vector<128x256xf32>
    %33 = tpu.matmul %32, %23, %cst_10 {dimension_numbers = #tpu.dot_dimension_numbers<[1], [0], [0], [1], [0, 0, 1, 1], [], []>} : vector<128x128xbf16>, vector<128x256xbf16>, vector<128x256xf32> -> vector<128x256xf32>
    %cst_11 = arith.constant dense<0.000000e+00> : vector<128x256xf32>
    %34 = tpu.matmul %32, %26, %cst_11 {dimension_numbers = #tpu.dot_dimension_numbers<[1], [0], [0], [1], [0, 0, 1, 1], [], []>} : vector<128x128xbf16>, vector<128x256xbf16>, vector<128x256xf32> -> vector<128x256xf32>
    %35 = arith.addf %33, %34 : vector<128x256xf32>
    %cst_12 = arith.constant 0.000000e+00 : f32
    %36 = vector.broadcast %cst_12 : f32 to vector<128x256xf32>
    %37 = arith.subf %36, %22 : vector<128x256xf32>
    %38 = math.exp %37 : vector<128x256xf32>
    %cst_13 = arith.constant 1.000000e+00 : f32
    %39 = vector.broadcast %cst_13 : f32 to vector<128x256xf32>
    %40 = arith.subf %39, %38 : vector<128x256xf32>
    %cst_14 = arith.constant 0.000000e+00 : f32
    %41 = vector.broadcast %cst_14 : f32 to vector<128x256xf32>
    %42 = arith.subf %41, %35 : vector<128x256xf32>
    %43 = math.exp %42 : vector<128x256xf32>
    %44 = arith.mulf %40, %43 : vector<128x256xf32>
    %c0_15 = arith.constant 0 : index
    %c0_16 = arith.constant 0 : index
    %c0_17 = arith.constant 0 : index
    %45 = vector.load %arg4[%c0_15, %c0_16, %c0_17] : memref<6x128x256xbf16, #tpu.memory_space<vmem>>, vector<1x128x256xbf16>
    %46 = vector.shape_cast %45 : vector<1x128x256xbf16> to vector<128x256xbf16>
    %47 = arith.extf %46 : vector<128x256xbf16> to vector<128x256xf32>
    %c1_18 = arith.constant 1 : index
    %c0_19 = arith.constant 0 : index
    %c0_20 = arith.constant 0 : index
    %48 = vector.load %arg4[%c1_18, %c0_19, %c0_20] : memref<6x128x256xbf16, #tpu.memory_space<vmem>>, vector<1x128x256xbf16>
    %49 = vector.shape_cast %48 : vector<1x128x256xbf16> to vector<128x256xbf16>
    %50 = arith.extf %49 : vector<128x256xbf16> to vector<128x256xf32>
    %c2 = arith.constant 2 : index
    %c0_21 = arith.constant 0 : index
    %c0_22 = arith.constant 0 : index
    %51 = vector.load %arg4[%c2, %c0_21, %c0_22] : memref<6x128x256xbf16, #tpu.memory_space<vmem>>, vector<1x128x256xbf16>
    %52 = vector.shape_cast %51 : vector<1x128x256xbf16> to vector<128x256xbf16>
    %53 = arith.extf %52 : vector<128x256xbf16> to vector<128x256xf32>
    %c3 = arith.constant 3 : index
    %c0_23 = arith.constant 0 : index
    %c0_24 = arith.constant 0 : index
    %54 = vector.load %arg4[%c3, %c0_23, %c0_24] : memref<6x128x256xbf16, #tpu.memory_space<vmem>>, vector<1x128x256xbf16>
    %55 = vector.shape_cast %54 : vector<1x128x256xbf16> to vector<128x256xbf16>
    %56 = arith.extf %55 : vector<128x256xbf16> to vector<128x256xf32>
    %c4 = arith.constant 4 : index
    %c0_25 = arith.constant 0 : index
    %c0_26 = arith.constant 0 : index
    %57 = vector.load %arg4[%c4, %c0_25, %c0_26] : memref<6x128x256xbf16, #tpu.memory_space<vmem>>, vector<1x128x256xbf16>
    %58 = vector.shape_cast %57 : vector<1x128x256xbf16> to vector<128x256xbf16>
    %59 = arith.extf %58 : vector<128x256xbf16> to vector<128x256xf32>
    %c5 = arith.constant 5 : index
    %c0_27 = arith.constant 0 : index
    %c0_28 = arith.constant 0 : index
    %60 = vector.load %arg4[%c5, %c0_27, %c0_28] : memref<6x128x256xbf16, #tpu.memory_space<vmem>>, vector<1x128x256xbf16>
    %61 = vector.shape_cast %60 : vector<1x128x256xbf16> to vector<128x256xbf16>
    %62 = arith.extf %61 : vector<128x256xbf16> to vector<128x256xf32>
    %63 = arith.mulf %56, %56 : vector<128x256xf32>
    %64 = arith.mulf %59, %59 : vector<128x256xf32>
    %65 = arith.addf %63, %64 : vector<128x256xf32>
    %66 = arith.mulf %62, %62 : vector<128x256xf32>
    %67 = arith.addf %65, %66 : vector<128x256xf32>
    %cst_29 = arith.constant 1.000000e-24 : f32
    %68 = vector.broadcast %cst_29 : f32 to vector<128x256xf32>
    %69 = arith.maximumf %67, %68 : vector<128x256xf32>
    %70 = math.rsqrt %69 : vector<128x256xf32>
    %71 = arith.mulf %44, %70 : vector<128x256xf32>
    %72 = arith.mulf %44, %47 : vector<128x256xf32>
    %cst_30 = arith.constant dense<0.000000e+00> : vector<256xf32>
    %73 = vector.multi_reduction <add>, %72, %cst_30 [0] : vector<128x256xf32> to vector<256xf32>
    %74 = vector.shape_cast %73 : vector<256xf32> to vector<1x256xf32>
    %75 = arith.mulf %44, %50 : vector<128x256xf32>
    %cst_31 = arith.constant dense<0.000000e+00> : vector<256xf32>
    %76 = vector.multi_reduction <add>, %75, %cst_31 [0] : vector<128x256xf32> to vector<256xf32>
    %77 = vector.shape_cast %76 : vector<256xf32> to vector<1x256xf32>
    %78 = arith.mulf %44, %53 : vector<128x256xf32>
    %cst_32 = arith.constant dense<0.000000e+00> : vector<256xf32>
    %79 = vector.multi_reduction <add>, %78, %cst_32 [0] : vector<128x256xf32> to vector<256xf32>
    %80 = vector.shape_cast %79 : vector<256xf32> to vector<1x256xf32>
    %81 = vector.broadcast %2 : vector<128x1xf32> to vector<128x256xf32>
    %82 = arith.mulf %44, %81 : vector<128x256xf32>
    %cst_33 = arith.constant dense<0.000000e+00> : vector<256xf32>
    %83 = vector.multi_reduction <add>, %82, %cst_33 [0] : vector<128x256xf32> to vector<256xf32>
    %84 = vector.shape_cast %83 : vector<256xf32> to vector<1x256xf32>
    %85 = arith.mulf %71, %56 : vector<128x256xf32>
    %cst_34 = arith.constant dense<0.000000e+00> : vector<256xf32>
    %86 = vector.multi_reduction <add>, %85, %cst_34 [0] : vector<128x256xf32> to vector<256xf32>
    %87 = vector.shape_cast %86 : vector<256xf32> to vector<1x256xf32>
    %88 = arith.mulf %71, %59 : vector<128x256xf32>
    %cst_35 = arith.constant dense<0.000000e+00> : vector<256xf32>
    %89 = vector.multi_reduction <add>, %88, %cst_35 [0] : vector<128x256xf32> to vector<256xf32>
    %90 = vector.shape_cast %89 : vector<256xf32> to vector<1x256xf32>
    %91 = arith.mulf %71, %62 : vector<128x256xf32>
    %cst_36 = arith.constant dense<0.000000e+00> : vector<256xf32>
    %92 = vector.multi_reduction <add>, %91, %cst_36 [0] : vector<128x256xf32> to vector<256xf32>
    %93 = vector.shape_cast %92 : vector<256xf32> to vector<1x256xf32>
    %cst_37 = arith.constant dense<0.000000e+00> : vector<256xf32>
    %94 = vector.multi_reduction <add>, %44, %cst_37 [0] : vector<128x256xf32> to vector<256xf32>
    %95 = vector.shape_cast %94 : vector<256xf32> to vector<1x256xf32>
    %96 = tpu.concatenate %74, %77, %80, %84, %87, %90, %93, %95 in 0 : vector<1x256xf32>, vector<1x256xf32>, vector<1x256xf32>, vector<1x256xf32>, vector<1x256xf32>, vector<1x256xf32>, vector<1x256xf32>, vector<1x256xf32> -> vector<8x256xf32>
    %c0_38 = arith.constant 0 : index
    %c0_39 = arith.constant 0 : index
    %97 = vector.load %arg5[%c0_38, %c0_39] : memref<8x256xf32, #tpu.memory_space<vmem>>, vector<8x256xf32>
    tpu.vector_store %arg5[%c0_38, %c0_39], %96 {strides = array<i32>} : memref<8x256xf32, #tpu.memory_space<vmem>>, vector<8x256xf32>,
    return
  }
  func.func @transform_0(%arg0: i32) -> (i32, i32) {
    %c0_i32 = arith.constant 0 : i32
    %c0_i32_0 = arith.constant 0 : i32
    %c0_i32_1 = arith.constant 0 : i32
    return %c0_i32, %c0_i32_0 : i32, i32
  }
  func.func @transform_1(%arg0: i32) -> (i32, i32) {
    %c0_i32 = arith.constant 0 : i32
    %c0_i32_0 = arith.constant 0 : i32
    %c0_i32_1 = arith.constant 0 : i32
    return %c0_i32, %c0_i32_0 : i32, i32
  }
  func.func @transform_2(%arg0: i32) -> (i32, i32) {
    %c0_i32 = arith.constant 0 : i32
    %c0_i32_0 = arith.constant 0 : i32
    return %c0_i32, %arg0 : i32, i32
  }
  func.func @transform_3(%arg0: i32) -> (i32, i32, i32) {
    %c0_i32 = arith.constant 0 : i32
    %c0_i32_0 = arith.constant 0 : i32
    %c0_i32_1 = arith.constant 0 : i32
    return %c0_i32, %c0_i32_0, %arg0 : i32, i32, i32
  }
  func.func @transform_4(%arg0: i32) -> (i32, i32) {
    %c0_i32 = arith.constant 0 : i32
    %c0_i32_0 = arith.constant 0 : i32
    return %c0_i32, %arg0 : i32, i32
  }
}

</mosaic_0001>

<bundles_post_ra>
// kernel: plain_voxels_forward.1
= control target key start
LH: loop header
LB: loop body
LE: loop exit
PB: predicated region body
PF: predicated region fallthrough
CT: control target
= control target key end

     0   :  { %s6496_s0 = inlined_call_operand.<no memory space> [shape: f32[1,1], index: 0, kind: input, shape index: {}]   ;;  %s6497_s1 = inlined_call_operand.vmem [shape: f32[128,2], index: 1, kind: input, shape index: {}]   ;;  %s6498_s2 = inlined_call_operand.vmem [shape: f32[128,512], index: 2, kind: input, shape index: {}]   ;;  %s6499_s3 = inlined_call_operand.vmem [shape: bf16[6,128,512], index: 3, kind: input, shape index: {}]   ;;  %s6500_s4 = inlined_call_operand.vmem [shape: f32[8,512], index: 4, kind: output, shape index: {}]  }
   0x1   :  { %9 = sst [smem:[#allocation2]] %s6496_s0 }
   0x2   :  { %s3652_s17 = smov 0   ;;  %s3654_s18 = smov 0  }
   0x3   :  { %s3656_s19 = smov 0  }
   0x4 LB: > { %s3131_s0 = sadd.s32 4294967295, %s3619_s19   ;;  %s3669_s20 = sadd.s32 1, %s3619_s19   ;;  %s3619_s19 = sphi %s3656_s19, %s7120_s19   ;;  %s3615_s18 = sphi %s3654_s18, %s7119_s18   ;;  %s3611_s17 = sphi %s3652_s17, %s7118_s17  }
   0x5   : > { %s61_s21 = ssub.s32 %s3619_s19, %s3669_s20  ;;  %s64_s22 = sadd.s32 1, %s3615_s18 }
   0x6   : > { %p62_p0 = scmp.eq.s32.totalorder %s61_s21, 0  ;;  %p71_p1 = scmp.ne.s32.totalorder %s3615_s18, %s3611_s17 }
   0x7   : > { %p72_p2 = scmp.eq.s32.totalorder %s3619_s19, 0  ;;  %p3134_p4 = scmp.ge.s32.totalorder %s3619_s19, 2 }
   0x8   : > { %s3678_s23 = scalar_select %p62_p0, %s3615_s18, %s64_s22  }
   0x9   : > { %p3680_p3 = por %p72_p2, %p71_p1  ;;  %155 = sbr.rel (%p3134_p4) target bundleno = 88 (0x58), region = 24 }
  0x10   : > { %158 = sbr.rel (!%p3680_p3) target bundleno = 36 (0x24), region = 28  ;;  %s160_s25 = sand.u32 (%p3680_p3), 1, %s3615_s18  }
  0x11   : > { %s3274_s26 = sshll.u32 (%p3680_p3), %s3619_s19, 4  ;;  %s3135_s27 = sshll.u32 (%p3680_p3), %s160_s25, 8 }
  0x12   : > { %s3692_s30 = scalar_lea.vmem (%p3680_p3), %s6498_s2, %s3274_s26  ;;  %s3697_s5 = scalar_lea.vmem (%p3680_p3), [#allocation3], %s3135_s27 }
  0x13   : > { %v178_v0 = vld [vmem:[%s3692_s30] sm:$0xff] (%p3680_p3)  ;;  %v180_v1 = vld [vmem:[%s3692_s30 + $0x8] sm:$0xff] (%p3680_p3) }
  0x14   : > { %v182_v2 = vld [vmem:[%s3692_s30 + $0x20] sm:$0xff] (%p3680_p3)  ;;  %179 = vst [vmem:[%s3697_s5] sm:$0xff] (%p3680_p3), %v178_v0  ;;  %181 = vst [vmem:[%s3697_s5 + $0x8] sm:$0xff] (%p3680_p3), %v180_v1  ;;  %v184_v3 = vld [vmem:[%s3692_s30 + $0x28] sm:$0xff] (%p3680_p3) }
  0x15   : > { %183 = vst [vmem:[%s3697_s5 + $0x10] sm:$0xff] (%p3680_p3), %v182_v2  ;;  %v186_v4 = vld [vmem:[%s3692_s30 + $0x40] sm:$0xff] (%p3680_p3)  ;;  %v188_v5 = vld [vmem:[%s3692_s30 + $0x48] sm:$0xff] (%p3680_p3)  ;;  %185 = vst [vmem:[%s3697_s5 + $0x18] sm:$0xff] (%p3680_p3), %v184_v3 }
  0x16   : > { %187 = vst [vmem:[%s3697_s5 + $0x20] sm:$0xff] (%p3680_p3), %v186_v4  ;;  %189 = vst [vmem:[%s3697_s5 + $0x28] sm:$0xff] (%p3680_p3), %v188_v5  ;;  %v190_v6 = vld [vmem:[%s3692_s30 + $0x60] sm:$0xff] (%p3680_p3)  ;;  %v192_v7 = vld [vmem:[%s3692_s30 + $0x68] sm:$0xff] (%p3680_p3) }
  0x17   : > { %v194_v8 = vld [vmem:[%s3692_s30 + $0x80] sm:$0xff]  ;;  %191 = vst [vmem:[%s3697_s5 + $0x30] sm:$0xff] %v190_v6  ;;  %193 = vst [vmem:[%s3697_s5 + $0x38] sm:$0xff] %v192_v7  ;;  %v196_v9 = vld [vmem:[%s3692_s30 + $0x88] sm:$0xff] }
  0x18   : > { %195 = vst [vmem:[%s3697_s5 + $0x40] sm:$0xff] %v194_v8  ;;  %v198_v10 = vld [vmem:[%s3692_s30 + $0xa0] sm:$0xff]  ;;  %v200_v11 = vld [vmem:[%s3692_s30 + $0xa8] sm:$0xff]  ;;  %197 = vst [vmem:[%s3697_s5 + $0x48] sm:$0xff] %v196_v9 }
  0x19   : > { %199 = vst [vmem:[%s3697_s5 + $0x50] sm:$0xff] %v198_v10  ;;  %201 = vst [vmem:[%s3697_s5 + $0x58] sm:$0xff] %v200_v11  ;;  %v202_v12 = vld [vmem:[%s3692_s30 + $0xc0] sm:$0xff]  ;;  %v204_v13 = vld [vmem:[%s3692_s30 + $0xc8] sm:$0xff] }
  0x1a   : > { %v206_v14 = vld [vmem:[%s3692_s30 + $0xe0] sm:$0xff]  ;;  %203 = vst [vmem:[%s3697_s5 + $0x60] sm:$0xff] %v202_v12  ;;  %205 = vst [vmem:[%s3697_s5 + $0x68] sm:$0xff] %v204_v13  ;;  %v208_v15 = vld [vmem:[%s3692_s30 + $0xe8] sm:$0xff] }
  0x1b   : > { %207 = vst [vmem:[%s3697_s5 + $0x70] sm:$0xff] %v206_v14  ;;  %v210_v16 = vld [vmem:[%s3692_s30 + $0x100] sm:$0xff]  ;;  %v212_v17 = vld [vmem:[%s3692_s30 + $0x108] sm:$0xff]  ;;  %209 = vst [vmem:[%s3697_s5 + $0x78] sm:$0xff] %v208_v15 }
  0x1c   : > { %211 = vst [vmem:[%s3697_s5 + $0x80] sm:$0xff] %v210_v16  ;;  %213 = vst [vmem:[%s3697_s5 + $0x88] sm:$0xff] %v212_v17  ;;  %v214_v18 = vld [vmem:[%s3692_s30 + $0x120] sm:$0xff]  ;;  %v216_v19 = vld [vmem:[%s3692_s30 + $0x128] sm:$0xff] }
  0x1d   : > { %v218_v20 = vld [vmem:[%s3692_s30 + $0x140] sm:$0xff]  ;;  %215 = vst [vmem:[%s3697_s5 + $0x90] sm:$0xff] %v214_v18  ;;  %217 = vst [vmem:[%s3697_s5 + $0x98] sm:$0xff] %v216_v19  ;;  %v220_v21 = vld [vmem:[%s3692_s30 + $0x148] sm:$0xff] }
  0x1e   : > { %219 = vst [vmem:[%s3697_s5 + $0xa0] sm:$0xff] %v218_v20  ;;  %v222_v22 = vld [vmem:[%s3692_s30 + $0x160] sm:$0xff]  ;;  %v224_v23 = vld [vmem:[%s3692_s30 + $0x168] sm:$0xff]  ;;  %221 = vst [vmem:[%s3697_s5 + $0xa8] sm:$0xff] %v220_v21 }
  0x1f   : > { %223 = vst [vmem:[%s3697_s5 + $0xb0] sm:$0xff] %v222_v22  ;;  %225 = vst [vmem:[%s3697_s5 + $0xb8] sm:$0xff] %v224_v23  ;;  %v226_v24 = vld [vmem:[%s3692_s30 + $0x180] sm:$0xff]  ;;  %v228_v25 = vld [vmem:[%s3692_s30 + $0x188] sm:$0xff] }
  0x20   : > { %v230_v26 = vld [vmem:[%s3692_s30 + $0x1a0] sm:$0xff]  ;;  %227 = vst [vmem:[%s3697_s5 + $0xc0] sm:$0xff] %v226_v24  ;;  %229 = vst [vmem:[%s3697_s5 + $0xc8] sm:$0xff] %v228_v25  ;;  %v232_v27 = vld [vmem:[%s3692_s30 + $0x1a8] sm:$0xff] }
  0x21   : > { %231 = vst [vmem:[%s3697_s5 + $0xd0] sm:$0xff] %v230_v26  ;;  %v234_v28 = vld [vmem:[%s3692_s30 + $0x1c0] sm:$0xff]  ;;  %v236_v29 = vld [vmem:[%s3692_s30 + $0x1c8] sm:$0xff]  ;;  %233 = vst [vmem:[%s3697_s5 + $0xd8] sm:$0xff] %v232_v27 }
  0x22   : > { %235 = vst [vmem:[%s3697_s5 + $0xe0] sm:$0xff] %v234_v28  ;;  %237 = vst [vmem:[%s3697_s5 + $0xe8] sm:$0xff] %v236_v29  ;;  %v238_v30 = vld [vmem:[%s3692_s30 + $0x1e0] sm:$0xff]  ;;  %v240_v31 = vld [vmem:[%s3692_s30 + $0x1e8] sm:$0xff] }
  0x23   : > { %239 = vst [vmem:[%s3697_s5 + $0xf0] sm:$0xff] %v238_v30  ;;  %241 = vst [vmem:[%s3697_s5 + $0xf8] sm:$0xff] %v240_v31 }
  0x24 PF: > { %247 = sbr.rel (!%p3680_p3) target bundleno = 88 (0x58), region = 51  ;;  %s249_s6 = sand.u32 (%p3680_p3), 1, %s3615_s18  }
  0x25   : > { %s3275_s7 = sshll.u32 (%p3680_p3), %s3619_s19, 3  ;;  %s3308_s8 = smul.u32 (%p3680_p3), 768, %s249_s6 }
  0x26   : > { %s3767_s11 = scalar_lea.vmem (%p3680_p3), %s6499_s3, %s3275_s7 }
  0x27   : > { %v472_v32 = vld [vmem:[%s3767_s11] sm:$0xff] (%p3680_p3)  ;;  %v474_v33 = vld [vmem:[%s3767_s11 + $0x10] sm:$0xff] (%p3680_p3)  ;;  %s3775_s12 = scalar_lea.vmem (%p3680_p3), [#allocation4], %s3308_s8 }
  0x28   : > { %v476_v34 = vld [vmem:[%s3767_s11 + $0x20] sm:$0xff] (%p3680_p3)  ;;  %v478_v35 = vld [vmem:[%s3767_s11 + $0x30] sm:$0xff] (%p3680_p3)  ;;  %473 = vst [vmem:[%s3775_s12] sm:$0xff] (%p3680_p3), %v472_v32  ;;  %475 = vst [vmem:[%s3775_s12 + $0x8] sm:$0xff] (%p3680_p3), %v474_v33 }
  0x29   : > { %v480_v36 = vld [vmem:[%s3767_s11 + $0x40] sm:$0xff] (%p3680_p3)  ;;  %v482_v37 = vld [vmem:[%s3767_s11 + $0x50] sm:$0xff] (%p3680_p3)  ;;  %477 = vst [vmem:[%s3775_s12 + $0x10] sm:$0xff] (%p3680_p3), %v476_v34  ;;  %479 = vst [vmem:[%s3775_s12 + $0x18] sm:$0xff] (%p3680_p3), %v478_v35 }
  0x2a   : > { %481 = vst [vmem:[%s3775_s12 + $0x20] sm:$0xff] (%p3680_p3), %v480_v36  ;;  %483 = vst [vmem:[%s3775_s12 + $0x28] sm:$0xff] (%p3680_p3), %v482_v37  ;;  %v484_v38 = vld [vmem:[%s3767_s11 + $0x60] sm:$0xff] (%p3680_p3)  ;;  %v486_v39 = vld [vmem:[%s3767_s11 + $0x70] sm:$0xff] (%p3680_p3) }
  0x2b   : > { %v488_v40 = vld [vmem:[%s3767_s11 + $0x80] sm:$0xff]  ;;  %485 = vst [vmem:[%s3775_s12 + $0x30] sm:$0xff] %v484_v38  ;;  %487 = vst [vmem:[%s3775_s12 + $0x38] sm:$0xff] %v486_v39  ;;  %v490_v41 = vld [vmem:[%s3767_s11 + $0x90] sm:$0xff] }
  0x2c   : > { %489 = vst [vmem:[%s3775_s12 + $0x40] sm:$0xff] %v488_v40  ;;  %v492_v42 = vld [vmem:[%s3767_s11 + $0xa0] sm:$0xff]  ;;  %v494_v43 = vld [vmem:[%s3767_s11 + $0xb0] sm:$0xff]  ;;  %491 = vst [vmem:[%s3775_s12 + $0x48] sm:$0xff] %v490_v41 }
  0x2d   : > { %493 = vst [vmem:[%s3775_s12 + $0x50] sm:$0xff] %v492_v42  ;;  %495 = vst [vmem:[%s3775_s12 + $0x58] sm:$0xff] %v494_v43  ;;  %v496_v44 = vld [vmem:[%s3767_s11 + $0xc0] sm:$0xff]  ;;  %v498_v45 = vld [vmem:[%s3767_s11 + $0xd0] sm:$0xff] }
  0x2e   : > { %v500_v46 = vld [vmem:[%s3767_s11 + $0xe0] sm:$0xff]  ;;  %497 = vst [vmem:[%s3775_s12 + $0x60] sm:$0xff] %v496_v44  ;;  %499 = vst [vmem:[%s3775_s12 + $0x68] sm:$0xff] %v498_v45  ;;  %v502_v47 = vld [vmem:[%s3767_s11 + $0xf0] sm:$0xff] }
  0x2f   : > { %501 = vst [vmem:[%s3775_s12 + $0x70] sm:$0xff] %v500_v46  ;;  %v504_v48 = vld [vmem:[%s3767_s11 + $0x100] sm:$0xff]  ;;  %v506_v49 = vld [vmem:[%s3767_s11 + $0x110] sm:$0xff]  ;;  %503 = vst [vmem:[%s3775_s12 + $0x78] sm:$0xff] %v502_v47 }
  0x30   : > { %505 = vst [vmem:[%s3775_s12 + $0x80] sm:$0xff] %v504_v48  ;;  %507 = vst [vmem:[%s3775_s12 + $0x88] sm:$0xff] %v506_v49  ;;  %v508_v50 = vld [vmem:[%s3767_s11 + $0x120] sm:$0xff]  ;;  %v510_v51 = vld [vmem:[%s3767_s11 + $0x130] sm:$0xff] }
  0x31   : > { %v512_v52 = vld [vmem:[%s3767_s11 + $0x140] sm:$0xff]  ;;  %509 = vst [vmem:[%s3775_s12 + $0x90] sm:$0xff] %v508_v50  ;;  %511 = vst [vmem:[%s3775_s12 + $0x98] sm:$0xff] %v510_v51  ;;  %v514_v53 = vld [vmem:[%s3767_s11 + $0x150] sm:$0xff] }
  0x32   : > { %513 = vst [vmem:[%s3775_s12 + $0xa0] sm:$0xff] %v512_v52  ;;  %v516_v54 = vld [vmem:[%s3767_s11 + $0x160] sm:$0xff]  ;;  %v518_v55 = vld [vmem:[%s3767_s11 + $0x170] sm:$0xff]  ;;  %515 = vst [vmem:[%s3775_s12 + $0xa8] sm:$0xff] %v514_v53 }
  0x33   : > { %517 = vst [vmem:[%s3775_s12 + $0xb0] sm:$0xff] %v516_v54  ;;  %519 = vst [vmem:[%s3775_s12 + $0xb8] sm:$0xff] %v518_v55  ;;  %v520_v56 = vld [vmem:[%s3767_s11 + $0x180] sm:$0xff]  ;;  %v522_v57 = vld [vmem:[%s3767_s11 + $0x190] sm:$0xff] }
  0x34   : > { %v524_v58 = vld [vmem:[%s3767_s11 + $0x1a0] sm:$0xff]  ;;  %521 = vst [vmem:[%s3775_s12 + $0xc0] sm:$0xff] %v520_v56  ;;  %523 = vst [vmem:[%s3775_s12 + $0xc8] sm:$0xff] %v522_v57  ;;  %v526_v59 = vld [vmem:[%s3767_s11 + $0x1b0] sm:$0xff] }
  0x35   : > { %525 = vst [vmem:[%s3775_s12 + $0xd0] sm:$0xff] %v524_v58  ;;  %v528_v60 = vld [vmem:[%s3767_s11 + $0x1c0] sm:$0xff]  ;;  %v530_v61 = vld [vmem:[%s3767_s11 + $0x1d0] sm:$0xff]  ;;  %527 = vst [vmem:[%s3775_s12 + $0xd8] sm:$0xff] %v526_v59 }
  0x36   : > { %529 = vst [vmem:[%s3775_s12 + $0xe0] sm:$0xff] %v528_v60  ;;  %531 = vst [vmem:[%s3775_s12 + $0xe8] sm:$0xff] %v530_v61  ;;  %v532_v62 = vld [vmem:[%s3767_s11 + $0x1e0] sm:$0xff]  ;;  %v534_v63 = vld [vmem:[%s3767_s11 + $0x1f0] sm:$0xff] }
  0x37   : > { %v536_v0 = vld [vmem:[%s3767_s11 + $0x200] sm:$0xff]  ;;  %533 = vst [vmem:[%s3775_s12 + $0xf0] sm:$0xff] %v532_v62  ;;  %535 = vst [vmem:[%s3775_s12 + $0xf8] sm:$0xff] %v534_v63  ;;  %v538_v1 = vld [vmem:[%s3767_s11 + $0x210] sm:$0xff] }
  0x38   : > { %537 = vst [vmem:[%s3775_s12 + $0x100] sm:$0xff] %v536_v0  ;;  %v540_v2 = vld [vmem:[%s3767_s11 + $0x220] sm:$0xff]  ;;  %v542_v3 = vld [vmem:[%s3767_s11 + $0x230] sm:$0xff]  ;;  %539 = vst [vmem:[%s3775_s12 + $0x108] sm:$0xff] %v538_v1 }
  0x39   : > { %541 = vst [vmem:[%s3775_s12 + $0x110] sm:$0xff] %v540_v2  ;;  %543 = vst [vmem:[%s3775_s12 + $0x118] sm:$0xff] %v542_v3  ;;  %v544_v4 = vld [vmem:[%s3767_s11 + $0x240] sm:$0xff]  ;;  %v546_v5 = vld [vmem:[%s3767_s11 + $0x250] sm:$0xff] }
  0x3a   : > { %v548_v6 = vld [vmem:[%s3767_s11 + $0x260] sm:$0xff]  ;;  %545 = vst [vmem:[%s3775_s12 + $0x120] sm:$0xff] %v544_v4  ;;  %547 = vst [vmem:[%s3775_s12 + $0x128] sm:$0xff] %v546_v5  ;;  %v550_v7 = vld [vmem:[%s3767_s11 + $0x270] sm:$0xff] }
  0x3b   : > { %549 = vst [vmem:[%s3775_s12 + $0x130] sm:$0xff] %v548_v6  ;;  %v552_v8 = vld [vmem:[%s3767_s11 + $0x280] sm:$0xff]  ;;  %v554_v9 = vld [vmem:[%s3767_s11 + $0x290] sm:$0xff]  ;;  %551 = vst [vmem:[%s3775_s12 + $0x138] sm:$0xff] %v550_v7 }
  0x3c   : > { %553 = vst [vmem:[%s3775_s12 + $0x140] sm:$0xff] %v552_v8  ;;  %555 = vst [vmem:[%s3775_s12 + $0x148] sm:$0xff] %v554_v9  ;;  %v556_v10 = vld [vmem:[%s3767_s11 + $0x2a0] sm:$0xff]  ;;  %v558_v11 = vld [vmem:[%s3767_s11 + $0x2b0] sm:$0xff] }
  0x3d   : > { %v560_v12 = vld [vmem:[%s3767_s11 + $0x2c0] sm:$0xff]  ;;  %557 = vst [vmem:[%s3775_s12 + $0x150] sm:$0xff] %v556_v10  ;;  %559 = vst [vmem:[%s3775_s12 + $0x158] sm:$0xff] %v558_v11  ;;  %v562_v13 = vld [vmem:[%s3767_s11 + $0x2d0] sm:$0xff] }
  0x3e   : > { %561 = vst [vmem:[%s3775_s12 + $0x160] sm:$0xff] %v560_v12  ;;  %v564_v14 = vld [vmem:[%s3767_s11 + $0x2e0] sm:$0xff]  ;;  %v566_v15 = vld [vmem:[%s3767_s11 + $0x2f0] sm:$0xff]  ;;  %563 = vst [vmem:[%s3775_s12 + $0x168] sm:$0xff] %v562_v13 }
  0x3f   : > { %565 = vst [vmem:[%s3775_s12 + $0x170] sm:$0xff] %v564_v14  ;;  %567 = vst [vmem:[%s3775_s12 + $0x178] sm:$0xff] %v566_v15  ;;  %v568_v16 = vld [vmem:[%s3767_s11 + $0x300] sm:$0xff]  ;;  %v570_v17 = vld [vmem:[%s3767_s11 + $0x310] sm:$0xff] }
  0x40   : > { %v572_v18 = vld [vmem:[%s3767_s11 + $0x320] sm:$0xff]  ;;  %569 = vst [vmem:[%s3775_s12 + $0x180] sm:$0xff] %v568_v16  ;;  %571 = vst [vmem:[%s3775_s12 + $0x188] sm:$0xff] %v570_v17  ;;  %v574_v19 = vld [vmem:[%s3767_s11 + $0x330] sm:$0xff] }
  0x41   : > { %573 = vst [vmem:[%s3775_s12 + $0x190] sm:$0xff] %v572_v18  ;;  %v576_v20 = vld [vmem:[%s3767_s11 + $0x340] sm:$0xff]  ;;  %v578_v21 = vld [vmem:[%s3767_s11 + $0x350] sm:$0xff]  ;;  %575 = vst [vmem:[%s3775_s12 + $0x198] sm:$0xff] %v574_v19 }
  0x42   : > { %577 = vst [vmem:[%s3775_s12 + $0x1a0] sm:$0xff] %v576_v20  ;;  %579 = vst [vmem:[%s3775_s12 + $0x1a8] sm:$0xff] %v578_v21  ;;  %v580_v22 = vld [vmem:[%s3767_s11 + $0x360] sm:$0xff]  ;;  %v582_v23 = vld [vmem:[%s3767_s11 + $0x370] sm:$0xff] }
  0x43   : > { %v584_v24 = vld [vmem:[%s3767_s11 + $0x380] sm:$0xff]  ;;  %581 = vst [vmem:[%s3775_s12 + $0x1b0] sm:$0xff] %v580_v22  ;;  %583 = vst [vmem:[%s3775_s12 + $0x1b8] sm:$0xff] %v582_v23  ;;  %v586_v25 = vld [vmem:[%s3767_s11 + $0x390] sm:$0xff] }
  0x44   : > { %585 = vst [vmem:[%s3775_s12 + $0x1c0] sm:$0xff] %v584_v24  ;;  %v588_v26 = vld [vmem:[%s3767_s11 + $0x3a0] sm:$0xff]  ;;  %v590_v27 = vld [vmem:[%s3767_s11 + $0x3b0] sm:$0xff]  ;;  %587 = vst [vmem:[%s3775_s12 + $0x1c8] sm:$0xff] %v586_v25 }
  0x45   : > { %589 = vst [vmem:[%s3775_s12 + $0x1d0] sm:$0xff] %v588_v26  ;;  %591 = vst [vmem:[%s3775_s12 + $0x1d8] sm:$0xff] %v590_v27  ;;  %v592_v28 = vld [vmem:[%s3767_s11 + $0x3c0] sm:$0xff]  ;;  %v594_v29 = vld [vmem:[%s3767_s11 + $0x3d0] sm:$0xff] }
  0x46   : > { %v596_v30 = vld [vmem:[%s3767_s11 + $0x3e0] sm:$0xff]  ;;  %593 = vst [vmem:[%s3775_s12 + $0x1e0] sm:$0xff] %v592_v28  ;;  %595 = vst [vmem:[%s3775_s12 + $0x1e8] sm:$0xff] %v594_v29  ;;  %v598_v31 = vld [vmem:[%s3767_s11 + $0x3f0] sm:$0xff] }
  0x47   : > { %597 = vst [vmem:[%s3775_s12 + $0x1f0] sm:$0xff] %v596_v30  ;;  %v600_v32 = vld [vmem:[%s3767_s11 + $0x400] sm:$0xff]  ;;  %v602_v33 = vld [vmem:[%s3767_s11 + $0x410] sm:$0xff]  ;;  %599 = vst [vmem:[%s3775_s12 + $0x1f8] sm:$0xff] %v598_v31 }
  0x48   : > { %601 = vst [vmem:[%s3775_s12 + $0x200] sm:$0xff] %v600_v32  ;;  %603 = vst [vmem:[%s3775_s12 + $0x208] sm:$0xff] %v602_v33  ;;  %v604_v34 = vld [vmem:[%s3767_s11 + $0x420] sm:$0xff]  ;;  %v606_v35 = vld [vmem:[%s3767_s11 + $0x430] sm:$0xff] }
  0x49   : > { %v608_v36 = vld [vmem:[%s3767_s11 + $0x440] sm:$0xff]  ;;  %605 = vst [vmem:[%s3775_s12 + $0x210] sm:$0xff] %v604_v34  ;;  %607 = vst [vmem:[%s3775_s12 + $0x218] sm:$0xff] %v606_v35  ;;  %v610_v37 = vld [vmem:[%s3767_s11 + $0x450] sm:$0xff] }
  0x4a   : > { %609 = vst [vmem:[%s3775_s12 + $0x220] sm:$0xff] %v608_v36  ;;  %v612_v38 = vld [vmem:[%s3767_s11 + $0x460] sm:$0xff]  ;;  %v614_v39 = vld [vmem:[%s3767_s11 + $0x470] sm:$0xff]  ;;  %611 = vst [vmem:[%s3775_s12 + $0x228] sm:$0xff] %v610_v37 }
  0x4b   : > { %613 = vst [vmem:[%s3775_s12 + $0x230] sm:$0xff] %v612_v38  ;;  %615 = vst [vmem:[%s3775_s12 + $0x238] sm:$0xff] %v614_v39  ;;  %v616_v40 = vld [vmem:[%s3767_s11 + $0x480] sm:$0xff]  ;;  %v618_v41 = vld [vmem:[%s3767_s11 + $0x490] sm:$0xff] }
  0x4c   : > { %v620_v42 = vld [vmem:[%s3767_s11 + $0x4a0] sm:$0xff]  ;;  %617 = vst [vmem:[%s3775_s12 + $0x240] sm:$0xff] %v616_v40  ;;  %619 = vst [vmem:[%s3775_s12 + $0x248] sm:$0xff] %v618_v41  ;;  %v622_v43 = vld [vmem:[%s3767_s11 + $0x4b0] sm:$0xff] }
  0x4d   : > { %621 = vst [vmem:[%s3775_s12 + $0x250] sm:$0xff] %v620_v42  ;;  %v624_v44 = vld [vmem:[%s3767_s11 + $0x4c0] sm:$0xff]  ;;  %v626_v45 = vld [vmem:[%s3767_s11 + $0x4d0] sm:$0xff]  ;;  %623 = vst [vmem:[%s3775_s12 + $0x258] sm:$0xff] %v622_v43 }
  0x4e   : > { %625 = vst [vmem:[%s3775_s12 + $0x260] sm:$0xff] %v624_v44  ;;  %627 = vst [vmem:[%s3775_s12 + $0x268] sm:$0xff] %v626_v45  ;;  %v628_v46 = vld [vmem:[%s3767_s11 + $0x4e0] sm:$0xff]  ;;  %v630_v47 = vld [vmem:[%s3767_s11 + $0x4f0] sm:$0xff] }
  0x4f   : > { %v632_v48 = vld [vmem:[%s3767_s11 + $0x500] sm:$0xff]  ;;  %629 = vst [vmem:[%s3775_s12 + $0x270] sm:$0xff] %v628_v46  ;;  %631 = vst [vmem:[%s3775_s12 + $0x278] sm:$0xff] %v630_v47  ;;  %v634_v49 = vld [vmem:[%s3767_s11 + $0x510] sm:$0xff] }
  0x50   : > { %633 = vst [vmem:[%s3775_s12 + $0x280] sm:$0xff] %v632_v48  ;;  %v636_v50 = vld [vmem:[%s3767_s11 + $0x520] sm:$0xff]  ;;  %v638_v51 = vld [vmem:[%s3767_s11 + $0x530] sm:$0xff]  ;;  %635 = vst [vmem:[%s3775_s12 + $0x288] sm:$0xff] %v634_v49 }
  0x51   : > { %637 = vst [vmem:[%s3775_s12 + $0x290] sm:$0xff] %v636_v50  ;;  %639 = vst [vmem:[%s3775_s12 + $0x298] sm:$0xff] %v638_v51  ;;  %v640_v52 = vld [vmem:[%s3767_s11 + $0x540] sm:$0xff]  ;;  %v642_v53 = vld [vmem:[%s3767_s11 + $0x550] sm:$0xff] }
  0x52   : > { %v644_v54 = vld [vmem:[%s3767_s11 + $0x560] sm:$0xff]  ;;  %641 = vst [vmem:[%s3775_s12 + $0x2a0] sm:$0xff] %v640_v52  ;;  %643 = vst [vmem:[%s3775_s12 + $0x2a8] sm:$0xff] %v642_v53  ;;  %v646_v55 = vld [vmem:[%s3767_s11 + $0x570] sm:$0xff] }
  0x53   : > { %645 = vst [vmem:[%s3775_s12 + $0x2b0] sm:$0xff] %v644_v54  ;;  %v648_v56 = vld [vmem:[%s3767_s11 + $0x580] sm:$0xff]  ;;  %v650_v57 = vld [vmem:[%s3767_s11 + $0x590] sm:$0xff]  ;;  %647 = vst [vmem:[%s3775_s12 + $0x2b8] sm:$0xff] %v646_v55 }
  0x54   : > { %649 = vst [vmem:[%s3775_s12 + $0x2c0] sm:$0xff] %v648_v56  ;;  %651 = vst [vmem:[%s3775_s12 + $0x2c8] sm:$0xff] %v650_v57  ;;  %v652_v58 = vld [vmem:[%s3767_s11 + $0x5a0] sm:$0xff]  ;;  %v654_v59 = vld [vmem:[%s3767_s11 + $0x5b0] sm:$0xff] }
  0x55   : > { %v656_v60 = vld [vmem:[%s3767_s11 + $0x5c0] sm:$0xff]  ;;  %653 = vst [vmem:[%s3775_s12 + $0x2d0] sm:$0xff] %v652_v58  ;;  %655 = vst [vmem:[%s3775_s12 + $0x2d8] sm:$0xff] %v654_v59  ;;  %v658_v61 = vld [vmem:[%s3767_s11 + $0x5d0] sm:$0xff] }
  0x56   : > { %657 = vst [vmem:[%s3775_s12 + $0x2e0] sm:$0xff] %v656_v60  ;;  %v660_v62 = vld [vmem:[%s3767_s11 + $0x5e0] sm:$0xff]  ;;  %v662_v63 = vld [vmem:[%s3767_s11 + $0x5f0] sm:$0xff]  ;;  %659 = vst [vmem:[%s3775_s12 + $0x2e8] sm:$0xff] %v658_v61 }
  0x57   : > { %661 = vst [vmem:[%s3775_s12 + $0x2f0] sm:$0xff] %v660_v62  ;;  %663 = vst [vmem:[%s3775_s12 + $0x2f8] sm:$0xff] %v662_v63 }
  0x58 PF: > { %p3140_p5 = scmp.ge.s32.totalorder %s3619_s19, 1  ;;  %p668_p6 = scmp.lt.s32.totalorder %s3619_s19, 3 }
  0x5a   : > { %p669_p7 = pnand %p3140_p5, %p668_p6 }
  0x5c   : > { %672 = sbr.rel (%p669_p7) target bundleno = 764 (0x2fc), region = 89 }
  0x63   : > { %v3968_v0 = vld [vmem:[%s6497_s1 + $0x10] sm:$0xff]  ;;  %v753_v1 = vld [vmem:[%s6497_s1] sm:$0xff]  ;;  %v3621_v2 = vmov 1   ;;  %v3977_v3 = vld [vmem:[%s6497_s1 + $0x18] sm:$0xff]  ;;  %s675_s29 = sand.u32 1, %s3611_s17   ;;  %s720_s6 = sld [smem:[#allocation2]] }
  0x64   : > { %3338 = vset.pattern.permute.xlu1 %v3621_v2  ;;  %3337 = vset.pattern.permute.xlu0 %v3621_v2  ;;  %v754_v4 = vld [vmem:[%s6497_s1 + $0x8] sm:$0xff]  ;;  %v3991_v6 = vld [vmem:[%s6497_s1 + $0x20] sm:$0xff]  ;;  %v3998_v7 = vld [vmem:[%s6497_s1 + $0x38] sm:$0xff]  ;;  %s3141_s30 = sshll.u32 %s675_s29, 8  ;;  %v6501_v32 = vmov 0   ;;  %s4729_s7 = smul.u32 768, %s675_s29 }
  0x65   : > { %1102 = vperm.xlu1 %3338, %v3968_v0   ;;  %1092 = vperm.xlu0 %3337, %v753_v1   ;;  %v3986_v5 = vld [vmem:[%s6497_s1 + $0x28] sm:$0xff]  ;;  %v4003_v8 = vld [vmem:[%s6497_s1 + $0x30] sm:$0xff]  ;;  %v4015_v10 = vld [vmem:[%s6497_s1 + $0x40] sm:$0xff]  ;;  %s4058_s5 = scalar_lea.vmem [#allocation3], %s3141_s30  ;;  %s6430_s8 = sshll.u32 %s3131_s0, 1 }
  0x66   : > { %v4010_v9 = vld [vmem:[%s6497_s1 + $0x48] sm:$0xff]  ;;  %v4022_v11 = vld [vmem:[%s6497_s1 + $0x58] sm:$0xff]  ;;  %v4027_v12 = vld [vmem:[%s6497_s1 + $0x50] sm:$0xff]  ;;  %1518 = vmatprep.mubr.bf16.mxu0 %v6501_v32  ;;  %1405 = vmatprep.mubr.bf16.mxu1 %v6501_v32  ;;  %s4763_s17 = scalar_lea.vmem [#allocation4], %s4729_s7  ;;  %p714_p8 = scmp.lt.s32.totalorder %s6430_s8, 3 }
  0x67   : > { %v4034_v13 = vld [vmem:[%s6497_s1 + $0x68] sm:$0xff]  ;;  %v4039_v14 = vld [vmem:[%s6497_s1 + $0x60] sm:$0xff]  ;;  %v4046_v15 = vld [vmem:[%s6497_s1 + $0x78] sm:$0xff] }
  0x68   : > { %v4051_v16 = vld [vmem:[%s6497_s1 + $0x70] sm:$0xff]  ;;  %v4061_v17 = vld [vmem:[%s4058_s5 + $0x20] sm:$0xff]  ;;  %v4064_v18 = vld [vmem:[%s4058_s5 + $0x28] sm:$0xff]  ;;  %s7122_s8 = smov (!%p714_p8, %s6430_s8), 3 }
  0x69   : > { %1107 = vperm.xlu1 %3338, %v3977_v3   ;;  %1097 = vperm.xlu0 %3337, %v754_v4   ;;  %v773_v19 = vand.u32 2147483647, %v4061_v17  ;;  %v4068_v20 = vld [vmem:[%s4058_s5] sm:$0xff]  ;;  %v774_v21 = vand.u32 2147483647, %v4064_v18  ;;  %v4072_v22 = vld [vmem:[%s4058_s5 + $0x8] sm:$0xff]  ;;  %v4083_v30 = vstv %s720_s6 }
  0x6a   : > { %v4075_v23 = vld [vmem:[%s4058_s5 + $0x30] sm:$0xff]  ;;  %v769_v25 = vand.u32 2147483647, %v4068_v20  ;;  %v4079_v26 = vld [vmem:[%s4058_s5 + $0x38] sm:$0xff]  ;;  %v770_v27 = vand.u32 2147483647, %v4072_v22 }
  0x6b   : > { %v805_v24 = vsub.f32 0.0, %v773_v19  ;;  %v806_v28 = vsub.f32 0.0, %v774_v21  ;;  %v775_v29 = vand.u32 2147483647, %v4075_v23  ;;  %v776_v31 = vand.u32 2147483647, %v4079_v26 }
  0x6c   : > { %v801_v34 = vsub.f32 0.0, %v769_v25  ;;  %v4090_v35 = vld [vmem:[%s4058_s5 + $0x10] sm:$0xff]  ;;  %v802_v36 = vsub.f32 0.0, %v770_v27  ;;  %v4095_v37 = vld [vmem:[%s4058_s5 + $0x18] sm:$0xff]  ;;  %v4115_v56 = vld [vmem:[%s4058_s5 + $0x40] sm:$0xff]  ;;  %vm934_vm0 = vcmp.gt.f32.partialorder %v4061_v17, 0.0 }
  0x6d   : > { %1117 = vperm.xlu1 %3338, %v3986_v5   ;;  %1112 = vperm.xlu0 %3337, %v3991_v6   ;;  %v838_v33 = vmul.f32 %v4083_v30, %v805_v24  ;;  %v839_v38 = vmul.f32 %v4083_v30, %v806_v28  ;;  %v807_v39 = vsub.f32 0.0, %v775_v29  ;;  %v808_v40 = vsub.f32 0.0, %v776_v31  ;;  %v4102_v45 = vld [vmem:[%s4058_s5 + $0x50] sm:$0xff]  ;;  %v4106_v47 = vld [vmem:[%s4058_s5 + $0x58] sm:$0xff]  ;;  %v4118_v58 = vld [vmem:[%s4058_s5 + $0x48] sm:$0xff]  ;;  %s3143_s19 = sshll.u32 %s7122_s8, 3 }
  0x6e   : > { %v771_v41 = vand.u32 2147483647, %v4090_v35  ;;  %v834_v43 = vmul.f32 %v4083_v30, %v801_v34  ;;  %v772_v44 = vand.u32 2147483647, %v4095_v37  ;;  %v835_v46 = vmul.f32 %v4083_v30, %v802_v36  ;;  %v4123_v60 = vld [vmem:[%s4058_s5 + $0x70] sm:$0xff]  ;;  %v4138_v25 = vld [vmem:[%s4058_s5 + $0x60] sm:$0xff]  ;;  %s6467_s10 = scalar_lea.vmem %s6500_s4, %s3143_s19 }
  0x6f   : > { %v874_v42 = vmul.f32 1.442695, %v838_v33  ;;  %v876_v48 = vmul.f32 1.442695, %v839_v38  ;;  %v840_v49 = vmul.f32 %v4083_v30, %v807_v39  ;;  %v841_v50 = vmul.f32 %v4083_v30, %v808_v40  ;;  %v4142_v31 = vld [vmem:[%s4058_s5 + $0x68] sm:$0xff] }
  0x70   : > { %v803_v51 = vsub.f32 0.0, %v771_v41  ;;  %v779_v52 = vand.u32 2147483647, %v4102_v45  ;;  %v866_v53 = vmul.f32 1.442695, %v834_v43  ;;  %v804_v54 = vsub.f32 0.0, %v772_v44 }
  0x71   : > { %1127 = vperm.xlu1 %3338, %v3998_v7   ;;  %1122 = vperm.xlu0 %3337, %v4003_v8   ;;  %3341 = vpow2.f32 %v874_v42  ;;  %v780_v55 = vand.u32 2147483647, %v4106_v47  ;;  %v868_v57 = vmul.f32 1.442695, %v835_v46  ;;  %v878_v59 = vmul.f32 1.442695, %v840_v49 }
  0x72   : > { %3343 = vpow2.f32 %v876_v48  ;;  %v880_v61 = vmul.f32 1.442695, %v841_v50  ;;  %v836_v62 = vmul.f32 %v4083_v30, %v803_v51  ;;  %v811_v63 = vsub.f32 0.0, %v779_v52 }
  0x73   : > { %3345 = vpow2.f32 %v866_v53  ;;  %v837_v2 = vmul.f32 %v4083_v30, %v804_v54  ;;  %v781_v34 = vand.u32 2147483647, %v4138_v25  ;;  %v782_v39 = vand.u32 2147483647, %v4142_v31  ;;  %v4156_v53 = vld [vmem:[%s4058_s5 + $0x90] sm:$0xff] }
  0x74   : > { %3347 = vpow2.f32 %v868_v57  ;;  %v870_v19 = vmul.f32 1.442695, %v836_v62  ;;  %v844_v21 = vmul.f32 %v4083_v30, %v811_v63  ;;  %vm935_vm1 = vcmp.gt.f32.partialorder %v4064_v18, 0.0 }
  0x75   : > { %1137 = vperm.xlu1 %3338, %v4010_v9   ;;  %1132 = vperm.xlu0 %3337, %v4015_v10   ;;  %3349 = vpow2.f32 %v878_v59  ;;  %v872_v27 = vmul.f32 1.442695, %v837_v2  ;;  %v813_v46 = vsub.f32 0.0, %v781_v34  ;;  %v814_v50 = vsub.f32 0.0, %v782_v39  ;;  %v4164_v2 = vld [vmem:[%s4058_s5 + $0x98] sm:$0xff]  ;;  %v4182_v34 = vld [vmem:[%s4058_s5 + $0x80] sm:$0xff] }
  0x76   : > { %3351 = vpow2.f32 %v880_v61  ;;  %v886_v36 = vmul.f32 1.442695, %v844_v21  ;;  %vm930_vm2 = vcmp.gt.f32.partialorder %v4068_v20, 0.0  ;;  %vm931_vm3 = vcmp.gt.f32.partialorder %v4072_v22, 0.0 }
  0x77   : > { %3353 = vpow2.f32 %v870_v19  ;;  %v846_v62 = vmul.f32 %v4083_v30, %v813_v46  ;;  %vm936_vm4 = vcmp.gt.f32.partialorder %v4075_v23, 0.0  ;;  %vm937_vm5 = vcmp.gt.f32.partialorder %v4079_v26, 0.0 }
  0x78   : > { %3355 = vpow2.f32 %v872_v27  ;;  %vm932_vm6 = vcmp.gt.f32.partialorder %v4090_v35, 0.0  ;;  %vm933_vm7 = vcmp.gt.f32.partialorder %v4095_v37, 0.0  ;;  %vm940_vm8 = vcmp.gt.f32.partialorder %v4102_v45, 0.0 }
  0x79   : > { %1147 = vperm.xlu1 %3338, %v4022_v11   ;;  %1142 = vperm.xlu0 %3337, %v4027_v12   ;;  %3357 = vpow2.f32 %v886_v36  ;;  %v890_v21 = vmul.f32 1.442695, %v846_v62  ;;  %vm941_vm9 = vcmp.gt.f32.partialorder %v4106_v47, 0.0  ;;  %v785_v46 = vand.u32 2147483647, %v4182_v34 }
  0x7a   : > { %vm938_vm10 = vcmp.gt.f32.partialorder %v4115_v56, 0.0  ;;  %vm939_vm11 = vcmp.gt.f32.partialorder %v4118_v58, 0.0  ;;  %vm944_vm12 = vcmp.gt.f32.partialorder %v4123_v60, 0.0  ;;  %vm942_vm14 = vcmp.gt.f32.partialorder %v4138_v25, 0.0 }
  0x7b   : > { %vm943_vm15 = vcmp.gt.f32.partialorder %v4142_v31, 0.0 }
  0x7d   : > { %1157 = vperm.xlu1 %3338, %v4034_v13   ;;  %1152 = vperm.xlu0 %3337, %v4039_v14  }
  0x81   : > { %1167 = vperm.xlu1 %3338, %v4046_v15   ;;  %1162 = vperm.xlu0 %3337, %v4051_v16  }
  0x85   : > { %3339 = vset.pattern.permute.xlu0 %v6501_v32  ;;  %3340 = vset.pattern.permute.xlu1 %v6501_v32 }
  0x86   : > { %2627 = vperm.xlu0 %3339, %v753_v1   ;;  %2631 = vperm.xlu1 %3340, %v754_v4   ;;  %v4128_v1 = vld [vmem:[%s4058_s5 + $0x78] sm:$0xff]  ;;  %v778_v4 = vand.u32 2147483647, %v4118_v58 }
  0x87   : > { %vm945_vm13 = vcmp.gt.f32.partialorder %v4128_v1, 0.0 }
  0x88   : > { %v810_v29 = vsub.f32 0.0, %v778_v4 }
  0x8a   : > { %2635 = vperm.xlu1 %3340, %v3968_v0   ;;  %2639 = vperm.xlu0 %3339, %v3977_v3   ;;  %v777_v0 = vand.u32 2147483647, %v4115_v56  ;;  %v812_v3 = vsub.f32 0.0, %v780_v55  ;;  %v843_v42 = vmul.f32 %v4083_v30, %v810_v29 }
  0x8c   : > { %v809_v24 = vsub.f32 0.0, %v777_v0  ;;  %v845_v28 = vmul.f32 %v4083_v30, %v812_v3  ;;  %v884_v52 = vmul.f32 1.442695, %v843_v42  ;;  %v847_v0 = vmul.f32 %v4083_v30, %v814_v50 }
  0x8d   : > { %v787_v3 = vand.u32 2147483647, %v4156_v53 }
  0x8e   : > { %2643 = vperm.xlu1 %3340, %v3991_v6   ;;  %2647 = vperm.xlu0 %3339, %v3986_v5   ;;  %v783_v5 = vand.u32 2147483647, %v4123_v60  ;;  %v784_v6 = vand.u32 2147483647, %v4128_v1  ;;  %v842_v38 = vmul.f32 %v4083_v30, %v809_v24  ;;  %v888_v41 = vmul.f32 1.442695, %v845_v28 }
  0x8f   : > { %v788_v24 = vand.u32 2147483647, %v4164_v2  ;;  %v892_v29 = vmul.f32 1.442695, %v847_v0 }
  0x90   : > { %v815_v33 = vsub.f32 0.0, %v783_v5  ;;  %v882_v49 = vmul.f32 1.442695, %v842_v38  ;;  %3359 = vpow2.f32 %v888_v41 }
  0x91   : > { %v820_v18 = vsub.f32 0.0, %v788_v24 }
  0x92   : > { %2651 = vperm.xlu1 %3340, %v4003_v8   ;;  %2655 = vperm.xlu0 %3339, %v3998_v7   ;;  %v3342_v7 = vpop.eup %3341  ;;  %v816_v8 = vsub.f32 0.0, %v784_v6  ;;  %3361 = vpow2.f32 %v882_v49 }
  0x93   : > { %v3344_v40 = vpop.eup %3343  ;;  %v966_v43 = vmul.f32 0.5, %v3342_v7  ;;  %3363 = vpow2.f32 %v884_v52  ;;  %v4212_v52 = vld [vmem:[%s4058_s5 + $0xa0] sm:$0xff] }
  0x94   : > { %v849_v44 = vmul.f32 %v4083_v30, %v816_v8 }
  0x96   : > { %2659 = vperm.xlu1 %3340, %v4015_v10   ;;  %2663 = vperm.xlu0 %3339, %v4010_v9   ;;  %v848_v10 = vmul.f32 %v4083_v30, %v815_v33  ;;  %v3346_v9 = vpop.eup %3345  ;;  %v896_v61 = vmul.f32 1.442695, %v849_v44  ;;  %v819_v33 = vsub.f32 0.0, %v787_v3 }
  0x97   : > { %v3348_v48 = vpop.eup %3347  ;;  %v962_v57 = vmul.f32 0.5, %v3346_v9 }
  0x98   : > { %v3350_v51 = vpop.eup %3349  ;;  %v894_v55 = vmul.f32 1.442695, %v848_v10  ;;  %v963_v59 = vmul.f32 0.5, %v3348_v48  ;;  %v4199_v10 = vld [vmem:[%s4058_s5 + $0xb0] sm:$0xff]  ;;  %v4205_v48 = vld [vmem:[%s4058_s5 + $0xb8] sm:$0xff] }
  0x99   : > { %v3352_v54 = vpop.eup %3351  ;;  %v968_v63 = vmul.f32 0.5, %v3350_v51  ;;  %v994_v19 = vsub.f32 1.0, %v962_v57 }
  0x9a   : > { %2667 = vperm.xlu1 %3340, %v4027_v12   ;;  %2671 = vperm.xlu0 %3339, %v4022_v11   ;;  %v967_v11 = vmul.f32 0.5, %v3344_v40  ;;  %v998_v12 = vsub.f32 1.0, %v966_v43  ;;  %3365 = vpow2.f32 %v894_v55  ;;  %v995_v27 = vsub.f32 1.0, %v963_v59  ;;  %v4191_v40 = vld [vmem:[%s4058_s5 + $0x88] sm:$0xff] }
  0x9b   : > { %3367 = vpow2.f32 %v896_v61  ;;  %v1000_v28 = vsub.f32 1.0, %v968_v63  ;;  %v1026_v39 = vsel %vm930_vm2, %v962_v57, %v994_v19  ;;  %v786_v51 = vand.u32 2147483647, %v4191_v40 }
  0x9c   : > { %v999_v4 = vsub.f32 1.0, %v967_v11  ;;  %v1030_v5 = vsel %vm934_vm0, %v966_v43, %v998_v12  ;;  %3369 = vpow2.f32 %v890_v21  ;;  %v1027_v41 = vsel %vm931_vm3, %v963_v59, %v995_v27 }
  0x9d   : > { %v4185_v38 = vmul.f32 %v1030_v5, %v4083_v30  ;;  %v1032_v42 = vsel %vm936_vm4, %v968_v63, %v1000_v28  ;;  %3371 = vpow2.f32 %v892_v29  ;;  %v852_v43 = vmul.f32 %v4083_v30, %v819_v33 }
  0x9e   : > { %2675 = vperm.xlu1 %3340, %v4039_v14   ;;  %2679 = vperm.xlu0 %3339, %v4034_v13   ;;  %v969_v14 = vmul.f32 0.5, %v3352_v54  ;;  %v3354_v13 = vpop.eup %3353  ;;  %v4215_v26 = vmul.f32 %v1026_v39, %v4083_v30  ;;  %v853_v12 = vmul.f32 %v4083_v30, %v820_v18  ;;  %v791_v55 = vand.u32 2147483647, %v4199_v10 }
  0x9f   : > { %v3356_v6 = vpop.eup %3355  ;;  %v4223_v59 = vmul.f32 %v1032_v42, %v4083_v30  ;;  %v902_v62 = vmul.f32 1.442695, %v852_v43  ;;  %v792_v63 = vand.u32 2147483647, %v4205_v48  ;;  %v818_v21 = vsub.f32 0.0, %v786_v51 }
  0xa0   : > { %v1001_v17 = vsub.f32 1.0, %v969_v14  ;;  %v3358_v7 = vpop.eup %3357  ;;  %v965_v8 = vmul.f32 0.5, %v3356_v6  ;;  %v904_v28 = vmul.f32 1.442695, %v853_v12  ;;  %v823_v29 = vsub.f32 0.0, %v791_v55  ;;  %v4269_v55 = vld [vmem:[%s4058_s5 + $0xc0] sm:$0xff] }
  0xa1   : > { %v3360_v36 = vpop.eup %3359  ;;  %v972_v44 = vmul.f32 0.5, %v3358_v7  ;;  %3373 = vpow2.f32 %v902_v62  ;;  %v851_v42 = vmul.f32 %v4083_v30, %v818_v21  ;;  %vm948_vm0 = vcmp.gt.f32.partialorder %v4156_v53, 0.0 }
  0xa2   : > { %2683 = vperm.xlu1 %3340, %v4051_v16   ;;  %2687 = vperm.xlu0 %3339, %v4046_v15   ;;  %v964_v16 = vmul.f32 0.5, %v3354_v13  ;;  %v1031_v15 = vsel %vm935_vm1, %v967_v11, %v999_v4  ;;  %v1033_v20 = vsel %vm937_vm5, %v969_v14, %v1001_v17  ;;  %v3362_v22 = vpop.eup %3361  ;;  %v997_v23 = vsub.f32 1.0, %v965_v8 }
  0xa3   : > { %v4208_v49 = vmul.f32 %v1031_v15, %v4083_v30  ;;  %v973_v50 = vmul.f32 0.5, %v3360_v36  ;;  %v3364_v54 = vpop.eup %3363  ;;  %v4218_v11 = vmul.f32 %v1027_v41, %v4083_v30  ;;  %v4226_v61 = vmul.f32 %v1033_v20, %v4083_v30 }
  0xa4   : > { %v996_v9 = vsub.f32 1.0, %v964_v16  ;;  %v3366_v57 = vpop.eup %3365  ;;  %v1004_v14 = vsub.f32 1.0, %v972_v44  ;;  %v817_v13 = vsub.f32 0.0, %v785_v46  ;;  %v789_v4 = vand.u32 2147483647, %v4212_v52 }
  0xa5   : > { %v3368_v0 = vpop.eup %3367  ;;  %v1029_v5 = vsel %vm933_vm7, %v965_v8, %v997_v23  ;;  %v1005_v6 = vsub.f32 1.0, %v973_v50  ;;  %v970_v19 = vmul.f32 0.5, %v3362_v22  ;;  %v971_v24 = vmul.f32 0.5, %v3364_v54  ;;  %v4248_v8 = vld [vmem:[%s4058_s5 + $0xa8] sm:$0xff] }
  0xa6   : > { %v1028_v3 = vsel %vm932_vm6, %v964_v16, %v996_v9  ;;  %v976_v27 = vmul.f32 0.5, %v3366_v57  ;;  %v977_v33 = vmul.f32 0.5, %v3368_v0  ;;  %v824_v17 = vsub.f32 0.0, %v792_v63  ;;  %v3370_v16 = vpop.eup %3369  ;;  %v4257_v9 = vld [vmem:[%s4058_s5 + $0xd0] sm:$0xff] }
  0xa7   : > { %v4239_v35 = vmul.f32 %v1028_v3, %v4083_v30  ;;  %v4242_v7 = vmul.f32 %v1029_v5, %v4083_v30  ;;  %v1036_v37 = vsel %vm940_vm8, %v972_v44, %v1004_v14  ;;  %v850_v15 = vmul.f32 %v4083_v30, %v817_v13  ;;  %v3372_v39 = vpop.eup %3371  ;;  %v4260_v44 = vld [vmem:[%s4058_s5 + $0xd8] sm:$0xff] }
  0xa8   : > { %v821_v36 = vsub.f32 0.0, %v789_v4  ;;  %v1037_v18 = vsel %vm941_vm9, %v973_v50, %v1005_v6  ;;  %v1002_v41 = vsub.f32 1.0, %v970_v19  ;;  %v1003_v45 = vsub.f32 1.0, %v971_v24  ;;  %v4283_v6 = vld [vmem:[%s4058_s5 + $0xc8] sm:$0xff] }
  0xa9   : > { %v1008_v43 = vsub.f32 1.0, %v976_v27  ;;  %3375 = vpow2.f32 %v904_v28  ;;  %v856_v20 = vmul.f32 %v4083_v30, %v823_v29  ;;  %v4263_v47 = vmul.f32 %v1036_v37, %v4083_v30 }
  0xaa   : > { %v1009_v46 = vsub.f32 1.0, %v977_v33  ;;  %v857_v22 = vmul.f32 %v4083_v30, %v824_v17  ;;  %v790_v23 = vand.u32 2147483647, %v4248_v8  ;;  %v974_v50 = vmul.f32 0.5, %v3370_v16 }
  0xab   : > { %v975_v51 = vmul.f32 0.5, %v3372_v39  ;;  %v898_v54 = vmul.f32 1.442695, %v850_v15  ;;  %v854_v12 = vmul.f32 %v4083_v30, %v821_v36  ;;  %v4272_v57 = vmul.f32 %v1037_v18, %v4083_v30  ;;  %v4299_v36 = vld [vmem:[%s4058_s5 + $0xf8] sm:$0xff] }
  0xac   : > { %v900_v62 = vmul.f32 1.442695, %v851_v42  ;;  %v795_v63 = vand.u32 2147483647, %v4257_v9  ;;  %v796_v0 = vand.u32 2147483647, %v4260_v44  ;;  %v1034_v14 = vsel %vm938_vm10, %v970_v19, %v1002_v41 }
  0xad   : > { %v1035_v13 = vsel %vm939_vm11, %v971_v24, %v1003_v45  ;;  %v1040_v4 = vsel %vm944_vm12, %v976_v27, %v1008_v43  ;;  %v910_v5 = vmul.f32 1.442695, %v856_v20  ;;  %v1041_v28 = vsel %vm945_vm13, %v977_v33, %v1009_v46  ;;  %v3374_v24 = vpop.eup %3373  ;;  %v4306_v45 = vld [vmem:[%s4058_s5 + $0xf0] sm:$0xff]  ;;  %v4309_v43 = vld [vmem:[%s4058_s5 + $0xe8] sm:$0xff] }
  0xae   : > { %v912_v29 = vmul.f32 1.442695, %v857_v22  ;;  %v822_v17 = vsub.f32 0.0, %v790_v23  ;;  %v793_v16 = vand.u32 2147483647, %v4269_v55  ;;  %v1006_v56 = vsub.f32 1.0, %v974_v50 }
  0xaf   : > { %v1007_v19 = vsub.f32 1.0, %v975_v51  ;;  %3377 = vpow2.f32 %v898_v54  ;;  %v906_v58 = vmul.f32 1.442695, %v854_v12  ;;  %v827_v60 = vsub.f32 0.0, %v795_v63  ;;  %v4322_v54 = vld [vmem:[%s4058_s5 + $0xe0] sm:$0xff] }
  0xb0   : > { %3379 = vpow2.f32 %v900_v62  ;;  %v828_v27 = vsub.f32 0.0, %v796_v0  ;;  %v794_v37 = vand.u32 2147483647, %v4283_v6  ;;  %v4290_v1 = vmul.f32 %v1034_v14, %v4083_v30 }
  0xb1   : > { %v4293_v33 = vmul.f32 %v1035_v13, %v4083_v30  ;;  %v4296_v15 = vmul.f32 %v1040_v4, %v4083_v30  ;;  %3381 = vpow2.f32 %v910_v5  ;;  %v4302_v18 = vmul.f32 %v1041_v28, %v4083_v30 }
  0xb2   : > { %3383 = vpow2.f32 %v912_v29  ;;  %v855_v41 = vmul.f32 %v4083_v30, %v822_v17  ;;  %v825_v42 = vsub.f32 0.0, %v793_v16  ;;  %v4313_v46 = vsel %vm942_vm14, %v974_v50, %v1006_v56 }
  0xb3   : > { %v3376_v20 = vpop.eup %3375  ;;  %v4317_v22 = vsel %vm943_vm15, %v975_v51, %v1007_v19  ;;  %v4319_v23 = vmul.f32 0.5, %v3374_v24  ;;  %3385 = vpow2.f32 %v906_v58  ;;  %vm949_vm1 = vcmp.gt.f32.partialorder %v4164_v2, 0.0 }
  0xb4   : > { %v860_v62 = vmul.f32 %v4083_v30, %v827_v60  ;;  %v861_v25 = vmul.f32 %v4083_v30, %v828_v27  ;;  %v826_v50 = vsub.f32 0.0, %v794_v37  ;;  %v800_v63 = vand.u32 2147483647, %v4299_v36 }
  0xb5   : > { %v799_v0 = vand.u32 2147483647, %v4306_v45  ;;  %v798_v14 = vand.u32 2147483647, %v4309_v43  ;;  %v981_v13 = vmul.f32 0.5, %v3376_v20  ;;  %v858_v5 = vmul.f32 %v4083_v30, %v825_v42 }
  0xb6   : > { %v908_v4 = vmul.f32 1.442695, %v855_v41  ;;  %v797_v28 = vand.u32 2147483647, %v4322_v54  ;;  %v918_v16 = vmul.f32 1.442695, %v860_v62  ;;  %v859_v19 = vmul.f32 %v4083_v30, %v826_v50 }
  0xb7   : > { %v920_v56 = vmul.f32 1.442695, %v861_v25  ;;  %v832_v58 = vsub.f32 0.0, %v800_v63  ;;  %vm946_vm2 = vcmp.gt.f32.partialorder %v4182_v34, 0.0  ;;  %v1012_v37 = vsub.f32 1.0, %v4319_v23 }
  0xb8   : > { %vm947_vm3 = vcmp.gt.f32.partialorder %v4191_v40, 0.0  ;;  %3387 = vpow2.f32 %v908_v4  ;;  %v829_v62 = vsub.f32 0.0, %v797_v28  ;;  %v916_v25 = vmul.f32 1.442695, %v859_v19 }
  0xb9   : > { %v3378_v24 = vpop.eup %3377  ;;  %3389 = vpow2.f32 %v918_v16  ;;  %v865_v50 = vmul.f32 %v4083_v30, %v832_v58  ;;  %vm952_vm4 = vcmp.gt.f32.partialorder %v4199_v10, 0.0  ;;  %vm953_vm5 = vcmp.gt.f32.partialorder %v4205_v48, 0.0 }
  0xba   : > { %3391 = vpow2.f32 %v920_v56  ;;  %v1044_v56 = vsel %vm948_vm0, %v4319_v23, %v1012_v37  ;;  %vm950_vm6 = vcmp.gt.f32.partialorder %v4212_v52, 0.0  ;;  %vm951_vm7 = vcmp.gt.f32.partialorder %v4248_v8, 0.0 }
  0xbb   : > { %vm956_vm8 = vcmp.gt.f32.partialorder %v4257_v9, 0.0  ;;  %vm957_vm9 = vcmp.gt.f32.partialorder %v4260_v44, 0.0  ;;  %vm954_vm10 = vcmp.gt.f32.partialorder %v4269_v55, 0.0  ;;  %vm955_vm11 = vcmp.gt.f32.partialorder %v4283_v6, 0.0 }
  0xbc   : > { %vm961_vm12 = vcmp.gt.f32.partialorder %v4299_v36, 0.0  ;;  %vm960_vm13 = vcmp.gt.f32.partialorder %v4306_v45, 0.0  ;;  %vm958_vm14 = vcmp.gt.f32.partialorder %v4322_v54, 0.0  ;;  %vm959_vm15 = vcmp.gt.f32.partialorder %v4309_v43, 0.0 }
  0xe4   : > { %v1093_v3 = vpop.permute.xlu0 %1092  ;;  %v1103_v21 = vpop.permute.xlu1 %1102 }
  0xe5   : > { %v4340_v29 = vmul.f32 %v1103_v21, %v4208_v49  ;;  %v4343_v17 = vmul.f32 %v1093_v3, %v4215_v26  ;;  %v831_v26 = vsub.f32 0.0, %v799_v0 }
  0xe8   : > { %v1098_v39 = vpop.permute.xlu0 %1097  ;;  %v1108_v12 = vpop.permute.xlu1 %1107 }
  0xe9   : > { %v4330_v31 = vmul.f32 %v1098_v39, %v4239_v35  ;;  %v4333_v51 = vmul.f32 %v1098_v39, %v4242_v7  ;;  %v4346_v35 = vmul.f32 %v1093_v3, %v4218_v11  ;;  %v4349_v7 = vmul.f32 %v1108_v12, %v4226_v61  ;;  %v3380_v3 = vpop.eup %3379 }
  0xea   : > { %v830_v11 = vsub.f32 0.0, %v798_v14  ;;  %v4360_v61 = vmul.f32 %v1103_v21, %v4185_v38  ;;  %v4363_v27 = vmul.f32 %v1108_v12, %v4223_v59  ;;  %v3382_v39 = vpop.eup %3381  ;;  %v1013_v38 = vsub.f32 1.0, %v981_v13 }
  0xeb   : > { %v1203_v60 = vpack.c.bf16 %v4333_v51, %v4346_v35  ;;  %v4356_v49 = vpack.c.bf16 %v4330_v31, %v4343_v17  ;;  %v4373_v20 = vpack.c.bf16 %v4349_v7, %v4340_v29  ;;  %v914_v21 = vmul.f32 1.442695, %v858_v5  ;;  %v3384_v59 = vpop.eup %3383 }
  0xec   : > { %v4367_v41 = vpop.permute.xlu1 %1117  ;;  %v4369_v42 = vpop.permute.xlu0 %1112  ;;  %v978_v12 = vmul.f32 0.5, %v3378_v24  ;;  %v979_v0 = vmul.f32 0.5, %v3380_v3  ;;  %v864_v14 = vmul.f32 %v4083_v30, %v831_v26  ;;  %v863_v4 = vmul.f32 %v4083_v30, %v830_v11 }
  0xed   : > { %1486 = vmatprep.subr.bf16.mxu0 %v1203_v60  ;;  %v3386_v63 = vpop.eup %3385  ;;  %v4382_v5 = vmul.f32 %v4367_v41, %v4272_v57  ;;  %v4386_v28 = vmul.f32 %v4369_v42, %v4293_v33  ;;  %v4390_v16 = vpack.c.bf16 %v4363_v27, %v4360_v61  ;;  %v1219_v19 = vunpack.c.l.bf16 %v1203_v60 }
  0xee   : > { %1487 = vmatpush1.bf16.msra.mxu0 %v4356_v49  ;;  %v1045_v58 = vsel %vm949_vm1, %v981_v13, %v1013_v38  ;;  %3393 = vpow2.f32 %v914_v21  ;;  %v862_v57 = vmul.f32 %v4083_v30, %v829_v62  ;;  %v1221_v33 = vunpack.c.h.bf16 %v1203_v60  ;;  %v3388_v62 = vpop.eup %3387 }
  0xef   : > { %1488 = vmatprep.subr.bf16.mxu0 %v4373_v20  ;;  %6663 = vst [vmem:[#allocation5_spill] sm:$0xff] %v4382_v5  ;;  %6664 = vst [vmem:[#allocation6_spill] sm:$0xff] %v4386_v28  ;;  %v1010_v24 = vsub.f32 1.0, %v978_v12  ;;  %3395 = vpow2.f32 %v916_v25  ;;  %v928_v26 = vmul.f32 1.442695, %v865_v50  ;;  %v1251_v11 = vsub.f32 %v4346_v35, %v1219_v19 }
  0xf0   : > { %v1011_v3 = vsub.f32 1.0, %v979_v0  ;;  %v984_v32 = vmul.f32 0.5, %v3382_v39  ;;  %v924_v53 = vmul.f32 1.442695, %v863_v4  ;;  %v1253_v23 = vsub.f32 %v4333_v51, %v1221_v33 }
  0xf1   : > { %v4405_v2 = vpack.c.bf16 %v4382_v5, %v4386_v28  ;;  %v985_v13 = vmul.f32 0.5, %v3384_v59  ;;  %v926_v37 = vmul.f32 1.442695, %v864_v14  ;;  %v4410_v60 = vmul.f32 %v4313_v46, %v4083_v30  ;;  %v1128_v46 = vpop.permute.xlu1 %1127  ;;  %v1123_v14 = vpop.permute.xlu0 %1122 }
  0xf2   : > { %1489 = vmatpush1.bf16.msra.mxu0 %v4390_v16  ;;  %v1071_v38 = vmul.f32 %v4317_v22, %v4083_v30  ;;  %v4415_v39 = vmul.f32 %v1044_v56, %v4083_v30  ;;  %v922_v21 = vmul.f32 1.442695, %v862_v57  ;;  %v1283_v25 = vpack.c.bf16 %v1253_v23, %v1251_v11  ;;  %v3390_v56 = vpop.eup %3389 }
  0xf3   : > { %1490 = vmatprep.subr.bf16.mxu0 %v4405_v2  ;;  %v1077_v59 = vmul.f32 %v1045_v58, %v4083_v30  ;;  %v1042_v50 = vsel %vm946_vm2, %v978_v12, %v1010_v24  ;;  %3397 = vpow2.f32 %v928_v26  ;;  %v1043_v22 = vsel %vm947_vm3, %v979_v0, %v1011_v3  ;;  %v3392_v34 = vpop.eup %3391 }
  0xf4   : > { %v1016_v4 = vsub.f32 1.0, %v984_v32  ;;  %v982_v19 = vmul.f32 0.5, %v3386_v63  ;;  %3399 = vpow2.f32 %v924_v53  ;;  %1373 = vmatprep.subr.bf16.mxu1 %v1283_v25  ;;  %v1218_v57 = vunpack.c.l.bf16 %v4356_v49 }
  0xf5   : > { %v1220_v58 = vunpack.c.h.bf16 %v4356_v49  ;;  %v1017_v33 = vsub.f32 1.0, %v985_v13  ;;  %3401 = vpow2.f32 %v926_v37  ;;  %v4428_v12 = vmul.f32 %v4367_v41, %v4263_v47  ;;  %v1133_v25 = vpop.permute.xlu0 %1132 }
  0xf6   : > { %v4432_v40 = vmul.f32 %v4369_v42, %v4290_v1  ;;  %v983_v0 = vmul.f32 0.5, %v3388_v62  ;;  %3403 = vpow2.f32 %v922_v21  ;;  %v4435_v63 = vmul.f32 %v1128_v46, %v4302_v18  ;;  %v1138_v62 = vpop.permute.xlu1 %1137 }
  0xf7   : > { %v4437_v24 = vmul.f32 %v1123_v14, %v1071_v38  ;;  %v1250_v49 = vsub.f32 %v4343_v17, %v1218_v57  ;;  %v1252_v26 = vsub.f32 %v4330_v31, %v1220_v58  ;;  %v4442_v3 = vmul.f32 %v1042_v50, %v4083_v30 }
  0xf8   : > { %v3394_v11 = vpop.eup %3393  ;;  %v1223_v47 = vunpack.c.l.bf16 %v4373_v20  ;;  %v1048_v1 = vsel %vm952_vm4, %v984_v32, %v1016_v4  ;;  %v1014_v41 = vsub.f32 1.0, %v982_v19  ;;  %v1075_v42 = vmul.f32 %v1043_v22, %v4083_v30 }
  0xf9   : > { %v3396_v18 = vpop.eup %3395  ;;  %v1282_v53 = vpack.c.bf16 %v1252_v26, %v1250_v49  ;;  %v1225_v23 = vunpack.c.h.bf16 %v4373_v20  ;;  %v1049_v37 = vsel %vm953_vm5, %v985_v13, %v1017_v33  ;;  %v4456_v10 = vpack.c.bf16 %v4428_v12, %v4432_v40 }
  0xfa   : > { %v1255_v38 = vsub.f32 %v4340_v29, %v1223_v47  ;;  %v1015_v32 = vsub.f32 1.0, %v983_v0  ;;  %v988_v21 = vmul.f32 0.5, %v3390_v56  ;;  %v4463_v20 = vpack.c.bf16 %v4435_v63, %v4437_v24 }
  0xfb   : > { %1374 = vmatpush1.bf16.msra.mxu1 %v1282_v53  ;;  %v1257_v48 = vsub.f32 %v4349_v7, %v1225_v23  ;;  %v4466_v13 = vmul.f32 %v1048_v1, %v4083_v30  ;;  %v989_v50 = vmul.f32 0.5, %v3392_v34  ;;  %1491 = vmatpush1.bf16.msra.mxu0 %v4456_v10  ;;  %v1081_v22 = vmul.f32 %v1049_v37, %v4083_v30 }
  0xfc   : > { %v1046_v4 = vsel %vm950_vm6, %v982_v19, %v1014_v41  ;;  %v986_v56 = vmul.f32 0.5, %v3394_v11  ;;  %v987_v57 = vmul.f32 0.5, %v3396_v18  ;;  %v4473_v33 = vmul.f32 %v1128_v46, %v4296_v15  ;;  %1492 = vmatprep.subr.bf16.mxu0 %v4463_v20 }
  0xfd   : > { %v3398_v58 = vpop.eup %3397  ;;  %v4476_v49 = vmul.f32 %v1123_v14, %v4410_v60  ;;  %v1285_v26 = vpack.c.bf16 %v1257_v48, %v1255_v38  ;;  %v1222_v34 = vunpack.c.l.bf16 %v4390_v16  ;;  %v4480_v1 = vmul.f32 %v1138_v62, %v1077_v59  ;;  %v1148_v38 = vpop.permute.xlu1 %1147 }
  0xfe   : > { %v3400_v47 = vpop.eup %3399  ;;  %v4482_v53 = vmul.f32 %v1133_v25, %v1075_v42  ;;  %v1047_v52 = vsel %vm951_vm7, %v983_v0, %v1015_v32  ;;  %v1020_v19 = vsub.f32 1.0, %v988_v21  ;;  %v1224_v60 = vunpack.c.h.bf16 %v4390_v16 }
  0xff   : > { %v3402_v15 = vpop.eup %3401  ;;  %1375 = vmatprep.subr.bf16.mxu1 %v1285_v26  ;;  %v1254_v46 = vsub.f32 %v4360_v61, %v1222_v34  ;;  %v1227_v14 = vunpack.c.l.bf16 %v4405_v2  ;;  %v1021_v11 = vsub.f32 1.0, %v989_v50  ;;  %v1229_v59 = vunpack.c.h.bf16 %v4405_v2 }
 0x100   : > { %v3404_v41 = vpop.eup %3403  ;;  %v1018_v18 = vsub.f32 1.0, %v986_v56  ;;  %v1019_v42 = vsub.f32 1.0, %v987_v57  ;;  %v993_v23 = vmul.f32 0.5, %v3398_v58  ;;  %v1256_v8 = vsub.f32 %v4363_v27, %v1224_v60  ;;  %v1143_v58 = vpop.permute.xlu0 %1142 }
 0x101   : > { %v1259_v0 = vsub.f32 %v4386_v28, %v1227_v14  ;;  %v4495_v37 = vpack.c.bf16 %v4473_v33, %v4476_v49  ;;  %v991_v16 = vmul.f32 0.5, %v3400_v47  ;;  %v1078_v32 = vmul.f32 %v1046_v4, %v4083_v30 }
 0x102   : > { %v1261_v2 = vsub.f32 %v4382_v5, %v1229_v59  ;;  %v4503_v48 = vpack.c.bf16 %v4480_v1, %v4482_v53  ;;  %v1079_v26 = vmul.f32 %v1047_v52, %v4083_v30  ;;  %v1284_v34 = vpack.c.bf16 %v1256_v8, %v1254_v46 }
 0x103   : > { %1493 = vmatpush1.bf16.msra.mxu0 %v4495_v37  ;;  %v1052_v47 = vsel %vm956_vm8, %v988_v21, %v1020_v19  ;;  %v992_v60 = vmul.f32 0.5, %v3402_v15  ;;  %v1053_v4 = vsel %vm957_vm9, %v989_v50, %v1021_v11  ;;  %v990_v59 = vmul.f32 0.5, %v3404_v41 }
 0x104   : > { %v1287_v14 = vpack.c.bf16 %v1261_v2, %v1259_v0  ;;  %1494 = vmatprep.subr.bf16.mxu0 %v4503_v48  ;;  %v1298_v28 = vlaneseq  ;;  %1376 = vmatpush1.bf16.msra.mxu1 %v1284_v34  ;;  %v1050_v5 = vsel %vm954_vm10, %v986_v56, %v1018_v18  ;;  %v1051_v52 = vsel %vm955_vm11, %v987_v57, %v1019_v42  ;;  %v1158_v57 = vpop.permute.xlu1 %1157  ;;  %v1153_v11 = vpop.permute.xlu0 %1152 }
 0x105   : > { %v1025_v46 = vsub.f32 1.0, %v993_v23  ;;  %v1023_v8 = vsub.f32 1.0, %v991_v16  ;;  %v4518_v9 = vmul.f32 %v1138_v62, %v4415_v39  ;;  %v4521_v21 = vmul.f32 %v1133_v25, %v4442_v3 }
 0x106   : > { %1377 = vmatprep.subr.bf16.mxu1 %v1287_v14  ;;  %v1226_v44 = vunpack.c.l.bf16 %v4456_v10  ;;  %v1228_v50 = vunpack.c.h.bf16 %v4456_v10  ;;  %v4525_v19 = vmul.f32 %v1148_v38, %v1081_v22  ;;  %v4527_v55 = vmul.f32 %v1143_v58, %v1079_v26 }
 0x107   : > { %v1231_v6 = vunpack.c.l.bf16 %v4463_v20  ;;  %v1024_v56 = vsub.f32 1.0, %v992_v60  ;;  %v1233_v3 = vunpack.c.h.bf16 %v4463_v20  ;;  %v1022_v62 = vsub.f32 1.0, %v990_v59 }
 0x108   : > { %v1258_v15 = vsub.f32 %v4432_v40, %v1226_v44  ;;  %v1260_v39 = vsub.f32 %v4428_v12, %v1228_v50  ;;  %v1085_v25 = vmul.f32 %v1053_v4, %v4083_v30  ;;  %v1083_v10 = vmul.f32 %v1051_v52, %v4083_v30  ;;  %v1168_v45 = vpop.permute.xlu1 %1167 }
 0x109   : > { %v1263_v22 = vsub.f32 %v4437_v24, %v1231_v6  ;;  %v1057_v41 = vsel %vm961_vm12, %v993_v23, %v1025_v46  ;;  %v1265_v42 = vsub.f32 %v4435_v63, %v1233_v3  ;;  %v1210_v0 = vpack.c.bf16 %v4518_v9, %v4521_v21 }
 0x10a   : > { %v1286_v18 = vpack.c.bf16 %v1260_v39, %v1258_v15  ;;  %v1055_v20 = vsel %vm959_vm15, %v991_v16, %v1023_v8  ;;  %v1084_v2 = vmul.f32 %v1052_v47, %v4083_v30  ;;  %v1082_v26 = vmul.f32 %v1050_v5, %v4083_v30 }
 0x10b   : > { %v1213_v34 = vpack.c.bf16 %v4525_v19, %v4527_v55  ;;  %v1289_v14 = vpack.c.bf16 %v1265_v42, %v1263_v22  ;;  %1495 = vmatpush1.bf16.msra.mxu0 %v1210_v0  ;;  %v1056_v36 = vsel %vm960_vm13, %v992_v60, %v1024_v56  ;;  %v1054_v23 = vsel %vm958_vm14, %v990_v59, %v1022_v62 }
 0x10c   : > { %1378 = vmatpush1.bf16.msra.mxu1 %v1286_v18  ;;  %v4551_v4 = vshrl.u32 %v1298_v28, 7  ;;  %v4554_v43 = vmul.f32 %v1148_v38, %v4466_v13  ;;  %v4556_v16 = vmul.f32 %v1143_v58, %v1078_v32  ;;  %v1089_v5 = vmul.f32 %v1057_v41, %v4083_v30  ;;  %v1163_v38 = vpop.permute.xlu0 %1162 }
 0x10d   : > { %1496 = vmatprep.subr.bf16.mxu0 %v1213_v34  ;;  %v1087_v47 = vmul.f32 %v1055_v20, %v4083_v30  ;;  %v4560_v52 = vmul.f32 %v1158_v57, %v1085_v25  ;;  %v4562_v46 = vmul.f32 %v1153_v11, %v1083_v10  ;;  %1379 = vmatprep.subr.bf16.mxu1 %v1289_v14  ;;  %v1230_v54 = vunpack.c.l.bf16 %v4495_v37 }
 0x10e   : > { %v1232_v60 = vunpack.c.h.bf16 %v4495_v37  ;;  %v1088_v13 = vmul.f32 %v1056_v36, %v4083_v30  ;;  %v1086_v32 = vmul.f32 %v1054_v23, %v4083_v30  ;;  %v1235_v58 = vunpack.c.l.bf16 %v4503_v48 }
 0x10f   : > { %v4569_v59 = vand.u32 127, %v1298_v28  ;;  %v4571_v8 = vmul.f32 %v1158_v57, %v1084_v2  ;;  %v4573_v44 = vmul.f32 %v1153_v11, %v1082_v26  ;;  %v1262_v50 = vsub.f32 %v4476_v49, %v1230_v54 }
 0x110   : > { %v1264_v6 = vsub.f32 %v4473_v33, %v1232_v60  ;;  %v4577_v56 = vmul.f32 %v1168_v45, %v1089_v5  ;;  %v1237_v37 = vunpack.c.h.bf16 %v4503_v48  ;;  %v1267_v15 = vsub.f32 %v4482_v53, %v1235_v58 }
 0x111   : > { %v1212_v30 = vpack.c.bf16 %v4554_v43, %v4556_v16  ;;  %v4583_v39 = vmul.f32 %v1163_v38, %v1087_v47  ;;  %v1215_v57 = vpack.c.bf16 %v4560_v52, %v4562_v46  ;;  %v1234_v3 = vunpack.c.l.bf16 %v1210_v0 }
 0x112   : > { %v1288_v28 = vpack.c.bf16 %v1264_v6, %v1262_v50  ;;  %v1269_v62 = vsub.f32 %v4480_v1, %v1237_v37  ;;  %v1236_v25 = vunpack.c.h.bf16 %v1210_v0  ;;  %v1300_v11 = vadd.s32 8, %v4551_v4 }
 0x113   : > { %1497 = vmatpush1.bf16.msra.mxu0 %v1212_v30  ;;  %vm1317_vm0 = vcmp.lt.s32.totalorder %v4569_v59, %v4551_v4  ;;  %v4591_v48 = vmul.f32 %v1168_v45, %v1088_v13  ;;  %v4593_v10 = vmul.f32 %v1163_v38, %v1086_v32  ;;  %v1266_v22 = vsub.f32 %v4521_v21, %v1234_v3 }
 0x114   : > { %1380 = vmatpush1.bf16.msra.mxu1 %v1288_v28  ;;  %1498 = vmatprep.subr.bf16.mxu0 %v1215_v57  ;;  %v1239_v41 = vunpack.c.l.bf16 %v1213_v34  ;;  %v1291_v18 = vpack.c.bf16 %v1269_v62, %v1267_v15  ;;  %v1268_v42 = vsub.f32 %v4518_v9, %v1236_v25  ;;  %v1241_v20 = vunpack.c.h.bf16 %v1213_v34 }
 0x115   : > { %v1214_v0 = vpack.c.bf16 %v4571_v8, %v4573_v44  ;;  %v1217_v26 = vpack.c.bf16 %v4577_v56, %v4583_v39  ;;  %v1238_v14 = vunpack.c.l.bf16 %v1212_v30  ;;  %v1301_v36 = vadd.s32 16, %v4551_v4 }
 0x116   : > { %v1271_v2 = vsub.f32 %v4527_v55, %v1239_v41  ;;  %1381 = vmatprep.subr.bf16.mxu1 %v1291_v18  ;;  %v1290_v23 = vpack.c.bf16 %v1268_v42, %v1266_v22  ;;  %v1273_v5 = vsub.f32 %v4525_v19, %v1241_v20  ;;  %v1240_v47 = vunpack.c.h.bf16 %v1212_v30 }
 0x117   : > { %1499 = vmatpush1.bf16.msra.mxu0 %v1214_v0  ;;  %vm1318_vm1 = vcmp.lt.s32.totalorder %v4569_v59, %v1300_v11  ;;  %v1270_v34 = vsub.f32 %v4556_v16, %v1238_v14  ;;  %v1243_v45 = vunpack.c.l.bf16 %v1215_v57  ;;  %v1245_v54 = vunpack.c.h.bf16 %v1215_v57 }
 0x118   : > { %1500 = vmatprep.subr.bf16.mxu0 %v1217_v26  ;;  %v1216_v60 = vpack.c.bf16 %v4591_v48, %v4593_v10  ;;  %1382 = vmatpush1.bf16.msra.mxu1 %v1290_v23  ;;  %v1293_v13 = vpack.c.bf16 %v1273_v5, %v1271_v2  ;;  %v1272_v38 = vsub.f32 %v4554_v43, %v1240_v47  ;;  %v1242_v32 = vunpack.c.l.bf16 %v1214_v0  ;;  %vm4618_vm2 = vmpackc.low %vm1318_vm1, %vm1317_vm0 }
 0x119   : > { %v1244_v58 = vunpack.c.h.bf16 %v1214_v0  ;;  %v1275_v50 = vsub.f32 %v4562_v46, %v1243_v45  ;;  %v1277_v6 = vsub.f32 %v4560_v52, %v1245_v54  ;;  %v1247_v37 = vunpack.c.l.bf16 %v1217_v26 }
 0x11a   : > { %v1249_v15 = vunpack.c.h.bf16 %v1217_v26  ;;  %1383 = vmatprep.subr.bf16.mxu1 %v1293_v13  ;;  %v1292_v30 = vpack.c.bf16 %v1272_v38, %v1270_v34  ;;  %v1274_v28 = vsub.f32 %v4573_v44, %v1242_v32  ;;  %v1246_v3 = vunpack.c.l.bf16 %v1216_v60 }
 0x11b   : > { %1501 = vmatpush1.bf16.msra.mxu0 %v1216_v60  ;;  %v1276_v57 = vsub.f32 %v4571_v8, %v1244_v58  ;;  %v1295_v25 = vpack.c.bf16 %v1277_v6, %v1275_v50  ;;  %v1279_v22 = vsub.f32 %v4583_v39, %v1247_v37  ;;  %v1302_v18 = vadd.s32 24, %v4551_v4 }
 0x11c   : > { %v1281_v41 = vsub.f32 %v4577_v56, %v1249_v15  ;;  %1384 = vmatpush1.bf16.msra.mxu1 %v1292_v30  ;;  %v1248_v42 = vunpack.c.h.bf16 %v1216_v60  ;;  %v3623_v20 = vmov 1.0|1.0   ;;  %v1278_v0 = vsub.f32 %v4593_v10, %v1246_v3 }
 0x11d   : > { %1385 = vmatprep.subr.bf16.mxu1 %v1295_v25  ;;  %v1294_v11 = vpack.c.bf16 %v1276_v57, %v1274_v28  ;;  %v6667_v26 = vmov 0   ;;  %vm1319_vm3 = vcmp.lt.s32.totalorder %v4569_v59, %v1301_v36  ;;  %vm1320_vm4 = vcmp.lt.s32.totalorder %v4569_v59, %v1302_v18 }
 0x11e   : > { %3177 = vmatmul.mubr.msk.bf16.vlgmr.msra.gmra.mrb[0].mxu0 %vm4618_vm2, %v3623_v20  ;;  %v1280_v2 = vsub.f32 %v4591_v48, %v1248_v42  ;;  %v1297_v14 = vpack.c.bf16 %v1281_v41, %v1279_v22  ;;  %vm3162_vm5 = vmpackc.low %vm1320_vm4, %vm1319_vm3  ;;  %v1303_v5 = vadd.s32 32, %v4551_v4  ;;  %v1304_v47 = vadd.s32 40, %v4551_v4  ;;  %v6668_v41 = vld [vmem:[#allocation5_spill] sm:$0xff]  ;;  %v6669_v42 = vld [vmem:[#allocation6_spill] sm:$0xff] }
 0x11f   : > { %1528 = vmatprep.mubr.bf16.mxu0 %v6667_v26  ;;  %v1305_v36 = vadd.s32 48, %v4551_v4  ;;  %v1306_v34 = vadd.s32 56, %v4551_v4  ;;  %v1307_v45 = vadd.s32 64, %v4551_v4  ;;  %v1308_v54 = vadd.s32 72, %v4551_v4 }
 0x120   : > { %1386 = vmatpush1.bf16.msra.mxu1 %v1294_v11  ;;  %v1296_v23 = vpack.c.bf16 %v1280_v2, %v1278_v0  ;;  %vm1321_vm6 = vcmp.lt.s32.totalorder %v4569_v59, %v1303_v5  ;;  %vm1322_vm7 = vcmp.lt.s32.totalorder %v4569_v59, %v1304_v47  ;;  %v1309_v60 = vadd.s32 80, %v4551_v4 }
 0x121   : > { %1387 = vmatprep.subr.bf16.mxu1 %v1297_v14  ;;  %vm3164_vm8 = vmpackc.low %vm1322_vm7, %vm1321_vm6  ;;  %vm1323_vm9 = vcmp.lt.s32.totalorder %v4569_v59, %v1305_v36  ;;  %vm1324_vm10 = vcmp.lt.s32.totalorder %v4569_v59, %v1306_v34  ;;  %vm1325_vm12 = vcmp.lt.s32.totalorder %v4569_v59, %v1307_v45  ;;  %vm1326_vm13 = vcmp.lt.s32.totalorder %v4569_v59, %v1308_v54 }
 0x122   : > { %vm3166_vm11 = vmpackc.low %vm1324_vm10, %vm1323_vm9  ;;  %v1310_v13 = vadd.s32 88, %v4551_v4  ;;  %vm1327_vm15 = vcmp.lt.s32.totalorder %v4569_v59, %v1309_v60  ;;  %v1311_v38 = vadd.s32 96, %v4551_v4  ;;  %v1312_v32 = vadd.s32 104, %v4551_v4 }
 0x123   : > { %vm3168_vm14 = vmpackc.low %vm1326_vm13, %vm1325_vm12  ;;  %v1313_v58 = vadd.s32 112, %v4551_v4  ;;  %v1314_v50 = vadd.s32 120, %v4551_v4  ;;  %v1603_v4 = vsub.f32 0.0, %v4360_v61  ;;  %v1604_v6 = vsub.f32 0.0, %v4340_v29 }
 0x124   : > { %1388 = vmatpush1.bf16.msra.mxu1 %v1296_v23  ;;  %vm1328_vm0 = vcmp.lt.s32.totalorder %v4569_v59, %v1310_v13  ;;  %vm1330_vm3 = vcmp.lt.s32.totalorder %v4569_v59, %v1312_v32  ;;  %v1599_v37 = vsub.f32 0.0, %v4343_v17  ;;  %v1600_v15 = vsub.f32 0.0, %v4346_v35 }
 0x125   : > { %vm3170_vm1 = vmpackc.low %vm1328_vm0, %vm1327_vm15  ;;  %vm1332_vm6 = vcmp.lt.s32.totalorder %v4569_v59, %v1314_v50  ;;  %v1605_v30 = vsub.f32 0.0, %v4363_v27  ;;  %v1641_v28 = vmul.f32 1.442695, %v1604_v6  ;;  %v1606_v57 = vsub.f32 0.0, %v4349_v7 }
 0x126   : > { %3179 = vmatmul.mubr.msk.bf16.gmra.mrb[4].mxu0 %vm3162_vm5, %v3623_v20  ;;  %v1631_v3 = vmul.f32 1.442695, %v1599_v37  ;;  %v1601_v62 = vsub.f32 0.0, %v4330_v31  ;;  %v1633_v25 = vmul.f32 1.442695, %v1600_v15  ;;  %v1602_v22 = vsub.f32 0.0, %v4333_v51 }
 0x127   : > { %1538 = vmatprep.mubr.bf16.mxu0 %v6667_v26  ;;  %3161 = vmatmul.mubr.msk.bf16.vlgmr.msra.gmra.mrb[0].mxu1 %vm4618_vm2, %v3623_v20  ;;  %vm1329_vm2 = vcmp.lt.s32.totalorder %v4569_v59, %v1311_v38  ;;  %v1643_v61 = vmul.f32 1.442695, %v1605_v30  ;;  %v1609_v29 = vsub.f32 0.0, %v4428_v12  ;;  %v1645_v17 = vmul.f32 1.442695, %v1606_v57  ;;  %v3227_v30 = vld [vmem:[%s4763_s17 + $0x198] sm:$0xff] }
 0x128   : > { %1415 = vmatprep.mubr.bf16.mxu1 %v6667_v26  ;;  %vm3172_vm4 = vmpackc.low %vm1330_vm3, %vm1329_vm2  ;;  %v1610_v35 = vsub.f32 0.0, %v6668_v41  ;;  %v1635_v18 = vmul.f32 1.442695, %v1601_v62  ;;  %v1607_v27 = vsub.f32 0.0, %v4432_v40  ;;  %v1637_v7 = vmul.f32 1.442695, %v1602_v22 }
 0x129   : > { %v1651_v31 = vmul.f32 1.442695, %v1609_v29  ;;  %v1613_v51 = vsub.f32 0.0, %v4473_v33  ;;  %v1614_v12 = vsub.f32 0.0, %v4435_v63  ;;  %v1611_v2 = vsub.f32 0.0, %v4476_v49 }
 0x12a   : > { %v1653_v11 = vmul.f32 1.442695, %v1610_v35  ;;  %v1647_v0 = vmul.f32 1.442695, %v1607_v27  ;;  %v1612_v40 = vsub.f32 0.0, %v4437_v24  ;;  %v1617_v23 = vsub.f32 0.0, %v4518_v9 }
 0x12b   : > { %v1659_v14 = vmul.f32 1.442695, %v1613_v51  ;;  %v1661_v5 = vmul.f32 1.442695, %v1614_v12  ;;  %v1618_v33 = vsub.f32 0.0, %v4480_v1  ;;  %v1615_v45 = vsub.f32 0.0, %v4521_v21 }
 0x12c   : > { %v1655_v63 = vmul.f32 1.442695, %v1611_v2  ;;  %v1657_v49 = vmul.f32 1.442695, %v1612_v40  ;;  %v1667_v24 = vmul.f32 1.442695, %v1617_v23 }
 0x12d   : > { %v1669_v9 = vmul.f32 1.442695, %v1618_v33  ;;  %v1616_v1 = vsub.f32 0.0, %v4482_v53  ;;  %v1663_v32 = vmul.f32 1.442695, %v1615_v45  ;;  %v1621_v50 = vsub.f32 0.0, %v4554_v43 }
 0x12e   : > { %3181 = vmatmul.mubr.msk.bf16.gmra.mrb[8].mxu0 %vm3164_vm8, %v3623_v20  ;;  %v1622_v53 = vsub.f32 0.0, %v4525_v19  ;;  %v1619_v37 = vsub.f32 0.0, %v4556_v16  ;;  %v1620_v57 = vsub.f32 0.0, %v4527_v55  ;;  %v1625_v22 = vsub.f32 0.0, %v4571_v8  ;;  %v3225_v45 = vld [vmem:[%s4763_s17 + $0x188] sm:$0xff] }
 0x12f   : > { %1548 = vmatprep.mubr.bf16.mxu0 %v6667_v26  ;;  %3163 = vmatmul.mubr.msk.bf16.gmra.mrb[4].mxu1 %vm3162_vm5, %v3623_v20  ;;  %vm1331_vm5 = vcmp.lt.s32.totalorder %v4569_v59, %v1313_v58  ;;  %v1639_v59 = vmul.f32 1.442695, %v1603_v4  ;;  %v1665_v21 = vmul.f32 1.442695, %v1616_v1  ;;  %v1675_v19 = vmul.f32 1.442695, %v1621_v50 }
 0x130   : > { %1425 = vmatprep.mubr.bf16.mxu1 %v6667_v26  ;;  %vm3174_vm7 = vmpackc.low %vm1332_vm6, %vm1331_vm5  ;;  %v1671_v41 = vmul.f32 1.442695, %v1619_v37  ;;  %v1626_v35 = vsub.f32 0.0, %v4560_v52  ;;  %v1623_v51 = vsub.f32 0.0, %v4573_v44  ;;  %v3224_v52 = vld [vmem:[%s4763_s17 + $0x180] sm:$0xff]  ;;  %v1627_v37 = vsub.f32 0.0, %v4593_v10 }
 0x131   : > { %3405 = vpow2.f32 %v1639_v59  ;;  %v1683_v2 = vmul.f32 1.442695, %v1625_v22  ;;  %v1629_v44 = vsub.f32 0.0, %v4591_v48  ;;  %v3243_v59 = vld [vmem:[%s4763_s17 + $0x218] sm:$0xff]  ;;  %vm3031_vm9 = vcmask 1041408  }
 0x132   : > { %3407 = vpow2.f32 %v1641_v28  ;;  %v1685_v23 = vmul.f32 1.442695, %v1626_v35  ;;  %v1687_v50 = vmul.f32 1.442695, %v1627_v37  ;;  %vm3034_vm10 = vcmask 1042432  }
 0x133   : > { %3409 = vpow2.f32 %v1631_v3  ;;  %vm3040_vm12 = vcmask 1044480   ;;  %vm3043_vm13 = vcmask 1045504  }
 0x134   : > { %3411 = vpow2.f32 %v1633_v25  ;;  %v1677_v25 = vmul.f32 1.442695, %v1622_v53 }
 0x135   : > { %3413 = vpow2.f32 %v1643_v61 }
 0x136   : > { %3183 = vmatmul.mubr.msk.bf16.gmra.mrb[12].mxu0 %vm3166_vm11, %v3623_v20  ;;  %3415 = vpow2.f32 %v1645_v17 }
 0x137   : > { %1558 = vmatprep.mubr.bf16.mxu0 %v6667_v26  ;;  %3165 = vmatmul.mubr.msk.bf16.gmra.mrb[8].mxu1 %vm3164_vm8, %v3623_v20  ;;  %3417 = vpow2.f32 %v1635_v18  ;;  %vm3028_vm8 = vcmask 1040384  }
 0x138   : > { %1435 = vmatprep.mubr.bf16.mxu1 %v6667_v26  ;;  %3419 = vpow2.f32 %v1637_v7 }
 0x139   : > { %3421 = vpow2.f32 %v1651_v31  ;;  %v1673_v31 = vmul.f32 1.442695, %v1620_v57 }
 0x13a   : > { %3423 = vpow2.f32 %v1653_v11  ;;  %v3240_v11 = vld [vmem:[%s4763_s17 + $0x200] sm:$0xff] }
 0x13b   : > { %v4705_v47 = vpop.eup %3405  ;;  %3425 = vpow2.f32 %v1647_v0  ;;  %v4777_v33 = vunpack.c.l.bf16 %v3240_v11 }
 0x13c   : > { %v4707_v36 = vpop.eup %3407 }
 0x13d   : > { %v4709_v34 = vpop.eup %3409  ;;  %v2180_v35 = vmul.f32 %v4777_v33, %v4777_v33 }
 0x13e   : > { %3185 = vmatmul.mubr.msk.bf16.gmra.mrb[16].mxu0 %vm3168_vm14, %v3623_v20  ;;  %v4712_v54 = vpop.eup %3411 }
 0x13f   : > { %1568 = vmatprep.mubr.bf16.mxu0 %v6667_v26  ;;  %3167 = vmatmul.mubr.msk.bf16.gmra.mrb[12].mxu1 %vm3166_vm11, %v3623_v20  ;;  %v4715_v60 = vpop.eup %3413  ;;  %vm3037_vm11 = vcmask 1043456  }
 0x140   : > { %1445 = vmatprep.mubr.bf16.mxu1 %v6667_v26  ;;  %v4717_v13 = vpop.eup %3415 }
 0x141   : > { %6670 = vst [vmem:[#allocation5_spill] sm:$0xff] %v4717_v13  ;;  %v4719_v38 = vpop.eup %3417  ;;  %v5090_v13 = vld [vmem:[%s4763_s17 + $0x118] sm:$0xff] }
 0x142   : > { %v4721_v58 = vpop.eup %3419  ;;  %6736 = vst [vmem:[#allocation71_spill] sm:$0xff] %v5090_v13 }
 0x143   : > { %v4724_v4 = vpop.eup %3421 }
 0x144   : > { %6671 = vst [vmem:[#allocation6_spill] sm:$0xff] %v4724_v4  ;;  %v4731_v6 = vpop.eup %3423  ;;  %v3261_v4 = vld [vmem:[%s4763_s17 + $0x2a8] sm:$0xff] }
 0x145   : > { %6672 = vst [vmem:[#allocation7_spill] sm:$0xff] %v4731_v6  ;;  %v4734_v15 = vpop.eup %3425 }
 0x146   : > { %3187 = vmatmul.mubr.msk.bf16.gmra.mrb[20].mxu0 %vm3170_vm1, %v3623_v20  ;;  %6673 = vst [vmem:[#allocation8_spill] sm:$0xff] %v4734_v15 }
 0x147   : > { %1578 = vmatprep.mubr.bf16.mxu0 %v6667_v26  ;;  %3169 = vmatmul.mubr.msk.bf16.gmra.mrb[16].mxu1 %vm3168_vm14, %v3623_v20  ;;  %vm3046_vm14 = vcmask 1046528  }
 0x148   : > { %1455 = vmatprep.mubr.bf16.mxu1 %v6667_v26 }
 0x14e   : > { %3189 = vmatmul.mubr.msk.bf16.gmra.mrb[24].mxu0 %vm3172_vm4, %v3623_v20 }
 0x14f   : > { %1588 = vmatprep.mubr.bf16.mxu0 %v6667_v26  ;;  %3171 = vmatmul.mubr.msk.bf16.gmra.mrb[20].mxu1 %vm3170_vm1, %v3623_v20 }
 0x150   : > { %1465 = vmatprep.mubr.bf16.mxu1 %v6667_v26 }
 0x156   : > { %3191 = vmatmul.mubr.msk.bf16.gmra.mrb[28].mxu0 %vm3174_vm7, %v3623_v20 }
 0x157   : > { %3173 = vmatmul.mubr.msk.bf16.gmra.mrb[24].mxu1 %vm3172_vm4, %v3623_v20 }
 0x158   : > { %1475 = vmatprep.mubr.bf16.mxu1 %v6667_v26 }
 0x15f   : > { %3175 = vmatmul.mubr.msk.bf16.gmra.mrb[28].mxu1 %vm3174_vm7, %v3623_v20  ;;  %v1608_v20 = vsub.f32 0.0, %v6669_v42 }
 0x161   : > { %v1649_v26 = vmul.f32 1.442695, %v1608_v20 }
 0x163   : > { %3427 = vpow2.f32 %v1649_v26  ;;  %v1624_v26 = vsub.f32 0.0, %v4562_v46 }
 0x164   : > { %3429 = vpow2.f32 %v1659_v14 }
 0x165   : > { %3431 = vpow2.f32 %v1661_v5  ;;  %v4775_v5 = vunpack.c.l.bf16 %v3224_v52  ;;  %v1681_v53 = vmul.f32 1.442695, %v1624_v26 }
 0x166   : > { %3433 = vpow2.f32 %v1655_v63  ;;  %v3256_v63 = vld [vmem:[%s4763_s17 + $0x280] sm:$0xff] }
 0x167   : > { %3435 = vpow2.f32 %v1657_v49  ;;  %v4780_v49 = vunpack.c.h.bf16 %v3224_v52  ;;  %v4794_v57 = vunpack.c.l.bf16 %v3256_v63  ;;  %v4809_v52 = vunpack.c.h.bf16 %v3256_v63 }
 0x168   : > { %3437 = vpow2.f32 %v1667_v24  ;;  %v4782_v24 = vunpack.c.h.bf16 %v3240_v11  ;;  %v4811_v11 = vunpack.c.h.bf16 %v3225_v45 }
 0x169   : > { %3439 = vpow2.f32 %v1669_v9  ;;  %v3241_v9 = vld [vmem:[%s4763_s17 + $0x208] sm:$0xff]  ;;  %v2245_v14 = vmul.f32 %v4809_v52, %v4809_v52 }
 0x16a   : > { %3441 = vpow2.f32 %v1663_v32  ;;  %v1679_v32 = vmul.f32 1.442695, %v1623_v51  ;;  %v4798_v22 = vunpack.c.l.bf16 %v3241_v9  ;;  %v2181_v10 = vmul.f32 %v4782_v24, %v4782_v24  ;;  %v3257_v51 = vld [vmem:[%s4763_s17 + $0x288] sm:$0xff] }
 0x16b   : > { %3443 = vpow2.f32 %v1665_v21  ;;  %v4820_v0 = vunpack.c.l.bf16 %v3257_v51  ;;  %v4837_v7 = vunpack.c.h.bf16 %v3257_v51  ;;  %v2151_v27 = vmul.f32 %v4811_v11, %v4811_v11 }
 0x16c   : > { %3445 = vpow2.f32 %v1675_v19 }
 0x16d   : > { %v4738_v28 = vpop.eup %3427  ;;  %3447 = vpow2.f32 %v1677_v25  ;;  %v4796_v25 = vunpack.c.l.bf16 %v3225_v45  ;;  %v2182_v45 = vmul.f32 %v4798_v22, %v4798_v22  ;;  %v2246_v51 = vmul.f32 %v4820_v0, %v4820_v0 }
 0x16e   : > { %6674 = vst [vmem:[#allocation9_spill] sm:$0xff] %v4738_v28  ;;  %v4742_v3 = vpop.eup %3429  ;;  %3449 = vpow2.f32 %v1671_v41  ;;  %v2148_v41 = vmul.f32 %v4775_v5, %v4775_v5  ;;  %v5012_v28 = vunpack.c.h.bf16 %v3261_v4 }
 0x16f   : > { %6675 = vst [vmem:[#allocation10_spill] sm:$0xff] %v4742_v3  ;;  %v4747_v61 = vpop.eup %3431  ;;  %3451 = vpow2.f32 %v1673_v31  ;;  %v2149_v31 = vmul.f32 %v4780_v49, %v4780_v49  ;;  %v2150_v63 = vmul.f32 %v4796_v25, %v4796_v25 }
 0x170   : > { %6676 = vst [vmem:[#allocation11_spill] sm:$0xff] %v4747_v61  ;;  %v4752_v55 = vpop.eup %3433  ;;  %3453 = vpow2.f32 %v1683_v2  ;;  %v4813_v2 = vunpack.c.h.bf16 %v3241_v9  ;;  %v3226_v9 = vld [vmem:[%s4763_s17 + $0x190] sm:$0xff]  ;;  %v2212_v37 = vadd.f32 %v2180_v35, %v2148_v41  ;;  %v1691_v41 = vmul.f32 1.442695, %v1629_v44  ;;  %6718 = vst [vmem:[#allocation53_spill] sm:$0xff] %v5012_v28 }
 0x171   : > { %6677 = vst [vmem:[#allocation12_spill] sm:$0xff] %v4752_v55  ;;  %v4758_v42 = vpop.eup %3435  ;;  %3455 = vpow2.f32 %v1685_v23  ;;  %v2244_v23 = vmul.f32 %v4794_v57, %v4794_v57  ;;  %v2213_v48 = vadd.f32 %v2181_v10, %v2149_v31  ;;  %v4844_v35 = vunpack.c.l.bf16 %v3226_v9  ;;  %v3258_v10 = vld [vmem:[%s4763_s17 + $0x290] sm:$0xff] }
 0x172   : > { %6678 = vst [vmem:[#allocation13_spill] sm:$0xff] %v4758_v42  ;;  %v4767_v12 = vpop.eup %3437  ;;  %3457 = vpow2.f32 %v1679_v32  ;;  %v3242_v32 = vld [vmem:[%s4763_s17 + $0x210] sm:$0xff]  ;;  %v2214_v8 = vadd.f32 %v2182_v45, %v2150_v63  ;;  %v4853_v29 = vunpack.c.h.bf16 %v3226_v9  ;;  %v2247_v9 = vmul.f32 %v4837_v7, %v4837_v7 }
 0x173   : > { %6679 = vst [vmem:[#allocation14_spill] sm:$0xff] %v4767_v12  ;;  %v4771_v40 = vpop.eup %3439  ;;  %3459 = vpow2.f32 %v1681_v53  ;;  %v1628_v53 = vsub.f32 0.0, %v4583_v39  ;;  %v2183_v39 = vmul.f32 %v4813_v2, %v4813_v2  ;;  %6686 = vst [vmem:[#allocation21_spill] sm:$0xff] %v4844_v35  ;;  %v4846_v31 = vunpack.c.l.bf16 %v3242_v32 }
 0x174   : > { %6680 = vst [vmem:[#allocation15_spill] sm:$0xff] %v4771_v40  ;;  %v4788_v21 = vpop.eup %3441  ;;  %3461 = vpow2.f32 %v1687_v50  ;;  %6689 = vst [vmem:[#allocation24_spill] sm:$0xff] %v4853_v29  ;;  %v4855_v16 = vunpack.c.h.bf16 %v3242_v32  ;;  %v2276_v62 = vadd.f32 %v2244_v23, %v2212_v37  ;;  %v2277_v63 = vadd.f32 %v2245_v14, %v2213_v48  ;;  %v3259_v48 = vld [vmem:[%s4763_s17 + $0x298] sm:$0xff] }
 0x175   : > { %6681 = vst [vmem:[#allocation16_spill] sm:$0xff] %v4788_v21  ;;  %v4792_v19 = vpop.eup %3443  ;;  %6687 = vst [vmem:[#allocation22_spill] sm:$0xff] %v4846_v31  ;;  %v1689_v17 = vmul.f32 1.442695, %v1628_v53  ;;  %v2215_v45 = vadd.f32 %v2183_v39, %v2151_v27  ;;  %v2152_v32 = vmul.f32 %v4844_v35, %v4844_v35  ;;  %v2184_v40 = vmul.f32 %v4846_v31, %v4846_v31 }
 0x176   : > { %6682 = vst [vmem:[#allocation17_spill] sm:$0xff] %v4792_v19  ;;  %v4817_v1 = vpop.eup %3445  ;;  %6690 = vst [vmem:[#allocation25_spill] sm:$0xff] %v4855_v16  ;;  %v4872_v50 = vunpack.c.l.bf16 %v3227_v30  ;;  %v4874_v44 = vunpack.c.l.bf16 %v3243_v59  ;;  %v2278_v53 = vadd.f32 %v2246_v51, %v2214_v8  ;;  %v4878_v14 = vunpack.c.h.bf16 %v3258_v10 }
 0x177   : > { %6683 = vst [vmem:[#allocation18_spill] sm:$0xff] %v4817_v1  ;;  %v4828_v26 = vpop.eup %3447  ;;  %v4866_v1 = vunpack.c.l.bf16 %v3258_v10  ;;  %v2153_v27 = vmul.f32 %v4853_v29, %v4853_v29  ;;  %v2185_v37 = vmul.f32 %v4855_v16, %v4855_v16  ;;  %v1630_v19 = vsub.f32 0.0, %v4577_v56 }
 0x178   : > { %6684 = vst [vmem:[#allocation19_spill] sm:$0xff] %v4828_v26  ;;  %v4833_v46 = vpop.eup %3449  ;;  %6694 = vst [vmem:[#allocation29_spill] sm:$0xff] %v4872_v50  ;;  %v2308_v21 = vmax.f32 %v2276_v62, 1e-24  ;;  %3463 = vpow2.f32 %v1691_v41  ;;  %v2309_v8 = vmax.f32 %v2277_v63, 1e-24  ;;  %v2279_v10 = vadd.f32 %v2247_v9, %v2215_v45 }
 0x179   : > { %6685 = vst [vmem:[#allocation20_spill] sm:$0xff] %v4833_v46  ;;  %v4849_v20 = vpop.eup %3451  ;;  %6693 = vst [vmem:[#allocation28_spill] sm:$0xff] %v4866_v1  ;;  %v2248_v51 = vmul.f32 %v4866_v1, %v4866_v1  ;;  %v2216_v61 = vadd.f32 %v2184_v40, %v2152_v32  ;;  %v4892_v3 = vunpack.c.l.bf16 %v3259_v48  ;;  %v2154_v42 = vmul.f32 %v4872_v50, %v4872_v50  ;;  %v3228_v32 = vld [vmem:[%s4763_s17 + $0x1a0] sm:$0xff]  ;;  %v3229_v46 = vld [vmem:[%s4763_s17 + $0x1a8] sm:$0xff] }
 0x17a   : > { %6688 = vst [vmem:[#allocation23_spill] sm:$0xff] %v4849_v20  ;;  %v4859_v18 = vpop.eup %3453  ;;  %6695 = vst [vmem:[#allocation30_spill] sm:$0xff] %v4874_v44  ;;  %v2186_v12 = vmul.f32 %v4874_v44, %v4874_v44  ;;  %3465 = vpow2.f32 %v1689_v17  ;;  %v2310_v56 = vmax.f32 %v2278_v53, 1e-24  ;;  %v2217_v62 = vadd.f32 %v2185_v37, %v2153_v27  ;;  %v4912_v27 = vld [vmem:[%s4763_s17] sm:$0xff] }
 0x17b   : > { %6691 = vst [vmem:[#allocation26_spill] sm:$0xff] %v4859_v18  ;;  %v4862_v43 = vpop.eup %3455  ;;  %6697 = vst [vmem:[#allocation32_spill] sm:$0xff] %v4878_v14  ;;  %v2249_v41 = vmul.f32 %v4878_v14, %v4878_v14  ;;  %v4902_v40 = vmul.f32 1.442695, %v1630_v19  ;;  %3467 = vrsqrt.f32 %v2308_v21  ;;  %v4904_v45 = vunpack.c.h.bf16 %v3227_v30  ;;  %v4915_v37 = vld [vmem:[%s4763_s17 + $0x80] sm:$0xff]  ;;  %v4928_v18 = vld [vmem:[%s4763_s17 + $0x8] sm:$0xff] }
 0x17c   : > { %6692 = vst [vmem:[#allocation27_spill] sm:$0xff] %v4862_v43  ;;  %v4876_v23 = vpop.eup %3457  ;;  %6699 = vst [vmem:[#allocation34_spill] sm:$0xff] %v4892_v3  ;;  %v4906_v9 = vunpack.c.h.bf16 %v3243_v59  ;;  %3469 = vrsqrt.f32 %v2309_v8  ;;  %v4918_v19 = vld [vmem:[%s4763_s17 + $0x100] sm:$0xff]  ;;  %v2311_v26 = vmax.f32 %v2279_v10, 1e-24  ;;  %v2280_v21 = vadd.f32 %v2248_v51, %v2216_v61  ;;  %v5034_v14 = vld [vmem:[%s4763_s17 + $0x90] sm:$0xff] }
 0x17d   : > { %6696 = vst [vmem:[#allocation31_spill] sm:$0xff] %v4876_v23  ;;  %v4885_v39 = vpop.eup %3459  ;;  %6701 = vst [vmem:[#allocation36_spill] sm:$0xff] %v4902_v40  ;;  %v2218_v30 = vadd.f32 %v2186_v12, %v2154_v42  ;;  %v2250_v59 = vmul.f32 %v4892_v3, %v4892_v3  ;;  %v3244_v17 = vld [vmem:[%s4763_s17 + $0x220] sm:$0xff]  ;;  %3471 = vrsqrt.f32 %v2310_v56  ;;  %v2281_v43 = vadd.f32 %v2249_v41, %v2217_v62  ;;  %v4939_v56 = vld [vmem:[%s4763_s17 + $0x88] sm:$0xff] }
 0x17e   : > { %6698 = vst [vmem:[#allocation33_spill] sm:$0xff] %v4885_v39  ;;  %v4900_v63 = vpop.eup %3461  ;;  %6702 = vst [vmem:[#allocation37_spill] sm:$0xff] %v4904_v45  ;;  %v4930_v10 = vunpack.c.h.bf16 %v3259_v48  ;;  %v2155_v61 = vmul.f32 %v4904_v45, %v4904_v45  ;;  %v2187_v42 = vmul.f32 %v4906_v9, %v4906_v9  ;;  %v4941_v62 = vunpack.c.l.bf16 %v3228_v32  ;;  %v3260_v48 = vld [vmem:[%s4763_s17 + $0x2a0] sm:$0xff]  ;;  %v4953_v23 = vld [vmem:[%s4763_s17 + $0x108] sm:$0xff] }
 0x17f   : > { %6700 = vst [vmem:[#allocation35_spill] sm:$0xff] %v4900_v63  ;;  %6703 = vst [vmem:[#allocation38_spill] sm:$0xff] %v4906_v9  ;;  %v4943_v41 = vunpack.c.l.bf16 %v3244_v17  ;;  %3473 = vrsqrt.f32 %v2311_v26  ;;  %v2312_v53 = vmax.f32 %v2280_v21, 1e-24  ;;  %v2282_v8 = vadd.f32 %v2250_v59, %v2218_v30  ;;  %v3245_v30 = vld [vmem:[%s4763_s17 + $0x228] sm:$0xff]  ;;  %v3262_v9 = vld [vmem:[%s4763_s17 + $0x2b0] sm:$0xff] }
 0x180   : > { %6704 = vst [vmem:[#allocation39_spill] sm:$0xff] %v4930_v10  ;;  %6705 = vst [vmem:[#allocation40_spill] sm:$0xff] %v4941_v62  ;;  %v2313_v20 = vmax.f32 %v2281_v43, 1e-24  ;;  %v2219_v6 = vadd.f32 %v2187_v42, %v2155_v61  ;;  %v2251_v26 = vmul.f32 %v4930_v10, %v4930_v10  ;;  %v4959_v21 = vunpack.c.l.bf16 %v3260_v48  ;;  %v3247_v10 = vld [vmem:[%s4763_s17 + $0x238] sm:$0xff] }
 0x181   : > { %6706 = vst [vmem:[#allocation41_spill] sm:$0xff] %v4943_v41  ;;  %v2156_v39 = vmul.f32 %v4941_v62, %v4941_v62  ;;  %v2188_v51 = vmul.f32 %v4943_v41, %v4943_v41  ;;  %v4968_v43 = vunpack.c.h.bf16 %v3228_v32  ;;  %v4970_v12 = vunpack.c.h.bf16 %v3244_v17  ;;  %v3246_v62 = vld [vmem:[%s4763_s17 + $0x230] sm:$0xff] }
 0x182   : > { %v4947_v63 = vpop.eup %3463  ;;  %6708 = vst [vmem:[#allocation43_spill] sm:$0xff] %v4959_v21  ;;  %3475 = vrsqrt.f32 %v2312_v53  ;;  %v2314_v55 = vmax.f32 %v2282_v8, 1e-24  ;;  %v4975_v40 = vunpack.c.l.bf16 %v3229_v46  ;;  %v4981_v17 = vunpack.c.l.bf16 %v3245_v30  ;;  %v3230_v8 = vld [vmem:[%s4763_s17 + $0x1b0] sm:$0xff] }
 0x183   : > { %6707 = vst [vmem:[#allocation42_spill] sm:$0xff] %v4947_v63  ;;  %6710 = vst [vmem:[#allocation45_spill] sm:$0xff] %v4968_v43  ;;  %3477 = vrsqrt.f32 %v2313_v20  ;;  %v4985_v41 = vadd.f32 %v2251_v26, %v2219_v6  ;;  %v4987_v42 = vunpack.c.h.bf16 %v3229_v46  ;;  %v4989_v53 = vunpack.c.h.bf16 %v3245_v30  ;;  %v5002_v46 = vld [vmem:[%s4763_s17 + $0x10] sm:$0xff] }
 0x184   : > { %v4962_v59 = vpop.eup %3465  ;;  %6711 = vst [vmem:[#allocation46_spill] sm:$0xff] %v4970_v12  ;;  %6712 = vst [vmem:[#allocation47_spill] sm:$0xff] %v4975_v40  ;;  %v2220_v15 = vadd.f32 %v2188_v51, %v2156_v39  ;;  %v2252_v20 = vmul.f32 %v4959_v21, %v4959_v21  ;;  %v2157_v32 = vmul.f32 %v4968_v43, %v4968_v43  ;;  %3479 = vrsqrt.f32 %v2314_v55 }
 0x185   : > { %6709 = vst [vmem:[#allocation44_spill] sm:$0xff] %v4962_v59  ;;  %v4972_v61 = vpop.eup %3467  ;;  %6713 = vst [vmem:[#allocation48_spill] sm:$0xff] %v4981_v17  ;;  %v2189_v6 = vmul.f32 %v4970_v12, %v4970_v12  ;;  %v5004_v26 = vunpack.c.h.bf16 %v3260_v48  ;;  %v5006_v30 = vunpack.c.l.bf16 %v3261_v4  ;;  %v2158_v39 = vmul.f32 %v4975_v40, %v4975_v40  ;;  %v3231_v12 = vld [vmem:[%s4763_s17 + $0x1b8] sm:$0xff] }
 0x186   : > { %v4977_v63 = vpop.eup %3469  ;;  %6714 = vst [vmem:[#allocation49_spill] sm:$0xff] %v4987_v42  ;;  %6715 = vst [vmem:[#allocation50_spill] sm:$0xff] %v4989_v53  ;;  %v2190_v51 = vmul.f32 %v4981_v17, %v4981_v17  ;;  %v5014_v43 = vunpack.c.l.bf16 %v3230_v8  ;;  %v5016_v21 = vunpack.c.l.bf16 %v3246_v62  ;;  %v2159_v48 = vmul.f32 %v4987_v42, %v4987_v42 }
 0x187   : > { %v4993_v59 = vpop.eup %3471  ;;  %6716 = vst [vmem:[#allocation51_spill] sm:$0xff] %v5004_v26  ;;  %6717 = vst [vmem:[#allocation52_spill] sm:$0xff] %v5006_v30  ;;  %v2191_v40 = vmul.f32 %v4989_v53, %v4989_v53  ;;  %v5027_v17 = vunpack.c.h.bf16 %v3230_v8  ;;  %v5029_v4 = vunpack.c.h.bf16 %v3246_v62  ;;  %v2315_v3 = vmax.f32 %v4985_v41, 1e-24 }
 0x188   : > { %6719 = vst [vmem:[#allocation54_spill] sm:$0xff] %v5014_v43  ;;  %6720 = vst [vmem:[#allocation55_spill] sm:$0xff] %v5016_v21  ;;  %v2284_v44 = vadd.f32 %v2252_v20, %v2220_v15  ;;  %v2221_v50 = vadd.f32 %v2189_v6, %v2157_v32  ;;  %v2253_v42 = vmul.f32 %v5004_v26, %v5004_v26  ;;  %v5040_v16 = vunpack.c.l.bf16 %v3231_v12  ;;  %v3263_v32 = vld [vmem:[%s4763_s17 + $0x2b8] sm:$0xff]  ;;  %v5054_v6 = vld [vmem:[%s4763_s17 + $0x110] sm:$0xff] }
 0x189   : > { %v5020_v55 = vpop.eup %3473  ;;  %6721 = vst [vmem:[#allocation56_spill] sm:$0xff] %v5027_v17  ;;  %6722 = vst [vmem:[#allocation57_spill] sm:$0xff] %v5029_v4  ;;  %v2254_v53 = vmul.f32 %v5006_v30, %v5006_v30  ;;  %v5042_v8 = vunpack.c.l.bf16 %v3247_v10  ;;  %v2222_v62 = vadd.f32 %v2190_v51, %v2158_v39  ;;  %v5044_v29 = vunpack.c.l.bf16 %v3262_v9 }
 0x18a   : > { %6723 = vst [vmem:[#allocation58_spill] sm:$0xff] %v5040_v16  ;;  %v2160_v41 = vmul.f32 %v5014_v43, %v5014_v43  ;;  %v2192_v15 = vmul.f32 %v5016_v21, %v5016_v21  ;;  %6727 = vst [vmem:[#allocation62_spill] sm:$0xff] %v5054_v6  ;;  %v2223_v45 = vadd.f32 %v2191_v40, %v2159_v48  ;;  %v5065_v21 = vunpack.c.h.bf16 %v3262_v9 }
 0x18b   : > { %6724 = vst [vmem:[#allocation59_spill] sm:$0xff] %v5042_v8  ;;  %6725 = vst [vmem:[#allocation60_spill] sm:$0xff] %v5044_v29  ;;  %v2255_v30 = vmul.f32 %v5012_v28, %v5012_v28  ;;  %v2161_v39 = vmul.f32 %v5027_v17, %v5027_v17  ;;  %v2193_v51 = vmul.f32 %v5029_v4, %v5029_v4  ;;  %v5067_v1 = vunpack.c.h.bf16 %v3231_v12 }
 0x18c   : > { %v5051_v20 = vpop.eup %3475  ;;  %6729 = vst [vmem:[#allocation64_spill] sm:$0xff] %v5065_v21  ;;  %v5069_v40 = vunpack.c.h.bf16 %v3247_v10  ;;  %v2285_v48 = vadd.f32 %v2253_v42, %v2221_v50  ;;  %v5071_v28 = vunpack.c.l.bf16 %v3263_v32  ;;  %v2162_v17 = vmul.f32 %v5040_v16, %v5040_v16  ;;  %v5087_v16 = vld [vmem:[%s4763_s17 + $0x98] sm:$0xff] }
 0x18d   : > { %6726 = vst [vmem:[#allocation61_spill] sm:$0xff] %v5051_v20  ;;  %v5062_v26 = vpop.eup %3477  ;;  %6730 = vst [vmem:[#allocation65_spill] sm:$0xff] %v5067_v1  ;;  %v2194_v4 = vmul.f32 %v5042_v8, %v5042_v8  ;;  %v2286_v9 = vadd.f32 %v2254_v53, %v2222_v62  ;;  %v2224_v31 = vadd.f32 %v2192_v15, %v2160_v41  ;;  %v2316_v50 = vmax.f32 %v2284_v44, 1e-24  ;;  %v5084_v20 = vld [vmem:[%s4763_s17 + $0x18] sm:$0xff]  ;;  %v5108_v8 = vld [vmem:[%s4763_s17 + $0x20] sm:$0xff] }
 0x18e   : > { %6728 = vst [vmem:[#allocation63_spill] sm:$0xff] %v5062_v26  ;;  %6731 = vst [vmem:[#allocation66_spill] sm:$0xff] %v5069_v40  ;;  %v2256_v12 = vmul.f32 %v5044_v29, %v5044_v29  ;;  %v5080_v35 = vpop.eup %3479  ;;  %v2287_v42 = vadd.f32 %v2255_v30, %v2223_v45  ;;  %v2225_v26 = vadd.f32 %v2193_v51, %v2161_v39  ;;  %v5094_v62 = vunpack.c.h.bf16 %v3263_v32  ;;  %v5130_v45 = vld [vmem:[%s4763_s17 + $0xa8] sm:$0xff] }
 0x18f   : > { %6732 = vst [vmem:[#allocation67_spill] sm:$0xff] %v5071_v28  ;;  %6733 = vst [vmem:[#allocation68_spill] sm:$0xff] %v5080_v35  ;;  %v2257_v53 = vmul.f32 %v5065_v21, %v5065_v21  ;;  %v2163_v41 = vmul.f32 %v5067_v1, %v5067_v1  ;;  %v2195_v44 = vmul.f32 %v5069_v40, %v5069_v40  ;;  %v2317_v30 = vmax.f32 %v2285_v48, 1e-24  ;;  %v5133_v40 = vld [vmem:[%s4763_s17 + $0x128] sm:$0xff] }
 0x190   : > { %6734 = vst [vmem:[#allocation69_spill] sm:$0xff] %v5084_v20  ;;  %6735 = vst [vmem:[#allocation70_spill] sm:$0xff] %v5087_v16  ;;  %v2226_v15 = vadd.f32 %v2194_v4, %v2162_v17  ;;  %v2258_v39 = vmul.f32 %v5071_v28, %v5071_v28  ;;  %3481 = vrsqrt.f32 %v2315_v3  ;;  %v2318_v32 = vmax.f32 %v2286_v9, 1e-24  ;;  %v5111_v17 = vld [vmem:[%s4763_s17 + $0xa0] sm:$0xff]  ;;  %v3249_v28 = vld [vmem:[%s4763_s17 + $0x248] sm:$0xff] }
 0x191   : > { %6737 = vst [vmem:[#allocation72_spill] sm:$0xff] %v5094_v62  ;;  %v2288_v10 = vadd.f32 %v2256_v12, %v2224_v31  ;;  %6738 = vst [vmem:[#allocation73_spill] sm:$0xff] %v5108_v8  ;;  %3483 = vrsqrt.f32 %v2316_v50  ;;  %v5114_v4 = vld [vmem:[%s4763_s17 + $0x120] sm:$0xff]  ;;  %v2319_v48 = vmax.f32 %v2287_v42, 1e-24  ;;  %v2289_v51 = vadd.f32 %v2257_v53, %v2225_v26  ;;  %v5125_v26 = vld [vmem:[%s4763_s17 + $0x28] sm:$0xff] }
 0x192   : > { %6739 = vst [vmem:[#allocation74_spill] sm:$0xff] %v5111_v17  ;;  %6740 = vst [vmem:[#allocation75_spill] sm:$0xff] %v5114_v4  ;;  %v2227_v3 = vadd.f32 %v2195_v44, %v2163_v41  ;;  %v2259_v31 = vmul.f32 %v5094_v62, %v5094_v62  ;;  %v3232_v9 = vld [vmem:[%s4763_s17 + $0x1c0] sm:$0xff]  ;;  %3485 = vrsqrt.f32 %v2317_v30  ;;  %v2290_v43 = vadd.f32 %v2258_v39, %v2226_v15  ;;  %v3233_v62 = vld [vmem:[%s4763_s17 + $0x1c8] sm:$0xff] }
 0x193   : > { %v3248_v12 = vld [vmem:[%s4763_s17 + $0x240] sm:$0xff]  ;;  %6741 = vst [vmem:[#allocation76_spill] sm:$0xff] %v5125_v26  ;;  %3487 = vrsqrt.f32 %v2318_v32  ;;  %v2320_v53 = vmax.f32 %v2288_v10, 1e-24  ;;  %6742 = vst [vmem:[#allocation77_spill] sm:$0xff] %v5130_v45  ;;  %v5135_v30 = vunpack.c.l.bf16 %v3232_v9  ;;  %v5151_v32 = vld [vmem:[%s4763_s17 + $0x30] sm:$0xff]  ;;  %v5169_v50 = vunpack.c.l.bf16 %v3233_v62 }
 0x194   : > { %6743 = vst [vmem:[#allocation78_spill] sm:$0xff] %v5133_v40  ;;  %v5137_v15 = vunpack.c.l.bf16 %v3248_v12  ;;  %v3264_v39 = vld [vmem:[%s4763_s17 + $0x2c0] sm:$0xff]  ;;  %3489 = vrsqrt.f32 %v2319_v48  ;;  %v2321_v10 = vmax.f32 %v2289_v51, 1e-24  ;;  %v2291_v41 = vadd.f32 %v2259_v31, %v2227_v3  ;;  %6747 = vst [vmem:[#allocation82_spill] sm:$0xff] %v5151_v32  ;;  %v5154_v51 = vld [vmem:[%s4763_s17 + $0xb0] sm:$0xff] }
 0x195   : > { %6744 = vst [vmem:[#allocation79_spill] sm:$0xff] %v5135_v30  ;;  %v2322_v1 = vmax.f32 %v2290_v43, 1e-24  ;;  %3491 = vrsqrt.f32 %v2320_v53  ;;  %v5148_v13 = vunpack.c.l.bf16 %v3264_v39  ;;  %6748 = vst [vmem:[#allocation83_spill] sm:$0xff] %v5154_v51  ;;  %v5157_v48 = vld [vmem:[%s4763_s17 + $0x130] sm:$0xff]  ;;  %v2164_v3 = vmul.f32 %v5135_v30, %v5135_v30  ;;  %v3235_v40 = vld [vmem:[%s4763_s17 + $0x1d8] sm:$0xff] }
 0x196   : > { %6745 = vst [vmem:[#allocation80_spill] sm:$0xff] %v5137_v15  ;;  %6749 = vst [vmem:[#allocation84_spill] sm:$0xff] %v5157_v48  ;;  %v2196_v43 = vmul.f32 %v5137_v15, %v5137_v15  ;;  %v5163_v31 = vunpack.c.h.bf16 %v3232_v9  ;;  %v5165_v21 = vunpack.c.h.bf16 %v3248_v12  ;;  %3493 = vrsqrt.f32 %v2321_v10  ;;  %v3265_v12 = vld [vmem:[%s4763_s17 + $0x2c8] sm:$0xff]  ;;  %v3234_v9 = vld [vmem:[%s4763_s17 + $0x1d0] sm:$0xff] }
 0x197   : > { %6746 = vst [vmem:[#allocation81_spill] sm:$0xff] %v5148_v13  ;;  %v2323_v29 = vmax.f32 %v2291_v41, 1e-24  ;;  %6753 = vst [vmem:[#allocation88_spill] sm:$0xff] %v5169_v50  ;;  %v5171_v44 = vunpack.c.l.bf16 %v3249_v28  ;;  %3495 = vrsqrt.f32 %v2322_v1  ;;  %v2260_v17 = vmul.f32 %v5148_v13, %v5148_v13  ;;  %v3250_v41 = vld [vmem:[%s4763_s17 + $0x250] sm:$0xff] }
 0x198   : > { %6750 = vst [vmem:[#allocation85_spill] sm:$0xff] %v5163_v31  ;;  %6751 = vst [vmem:[#allocation86_spill] sm:$0xff] %v5165_v21  ;;  %v5186_v30 = vunpack.c.h.bf16 %v3264_v39  ;;  %v2165_v1 = vmul.f32 %v5163_v31, %v5163_v31  ;;  %v2197_v4 = vmul.f32 %v5165_v21, %v5165_v21  ;;  %v5196_v15 = vunpack.c.l.bf16 %v3265_v12 }
 0x199   : > { %6754 = vst [vmem:[#allocation89_spill] sm:$0xff] %v5171_v44  ;;  %3497 = vrsqrt.f32 %v2323_v29  ;;  %v2198_v39 = vmul.f32 %v5171_v44, %v5171_v44  ;;  %v5204_v21 = vunpack.c.h.bf16 %v3233_v62  ;;  %v5206_v13 = vunpack.c.h.bf16 %v3249_v28  ;;  %v3251_v29 = vld [vmem:[%s4763_s17 + $0x258] sm:$0xff]  ;;  %v3266_v44 = vld [vmem:[%s4763_s17 + $0x2d0] sm:$0xff] }
 0x19a   : > { %v5167_v53 = vpop.eup %3481  ;;  %6757 = vst [vmem:[#allocation92_spill] sm:$0xff] %v5186_v30  ;;  %6759 = vst [vmem:[#allocation94_spill] sm:$0xff] %v5196_v15  ;;  %v5212_v26 = vunpack.c.l.bf16 %v3234_v9  ;;  %v2229_v51 = vadd.f32 %v2197_v4, %v2165_v1  ;;  %v2261_v28 = vmul.f32 %v5186_v30, %v5186_v30  ;;  %v5234_v16 = vunpack.c.l.bf16 %v3235_v40  ;;  %v3267_v62 = vld [vmem:[%s4763_s17 + $0x2d8] sm:$0xff] }
 0x19b   : > { %6752 = vst [vmem:[#allocation87_spill] sm:$0xff] %v5167_v53  ;;  %v5173_v42 = vpop.eup %3483  ;;  %6760 = vst [vmem:[#allocation95_spill] sm:$0xff] %v5204_v21  ;;  %v2167_v4 = vmul.f32 %v5204_v21, %v5204_v21  ;;  %v5245_v1 = vunpack.c.l.bf16 %v3266_v44  ;;  %v5271_v20 = vunpack.c.h.bf16 %v3251_v29 }
 0x19c   : > { %6755 = vst [vmem:[#allocation90_spill] sm:$0xff] %v5173_v42  ;;  %v5184_v8 = vpop.eup %3485  ;;  %v2228_v42 = vadd.f32 %v2196_v43, %v2164_v3  ;;  %v2166_v3 = vmul.f32 %v5169_v50, %v5169_v50  ;;  %6761 = vst [vmem:[#allocation96_spill] sm:$0xff] %v5206_v13  ;;  %v5214_v50 = vunpack.c.l.bf16 %v3250_v41  ;;  %v5219_v43 = vunpack.c.h.bf16 %v3250_v41 }
 0x19d   : > { %6756 = vst [vmem:[#allocation91_spill] sm:$0xff] %v5184_v8  ;;  %v5194_v10 = vpop.eup %3487  ;;  %6763 = vst [vmem:[#allocation98_spill] sm:$0xff] %v5212_v26  ;;  %v5230_v8 = vld [vmem:[%s4763_s17 + $0xb8] sm:$0xff]  ;;  %v5236_v41 = vunpack.c.l.bf16 %v3251_v29 }
 0x19e   : > { %6758 = vst [vmem:[#allocation93_spill] sm:$0xff] %v5194_v10  ;;  %v5210_v45 = vpop.eup %3489  ;;  %6764 = vst [vmem:[#allocation99_spill] sm:$0xff] %v5214_v50  ;;  %v5217_v10 = vunpack.c.h.bf16 %v3234_v9  ;;  %v2292_v31 = vadd.f32 %v2260_v17, %v2228_v42  ;;  %v2230_v53 = vadd.f32 %v2198_v39, %v2166_v3  ;;  %v2262_v9 = vmul.f32 %v5196_v15, %v5196_v15 }
 0x19f   : > { %6762 = vst [vmem:[#allocation97_spill] sm:$0xff] %v5210_v45  ;;  %6766 = vst [vmem:[#allocation101_spill] sm:$0xff] %v5219_v43  ;;  %v5224_v32 = vpop.eup %3491  ;;  %v5227_v45 = vld [vmem:[%s4763_s17 + $0x38] sm:$0xff]  ;;  %v5239_v17 = vunpack.c.h.bf16 %v3265_v12  ;;  %v2199_v42 = vmul.f32 %v5206_v13, %v5206_v13  ;;  %v2168_v39 = vmul.f32 %v5212_v26, %v5212_v26  ;;  %v2200_v15 = vmul.f32 %v5214_v50, %v5214_v50 }
 0x1a0   : > { %6765 = vst [vmem:[#allocation100_spill] sm:$0xff] %v5217_v10  ;;  %6767 = vst [vmem:[#allocation102_spill] sm:$0xff] %v5224_v32  ;;  %v5247_v3 = vpop.eup %3493  ;;  %v2169_v12 = vmul.f32 %v5217_v10, %v5217_v10  ;;  %v2201_v21 = vmul.f32 %v5219_v43, %v5219_v43  ;;  %v5261_v32 = vunpack.c.h.bf16 %v3266_v44  ;;  %v2170_v26 = vmul.f32 %v5234_v16, %v5234_v16  ;;  %v5274_v43 = vld [vmem:[%s4763_s17 + $0x138] sm:$0xff] }
 0x1a1   : > { %6768 = vst [vmem:[#allocation103_spill] sm:$0xff] %v5227_v45  ;;  %6769 = vst [vmem:[#allocation104_spill] sm:$0xff] %v5230_v8  ;;  %v5257_v30 = vpop.eup %3495  ;;  %v2202_v50 = vmul.f32 %v5236_v41, %v5236_v41  ;;  %v5269_v10 = vunpack.c.h.bf16 %v3235_v40  ;;  %v2293_v13 = vadd.f32 %v2261_v28, %v2229_v51  ;;  %v2231_v35 = vadd.f32 %v2199_v42, %v2167_v4  ;;  %v5311_v42 = vld [vmem:[%s4763_s17 + $0x140] sm:$0xff] }
 0x1a2   : > { %6770 = vst [vmem:[#allocation105_spill] sm:$0xff] %v5234_v16  ;;  %6771 = vst [vmem:[#allocation106_spill] sm:$0xff] %v5236_v41  ;;  %v2263_v44 = vmul.f32 %v5239_v17, %v5239_v17  ;;  %v2294_v6 = vadd.f32 %v2262_v9, %v2230_v53  ;;  %v2232_v16 = vadd.f32 %v2200_v15, %v2168_v39  ;;  %v5284_v51 = vunpack.c.h.bf16 %v3267_v62  ;;  %v3252_v41 = vld [vmem:[%s4763_s17 + $0x260] sm:$0xff] }
 0x1a3   : > { %6772 = vst [vmem:[#allocation107_spill] sm:$0xff] %v5239_v17  ;;  %6773 = vst [vmem:[#allocation108_spill] sm:$0xff] %v5245_v1  ;;  %v5278_v48 = vpop.eup %3497  ;;  %v2264_v40 = vmul.f32 %v5245_v1, %v5245_v1  ;;  %v2233_v29 = vadd.f32 %v2201_v21, %v2169_v12  ;;  %v2171_v28 = vmul.f32 %v5269_v10, %v5269_v10  ;;  %v2325_v39 = vmax.f32 %v2293_v13, 1e-24 }
 0x1a4   : > { %6774 = vst [vmem:[#allocation109_spill] sm:$0xff] %v5247_v3  ;;  %6775 = vst [vmem:[#allocation110_spill] sm:$0xff] %v5257_v30  ;;  %v5263_v3 = vunpack.c.l.bf16 %v3267_v62  ;;  %v2324_v30 = vmax.f32 %v2292_v31, 1e-24  ;;  %v2265_v31 = vmul.f32 %v5261_v32, %v5261_v32  ;;  %v2203_v53 = vmul.f32 %v5271_v20, %v5271_v20 }
 0x1a5   : > { %6776 = vst [vmem:[#allocation111_spill] sm:$0xff] %v5261_v32  ;;  %6778 = vst [vmem:[#allocation113_spill] sm:$0xff] %v5269_v10  ;;  %v2234_v4 = vadd.f32 %v2202_v50, %v2170_v26  ;;  %v2295_v12 = vadd.f32 %v2263_v44, %v2231_v35  ;;  %v3236_v10 = vld [vmem:[%s4763_s17 + $0x1e0] sm:$0xff]  ;;  %v2326_v15 = vmax.f32 %v2294_v6, 1e-24  ;;  %v2296_v9 = vadd.f32 %v2264_v40, %v2232_v16 }
 0x1a6   : > { %6777 = vst [vmem:[#allocation112_spill] sm:$0xff] %v5263_v3  ;;  %6779 = vst [vmem:[#allocation114_spill] sm:$0xff] %v5271_v20  ;;  %v2266_v21 = vmul.f32 %v5263_v3, %v5263_v3  ;;  %v5299_v32 = vld [vmem:[%s4763_s17 + $0x40] sm:$0xff]  ;;  %v5304_v1 = vunpack.c.l.bf16 %v3236_v10  ;;  %v5306_v50 = vunpack.c.l.bf16 %v3252_v41  ;;  %3499 = vrsqrt.f32 %v2324_v30 }
 0x1a7   : > { %6780 = vst [vmem:[#allocation115_spill] sm:$0xff] %v5274_v43  ;;  %6781 = vst [vmem:[#allocation116_spill] sm:$0xff] %v5278_v48  ;;  %v5302_v20 = vld [vmem:[%s4763_s17 + $0xc0] sm:$0xff]  ;;  %v2297_v13 = vadd.f32 %v2265_v31, %v2233_v29  ;;  %v2235_v62 = vadd.f32 %v2203_v53, %v2171_v28  ;;  %v2267_v35 = vmul.f32 %v5284_v51, %v5284_v51  ;;  %3501 = vrsqrt.f32 %v2325_v39 }
 0x1a8   : > { %6782 = vst [vmem:[#allocation117_spill] sm:$0xff] %v5284_v51  ;;  %6783 = vst [vmem:[#allocation118_spill] sm:$0xff] %v5299_v32  ;;  %v3268_v44 = vld [vmem:[%s4763_s17 + $0x2e0] sm:$0xff]  ;;  %v2298_v16 = vadd.f32 %v2266_v21, %v2234_v4  ;;  %v2172_v40 = vmul.f32 %v5304_v1, %v5304_v1  ;;  %v2204_v17 = vmul.f32 %v5306_v50, %v5306_v50  ;;  %v2327_v28 = vmax.f32 %v2295_v12, 1e-24  ;;  %v5333_v51 = vld [vmem:[%s4763_s17 + $0x48] sm:$0xff] }
 0x1a9   : > { %6784 = vst [vmem:[#allocation119_spill] sm:$0xff] %v5302_v20  ;;  %6785 = vst [vmem:[#allocation120_spill] sm:$0xff] %v5304_v1  ;;  %v5318_v6 = vunpack.c.l.bf16 %v3268_v44  ;;  %v5336_v1 = vld [vmem:[%s4763_s17 + $0xc8] sm:$0xff]  ;;  %3503 = vrsqrt.f32 %v2326_v15  ;;  %v2329_v29 = vmax.f32 %v2297_v13, 1e-24  ;;  %v2299_v31 = vadd.f32 %v2267_v35, %v2235_v62  ;;  %v5355_v62 = vld [vmem:[%s4763_s17 + $0xd0] sm:$0xff] }
 0x1aa   : > { %6786 = vst [vmem:[#allocation121_spill] sm:$0xff] %v5306_v50  ;;  %6787 = vst [vmem:[#allocation122_spill] sm:$0xff] %v5311_v42  ;;  %v2328_v50 = vmax.f32 %v2296_v9, 1e-24  ;;  %v2236_v48 = vadd.f32 %v2204_v17, %v2172_v40  ;;  %v5343_v21 = vld [vmem:[%s4763_s17 + $0x148] sm:$0xff]  ;;  %v5345_v43 = vunpack.c.h.bf16 %v3236_v10  ;;  %3505 = vrsqrt.f32 %v2327_v28  ;;  %v5352_v17 = vld [vmem:[%s4763_s17 + $0x50] sm:$0xff] }
 0x1ab   : > { %6788 = vst [vmem:[#allocation123_spill] sm:$0xff] %v5318_v6  ;;  %6789 = vst [vmem:[#allocation124_spill] sm:$0xff] %v5333_v51  ;;  %v2268_v39 = vmul.f32 %v5318_v6, %v5318_v6  ;;  %v2330_v32 = vmax.f32 %v2298_v16, 1e-24  ;;  %v5349_v13 = vunpack.c.h.bf16 %v3252_v41  ;;  %v5358_v35 = vld [vmem:[%s4763_s17 + $0x150] sm:$0xff]  ;;  %v5360_v4 = vunpack.c.h.bf16 %v3268_v44  ;;  %v5383_v6 = vld [vmem:[%s4763_s17 + $0x58] sm:$0xff] }
 0x1ac   : > { %6790 = vst [vmem:[#allocation125_spill] sm:$0xff] %v5336_v1  ;;  %6791 = vst [vmem:[#allocation126_spill] sm:$0xff] %v5343_v21  ;;  %3507 = vrsqrt.f32 %v2328_v50  ;;  %v2173_v10 = vmul.f32 %v5345_v43, %v5345_v43  ;;  %v2331_v41 = vmax.f32 %v2299_v31, 1e-24  ;;  %v3253_v42 = vld [vmem:[%s4763_s17 + $0x268] sm:$0xff] }
 0x1ad   : > { %6792 = vst [vmem:[#allocation127_spill] sm:$0xff] %v5345_v43  ;;  %6793 = vst [vmem:[#allocation128_spill] sm:$0xff] %v5349_v13  ;;  %v2300_v40 = vadd.f32 %v2268_v39, %v2236_v48  ;;  %3509 = vrsqrt.f32 %v2329_v29  ;;  %v2205_v28 = vmul.f32 %v5349_v13, %v5349_v13  ;;  %v5386_v48 = vld [vmem:[%s4763_s17 + $0xd8] sm:$0xff]  ;;  %v2269_v31 = vmul.f32 %v5360_v4, %v5360_v4 }
 0x1ae   : > { %6794 = vst [vmem:[#allocation129_spill] sm:$0xff] %v5352_v17  ;;  %6795 = vst [vmem:[#allocation130_spill] sm:$0xff] %v5355_v62  ;;  %3511 = vrsqrt.f32 %v2330_v32  ;;  %v5407_v17 = vld [vmem:[%s4763_s17 + $0x158] sm:$0xff] }
 0x1af   : > { %6796 = vst [vmem:[#allocation131_spill] sm:$0xff] %v5358_v35  ;;  %6797 = vst [vmem:[#allocation132_spill] sm:$0xff] %v5360_v4  ;;  %v2332_v21 = vmax.f32 %v2300_v40, 1e-24  ;;  %v2237_v1 = vadd.f32 %v2205_v28, %v2173_v10  ;;  %3513 = vrsqrt.f32 %v2331_v41  ;;  %v5411_v41 = vunpack.c.l.bf16 %v3253_v42 }
 0x1b0   : > { %v5374_v39 = vpop.eup %3499  ;;  %6799 = vst [vmem:[#allocation134_spill] sm:$0xff] %v5383_v6  ;;  %6800 = vst [vmem:[#allocation135_spill] sm:$0xff] %v5386_v48 }
 0x1b1   : > { %6798 = vst [vmem:[#allocation133_spill] sm:$0xff] %v5374_v39  ;;  %v5393_v29 = vpop.eup %3501  ;;  %6803 = vst [vmem:[#allocation138_spill] sm:$0xff] %v5407_v17  ;;  %3515 = vrsqrt.f32 %v2332_v21  ;;  %v2206_v21 = vmul.f32 %v5411_v41, %v5411_v41  ;;  %v5453_v39 = vunpack.c.h.bf16 %v3253_v42 }
 0x1b2   : > { %6801 = vst [vmem:[#allocation136_spill] sm:$0xff] %v5393_v29  ;;  %v3237_v29 = vld [vmem:[%s4763_s17 + $0x1e8] sm:$0xff]  ;;  %6805 = vst [vmem:[#allocation140_spill] sm:$0xff] %v5411_v41  ;;  %v5441_v41 = vld [vmem:[%s4763_s17 + $0x60] sm:$0xff] }
 0x1b3   : > { %6811 = vst [vmem:[#allocation146_spill] sm:$0xff] %v5441_v41  ;;  %6814 = vst [vmem:[#allocation149_spill] sm:$0xff] %v5453_v39 }
 0x1f1   : > { %v5308_v26 = vpop.f32.mrb[0].mxu0 }
 0x1f2   : > { %v5316_v3 = vpop.f32.mrb[1].mxu0 }
 0x1f3   : > { %v5324_v30 = vpop.f32.mrb[2].mxu0 }
 0x1f4   : > { %v5328_v53 = vpop.f32.mrb[3].mxu0 }
 0x1f9   : > { %v5364_v16 = vpop.f32.mrb[4].mxu0 }
 0x1fa   : > { %v5369_v15 = vpop.f32.mrb[5].mxu0  ;;  %v1407_v12 = vpop.f32.mrb[0].mxu1 }
 0x1fb   : > { %v5376_v9 = vpop.f32.mrb[6].mxu0  ;;  %v1521_v44 = vadd.f32 %v5308_v26, %v1407_v12  ;;  %v1409_v32 = vpop.f32.mrb[1].mxu1  ;;  %v5409_v26 = vunpack.c.l.bf16 %v3237_v29 }
 0x1fc   : > { %v5389_v50 = vpop.f32.mrb[7].mxu0  ;;  %v1523_v43 = vadd.f32 %v5316_v3, %v1409_v32  ;;  %v1411_v13 = vpop.f32.mrb[2].mxu1 }
 0x1fd   : > { %v5398_v12 = vpop.eup %3503  ;;  %v1727_v51 = vsub.f32 0.0, %v1521_v44  ;;  %v1525_v40 = vadd.f32 %v5324_v30, %v1411_v13  ;;  %v1413_v10 = vpop.f32.mrb[3].mxu1  ;;  %6804 = vst [vmem:[#allocation139_spill] sm:$0xff] %v5409_v26  ;;  %v2301_v30 = vadd.f32 %v2269_v31, %v2237_v1  ;;  %v3269_v13 = vld [vmem:[%s4763_s17 + $0x2e8] sm:$0xff] }
 0x1fe   : > { %6802 = vst [vmem:[#allocation137_spill] sm:$0xff] %v5398_v12  ;;  %v1728_v3 = vsub.f32 0.0, %v1523_v43  ;;  %v1527_v32 = vadd.f32 %v5328_v53, %v1413_v10  ;;  %v5414_v62 = vpop.eup %3505  ;;  %v5418_v43 = vunpack.c.l.bf16 %v3269_v13  ;;  %v2174_v53 = vmul.f32 %v5409_v26, %v5409_v26 }
 0x1ff   : > { %v1759_v44 = vmul.f32 1.442695, %v1727_v51  ;;  %v1729_v35 = vsub.f32 0.0, %v1525_v40  ;;  %6806 = vst [vmem:[#allocation141_spill] sm:$0xff] %v5414_v62  ;;  %v5422_v10 = vpop.eup %3507 }
 0x200   : > { %v1761_v28 = vmul.f32 1.442695, %v1728_v3  ;;  %v1730_v4 = vsub.f32 0.0, %v1527_v32  ;;  %6807 = vst [vmem:[#allocation142_spill] sm:$0xff] %v5418_v43  ;;  %6808 = vst [vmem:[#allocation143_spill] sm:$0xff] %v5422_v10  ;;  %v5429_v31 = vpop.eup %3509 }
 0x201   : > { %v5416_v12 = vpop.f32.mrb[8].mxu0  ;;  %3517 = vpow2.f32 %v1759_v44  ;;  %v1763_v20 = vmul.f32 1.442695, %v1729_v35  ;;  %6809 = vst [vmem:[#allocation144_spill] sm:$0xff] %v5429_v31  ;;  %v5435_v44 = vpop.eup %3511  ;;  %v5444_v31 = vld [vmem:[%s4763_s17 + $0xe0] sm:$0xff]  ;;  %v2270_v35 = vmul.f32 %v5418_v43, %v5418_v43 }
 0x202   : > { %v5424_v51 = vpop.f32.mrb[9].mxu0  ;;  %3519 = vpow2.f32 %v1761_v28  ;;  %v1765_v40 = vmul.f32 1.442695, %v1730_v4  ;;  %v1417_v3 = vpop.f32.mrb[4].mxu1  ;;  %6810 = vst [vmem:[#allocation145_spill] sm:$0xff] %v5435_v44  ;;  %6812 = vst [vmem:[#allocation147_spill] sm:$0xff] %v5444_v31  ;;  %v2238_v28 = vadd.f32 %v2206_v21, %v2174_v53 }
 0x203   : > { %v5431_v32 = vpop.f32.mrb[10].mxu0  ;;  %3521 = vpow2.f32 %v1763_v20  ;;  %v1531_v10 = vadd.f32 %v5364_v16, %v1417_v3  ;;  %v1419_v1 = vpop.f32.mrb[5].mxu1  ;;  %v2333_v4 = vmax.f32 %v2301_v30, 1e-24  ;;  %v5449_v20 = vunpack.c.h.bf16 %v3237_v29 }
 0x204   : > { %v5438_v62 = vpop.f32.mrb[11].mxu0  ;;  %3523 = vpow2.f32 %v1765_v40  ;;  %v1533_v26 = vadd.f32 %v5369_v15, %v1419_v1  ;;  %v1421_v6 = vpop.f32.mrb[6].mxu1  ;;  %v5461_v40 = vld [vmem:[%s4763_s17 + $0x160] sm:$0xff] }
 0x205   : > { %6813 = vst [vmem:[#allocation148_spill] sm:$0xff] %v5449_v20  ;;  %v1731_v16 = vsub.f32 0.0, %v1531_v10  ;;  %v1535_v3 = vadd.f32 %v5376_v9, %v1421_v6  ;;  %v1423_v48 = vpop.f32.mrb[7].mxu1  ;;  %v5455_v30 = vpop.eup %3513  ;;  %6816 = vst [vmem:[#allocation151_spill] sm:$0xff] %v5461_v40  ;;  %3525 = vrsqrt.f32 %v2333_v4  ;;  %v5463_v6 = vadd.f32 %v2270_v35, %v2238_v28 }
 0x206   : > { %6815 = vst [vmem:[#allocation150_spill] sm:$0xff] %v5455_v30  ;;  %v1732_v53 = vsub.f32 0.0, %v1533_v26  ;;  %v1537_v21 = vadd.f32 %v5389_v50, %v1423_v48  ;;  %v2175_v26 = vmul.f32 %v5449_v20, %v5449_v20  ;;  %v2207_v48 = vmul.f32 %v5453_v39, %v5453_v39  ;;  %v5471_v50 = vpop.eup %3515 }
 0x207   : > { %v1767_v29 = vmul.f32 1.442695, %v1731_v16  ;;  %v1733_v10 = vsub.f32 0.0, %v1535_v3  ;;  %6817 = vst [vmem:[#allocation152_spill] sm:$0xff] %v5463_v6  ;;  %6818 = vst [vmem:[#allocation153_spill] sm:$0xff] %v5471_v50  ;;  %v5476_v35 = vunpack.c.h.bf16 %v3269_v13  ;;  %v6820_v4 = vsub.f32 1.0, %v4709_v34 }
 0x208   : > { %v1769_v9 = vmul.f32 1.442695, %v1732_v53  ;;  %v1734_v44 = vsub.f32 0.0, %v1537_v21  ;;  %v5496_v53 = vadd.f32 %v2207_v48, %v2175_v26 }
 0x209   : > { %v5465_v42 = vpop.f32.mrb[12].mxu0  ;;  %3527 = vpow2.f32 %v1767_v29  ;;  %v1771_v1 = vmul.f32 1.442695, %v1733_v10  ;;  %6819 = vst [vmem:[#allocation154_spill] sm:$0xff] %v5476_v35 }
 0x20a   : > { %v5473_v15 = vpop.f32.mrb[13].mxu0  ;;  %3529 = vpow2.f32 %v1769_v9  ;;  %v1773_v28 = vmul.f32 1.442695, %v1734_v44  ;;  %v1427_v16 = vpop.f32.mrb[8].mxu1  ;;  %6821 = vst [vmem:[#allocation155_spill] sm:$0xff] %v5496_v53 }
 0x20b   : > { %v5478_v3 = vpop.f32.mrb[14].mxu0  ;;  %v3518_v39 = vpop.eup %3517  ;;  %3531 = vpow2.f32 %v1771_v1  ;;  %v5483_v29 = vadd.f32 %v5416_v12, %v1427_v16  ;;  %v6822_v16 = vsub.f32 1.0, %v4712_v54  ;;  %v6824_v54 = vunpack.c.l.bf16 %v4912_v27 }
 0x20c   : > { %v1429_v10 = vpop.f32.mrb[9].mxu1  ;;  %v5485_v20 = vpop.f32.mrb[15].mxu0  ;;  %v5491_v43 = vmul.f32 %v3518_v39, %v6820_v4  ;;  %3533 = vpow2.f32 %v1773_v28  ;;  %v5510_v39 = vmul.f32 %v5476_v35, %v5476_v35  ;;  %v6825_v4 = vunpack.c.l.bf16 %v4915_v37 }
 0x20d   : > { %v3520_v44 = vpop.eup %3519  ;;  %v5494_v21 = vadd.f32 %v5424_v51, %v1429_v10  ;;  %v1431_v1 = vpop.f32.mrb[10].mxu1 }
 0x20e   : > { %v3522_v12 = vpop.eup %3521  ;;  %v5500_v31 = vmul.f32 %v3520_v44, %v6822_v16  ;;  %v5504_v9 = vadd.f32 %v5431_v32, %v1431_v1  ;;  %v5506_v34 = vpop.f32.mrb[11].mxu1  ;;  %6823 = vst [vmem:[#allocation156_spill] sm:$0xff] %v5510_v39  ;;  %v2372_v26 = vmul.f32 %v4972_v61, %v5491_v43  ;;  %v2404_v48 = vmul.f32 %v6824_v54, %v5491_v43 }
 0x20f   : > { %v3524_v51 = vpop.eup %3523  ;;  %v2478_v28 = vmul.f32 %v6825_v4, %v5491_v43  ;;  %v6826_v32 = vunpack.c.l.bf16 %v4918_v19  ;;  %v6827_v1 = vunpack.c.h.bf16 %v4912_v27  ;;  %v6828_v61 = vunpack.c.h.bf16 %v4915_v37 }
 0x210   : > { %v2373_v44 = vmul.f32 %v4977_v63, %v5500_v31  ;;  %v6829_v54 = vunpack.c.h.bf16 %v4918_v19  ;;  %v2764_v4 = vmul.f32 %v2372_v26, %v4775_v5  ;;  %v2838_v40 = vmul.f32 %v2372_v26, %v4777_v33 }
 0x211   : > { %v2552_v10 = vmul.f32 %v6826_v32, %v5491_v43  ;;  %v2405_v16 = vmul.f32 %v6827_v1, %v5500_v31  ;;  %v2479_v13 = vmul.f32 %v6828_v61, %v5500_v31  ;;  %v2912_v32 = vmul.f32 %v2372_v26, %v4794_v57  ;;  %v5541_v27 = vpop.f32.mrb[16].mxu0  ;;  %v5543_v1 = vpop.eup %3525 }
 0x212   : > { %v2553_v35 = vmul.f32 %v6829_v54, %v5500_v31  ;;  %v6830_v63 = vsub.f32 1.0, %v4719_v38  ;;  %6831 = vst [vmem:[#allocation157_spill] sm:$0xff] %v5543_v1  ;;  %v2765_v37 = vmul.f32 %v2373_v44, %v4780_v49  ;;  %v2839_v61 = vmul.f32 %v2373_v44, %v4782_v24  ;;  %v5552_v33 = vpop.f32.mrb[17].mxu0 }
 0x213   : > { %v2913_v19 = vmul.f32 %v2373_v44, %v4809_v52  ;;  %v6832_v5 = vsub.f32 1.0, %v4721_v58  ;;  %6833 = vst [vmem:[#allocation158_spill] sm:$0xff] %v5552_v33  ;;  %v6834_v57 = vunpack.c.l.bf16 %v4928_v18  ;;  %v6835_v49 = vunpack.c.l.bf16 %v4939_v56  ;;  %v5565_v58 = vpop.f32.mrb[12].mxu1  ;;  %v3528_v44 = vpop.eup %3527 }
 0x214   : > { %v5539_v41 = vmul.f32 %v3522_v12, %v6830_v63  ;;  %v6836_v24 = vunpack.c.l.bf16 %v4953_v23  ;;  %v3530_v30 = vpop.eup %3529 }
 0x215   : > { %v5550_v54 = vmul.f32 %v3524_v51, %v6832_v5  ;;  %v5567_v51 = vpop.f32.mrb[18].mxu0  ;;  %v6838_v5 = vunpack.c.h.bf16 %v4928_v18 }
 0x216   : > { %v2374_v38 = vmul.f32 %v4993_v59, %v5539_v41  ;;  %v2406_v12 = vmul.f32 %v6834_v57, %v5539_v41  ;;  %v2480_v26 = vmul.f32 %v6835_v49, %v5539_v41  ;;  %v2554_v52 = vmul.f32 %v6836_v24, %v5539_v41  ;;  %6837 = vst [vmem:[#allocation159_spill] sm:$0xff] %v5567_v51  ;;  %v5579_v24 = vpop.f32.mrb[13].mxu1  ;;  %v5581_v50 = vpop.f32.mrb[19].mxu0 }
 0x217   : > { %v2986_v59 = vadd.f32 %v5539_v41, %v5491_v43  ;;  %v2375_v63 = vmul.f32 %v5020_v55, %v5550_v54  ;;  %v2407_v57 = vmul.f32 %v6838_v5, %v5550_v54  ;;  %v6839_v49 = vunpack.c.h.bf16 %v4939_v56  ;;  %v5584_v8 = vpop.f32.mrb[14].mxu1  ;;  %v3532_v55 = vpop.eup %3531 }
 0x218   : > { %v2436_v17 = vadd.f32 %v2406_v12, %v2404_v48  ;;  %v2510_v6 = vadd.f32 %v2480_v26, %v2478_v28  ;;  %v2584_v39 = vadd.f32 %v2554_v52, %v2552_v10  ;;  %v2766_v53 = vmul.f32 %v2374_v38, %v4796_v25  ;;  %v3534_v51 = vpop.eup %3533 }
 0x219   : > { %v2481_v1 = vmul.f32 %v6839_v49, %v5550_v54  ;;  %v2840_v18 = vmul.f32 %v2374_v38, %v4798_v22  ;;  %v2914_v5 = vmul.f32 %v2374_v38, %v4820_v0  ;;  %v2457_v45 = vadd.f32 %v2407_v57, %v2405_v16  ;;  %v5588_v49 = vpop.f32.mrb[15].mxu1 }
 0x21a   : > { %v2796_v33 = vadd.f32 %v2766_v53, %v2764_v4  ;;  %v6840_v48 = vunpack.c.h.bf16 %v4953_v23  ;;  %v2767_v10 = vmul.f32 %v2375_v63, %v4811_v11  ;;  %v2841_v25 = vmul.f32 %v2375_v63, %v4813_v2  ;;  %v5602_v23 = vpop.f32.mrb[20].mxu0 }
 0x21b   : > { %v2531_v56 = vadd.f32 %v2481_v1, %v2479_v13  ;;  %v2870_v12 = vadd.f32 %v2840_v18, %v2838_v40  ;;  %v2944_v26 = vadd.f32 %v2914_v5, %v2912_v32  ;;  %v2915_v22 = vmul.f32 %v2375_v63, %v4837_v7  ;;  %6842 = vst [vmem:[#allocation160_spill] sm:$0xff] %v5602_v23  ;;  %v6845_v32 = vld [vmem:[#allocation5_spill] sm:$0xff]  ;;  %v6854_v5 = vld [vmem:[#allocation63_spill] sm:$0xff] }
 0x21c   : > { %v2555_v28 = vmul.f32 %v6840_v48, %v5550_v54  ;;  %v3007_v0 = vadd.f32 %v5550_v54, %v5500_v31  ;;  %v2817_v16 = vadd.f32 %v2767_v10, %v2765_v37  ;;  %v2891_v1 = vadd.f32 %v2841_v25, %v2839_v61  ;;  %v5616_v37 = vpop.f32.mrb[21].mxu0 }
 0x21d   : > { %v6841_v53 = vsub.f32 1.0, %v4705_v47  ;;  %v2965_v38 = vadd.f32 %v2915_v22, %v2913_v19  ;;  %v6843_v11 = vsub.f32 1.0, %v4707_v36  ;;  %v6844_v40 = vsub.f32 1.0, %v4715_v60  ;;  %6847 = vst [vmem:[#allocation5_spill] sm:$0xff] %v5616_v37  ;;  %v6848_v47 = vld [vmem:[#allocation61_spill] sm:$0xff]  ;;  %v6851_v60 = vld [vmem:[#allocation62_spill] sm:$0xff] }
 0x21e   : > { %v2605_v13 = vadd.f32 %v2555_v28, %v2553_v35  ;;  %v6846_v52 = vsub.f32 1.0, %v6845_v32  ;;  %v6849_v19 = vunpack.c.l.bf16 %v5002_v46  ;;  %v6850_v36 = vunpack.c.l.bf16 %v5034_v14 }
 0x21f   : > { %v5600_v4 = vmul.f32 %v3528_v44, %v6841_v53  ;;  %v5606_v2 = vmul.f32 %v3530_v30, %v6843_v11  ;;  %v5610_v7 = vmul.f32 %v3532_v55, %v6844_v40  ;;  %v6852_v63 = vunpack.c.l.bf16 %v6851_v60  ;;  %v5629_v55 = vpop.f32.mrb[16].mxu1 }
 0x220   : > { %v5614_v35 = vmul.f32 %v3534_v51, %v6846_v52  ;;  %v5631_v51 = vpop.f32.mrb[22].mxu0  ;;  %v6855_v28 = vunpack.c.h.bf16 %v5002_v46  ;;  %v6856_v25 = vunpack.c.h.bf16 %v5034_v14  ;;  %v5642_v53 = vpop.f32.mrb[17].mxu1 }
 0x221   : > { %v2376_v61 = vmul.f32 %v6848_v47, %v5600_v4  ;;  %v2408_v44 = vmul.f32 %v6849_v19, %v5600_v4  ;;  %v2482_v30 = vmul.f32 %v6850_v36, %v5600_v4  ;;  %v2556_v57 = vmul.f32 %v6852_v63, %v5600_v4  ;;  %6853 = vst [vmem:[#allocation61_spill] sm:$0xff] %v5631_v51  ;;  %v5644_v11 = vpop.f32.mrb[23].mxu0  ;;  %v6858_v47 = vld [vmem:[#allocation21_spill] sm:$0xff]  ;;  %v5647_v19 = vpop.f32.mrb[18].mxu1  ;;  %v6859_v36 = vld [vmem:[#allocation22_spill] sm:$0xff] }
 0x222   : > { %v2987_v18 = vadd.f32 %v2986_v59, %v5600_v4  ;;  %v2377_v48 = vmul.f32 %v6854_v5, %v5606_v2  ;;  %v2409_v10 = vmul.f32 %v6855_v28, %v5606_v2  ;;  %v2483_v22 = vmul.f32 %v6856_v25, %v5606_v2  ;;  %6857 = vst [vmem:[#allocation62_spill] sm:$0xff] %v5644_v11  ;;  %v6860_v5 = vld [vmem:[#allocation28_spill] sm:$0xff]  ;;  %v5651_v37 = vpop.f32.mrb[19].mxu1 }
 0x223   : > { %v2437_v40 = vadd.f32 %v2436_v17, %v2408_v44  ;;  %v2511_v32 = vadd.f32 %v2510_v6, %v2482_v30  ;;  %v2585_v52 = vadd.f32 %v2584_v39, %v2556_v57  ;;  %v2768_v59 = vmul.f32 %v2376_v61, %v6858_v47  ;;  %v6862_v17 = vld [vmem:[#allocation24_spill] sm:$0xff]  ;;  %v6863_v39 = vld [vmem:[#allocation25_spill] sm:$0xff] }
 0x224   : > { %v2842_v63 = vmul.f32 %v2376_v61, %v6859_v36  ;;  %v2916_v46 = vmul.f32 %v2376_v61, %v6860_v5  ;;  %v2458_v28 = vadd.f32 %v2457_v45, %v2409_v10  ;;  %v2532_v51 = vadd.f32 %v2531_v56, %v2483_v22  ;;  %v6864_v47 = vld [vmem:[#allocation32_spill] sm:$0xff]  ;;  %v5662_v22 = vpop.f32.mrb[24].mxu0 }
 0x225   : > { %v2797_v14 = vadd.f32 %v2796_v33, %v2768_v59  ;;  %v6861_v25 = vunpack.c.h.bf16 %v6851_v60  ;;  %v2769_v6 = vmul.f32 %v2377_v48, %v6862_v17  ;;  %v2843_v44 = vmul.f32 %v2377_v48, %v6863_v39  ;;  %v6865_v10 = vld [vmem:[#allocation68_spill] sm:$0xff]  ;;  %6866 = vst [vmem:[#allocation63_spill] sm:$0xff] %v5662_v22  ;;  %v6867_v59 = vld [vmem:[#allocation69_spill] sm:$0xff]  ;;  %v6875_v17 = vld [vmem:[#allocation30_spill] sm:$0xff] }
 0x226   : > { %v2871_v30 = vadd.f32 %v2870_v12, %v2842_v63  ;;  %v2945_v57 = vadd.f32 %v2944_v26, %v2916_v46  ;;  %v2917_v23 = vmul.f32 %v2377_v48, %v6864_v47  ;;  %v3008_v36 = vadd.f32 %v3007_v0, %v5606_v2  ;;  %v6869_v12 = vld [vmem:[#allocation70_spill] sm:$0xff]  ;;  %v6871_v48 = vld [vmem:[#allocation71_spill] sm:$0xff] }
 0x227   : > { %v2557_v11 = vmul.f32 %v6861_v25, %v5606_v2  ;;  %v2818_v45 = vadd.f32 %v2817_v16, %v2769_v6  ;;  %v2892_v56 = vadd.f32 %v2891_v1, %v2843_v44  ;;  %v2378_v33 = vmul.f32 %v6865_v10, %v5610_v7  ;;  %v2632_v16 = vpop.permute.xlu1 %2631  ;;  %v5673_v1 = vpop.f32.mrb[25].mxu0 }
 0x228   : > { %v2966_v60 = vadd.f32 %v2965_v38, %v2917_v23  ;;  %v6868_v5 = vunpack.c.l.bf16 %v6867_v59  ;;  %v6870_v26 = vunpack.c.l.bf16 %v6869_v12  ;;  %v6872_v0 = vunpack.c.l.bf16 %v6871_v48  ;;  %6873 = vst [vmem:[#allocation21_spill] sm:$0xff] %v5673_v1  ;;  %v6876_v23 = vld [vmem:[#allocation34_spill] sm:$0xff]  ;;  %v5681_v44 = vpop.f32.mrb[20].mxu1  ;;  %v5683_v47 = vpop.f32.mrb[26].mxu0 }
 0x229   : > { %v2606_v61 = vadd.f32 %v2605_v13, %v2557_v11  ;;  %v6874_v11 = vld [vmem:[#allocation29_spill] sm:$0xff]  ;;  %v2844_v6 = vmul.f32 %v2378_v33, %v6875_v17  ;;  %v2918_v38 = vmul.f32 %v2378_v33, %v6876_v23  ;;  %v5679_v39 = vadd.f32 %v2987_v18, %v5610_v7  ;;  %6877 = vst [vmem:[#allocation22_spill] sm:$0xff] %v5683_v47  ;;  %v5693_v1 = vpop.f32.mrb[21].mxu1  ;;  %v5695_v17 = vpop.f32.mrb[27].mxu0 }
 0x22a   : > { %v2410_v25 = vmul.f32 %v6868_v5, %v5610_v7  ;;  %v2484_v63 = vmul.f32 %v6870_v26, %v5610_v7  ;;  %v2558_v13 = vmul.f32 %v6872_v0, %v5610_v7  ;;  %v2770_v46 = vmul.f32 %v2378_v33, %v6874_v11  ;;  %v6878_v0 = vld [vmem:[#allocation87_spill] sm:$0xff]  ;;  %6879 = vst [vmem:[#allocation28_spill] sm:$0xff] %v5695_v17  ;;  %v2628_v47 = vpop.permute.xlu0 %2627 }
 0x22b   : > { %v2379_v11 = vmul.f32 %v6878_v0, %v5614_v35  ;;  %v5699_v18 = vadd.f32 %v2871_v30, %v2844_v6  ;;  %v5701_v23 = vadd.f32 %v2945_v57, %v2918_v38  ;;  %v6884_v30 = vld [vmem:[#allocation38_spill] sm:$0xff]  ;;  %v5722_v17 = vadd.f32 %v3008_v36, %v5614_v35 }
 0x22c   : > { %v5685_v10 = vadd.f32 %v2437_v40, %v2410_v25  ;;  %v5687_v5 = vadd.f32 %v2511_v32, %v2484_v63  ;;  %v5689_v26 = vadd.f32 %v2585_v52, %v2558_v13  ;;  %v5697_v33 = vadd.f32 %v2797_v14, %v2770_v46  ;;  %v5706_v25 = vpop.f32.mrb[22].mxu1  ;;  %v6883_v14 = vld [vmem:[#allocation37_spill] sm:$0xff] }
 0x22d   : > { %v6880_v40 = vunpack.c.h.bf16 %v6867_v59  ;;  %v6881_v52 = vunpack.c.h.bf16 %v6869_v12  ;;  %v6882_v13 = vunpack.c.h.bf16 %v6871_v48  ;;  %v2771_v46 = vmul.f32 %v2379_v11, %v6883_v14  ;;  %v5716_v57 = vpop.f32.mrb[23].mxu1  ;;  %v6885_v59 = vld [vmem:[#allocation39_spill] sm:$0xff] }
 0x22e   : > { %v2845_v6 = vmul.f32 %v2379_v11, %v6884_v30  ;;  %v6886_v12 = vsub.f32 0.0, %v5483_v29  ;;  %v1737_v36 = vsub.f32 0.0, %v5504_v9  ;;  %v2690_v29 = vmul.f32 %v2628_v47, %v5491_v43 }
 0x22f   : > { %v2411_v32 = vmul.f32 %v6880_v40, %v5614_v35  ;;  %v2485_v63 = vmul.f32 %v6881_v52, %v5614_v35  ;;  %v2559_v0 = vmul.f32 %v6882_v13, %v5614_v35  ;;  %v2919_v40 = vmul.f32 %v2379_v11, %v6885_v59  ;;  %v5738_v11 = vpop.f32.mrb[28].mxu0 }
 0x230   : > { %v1775_v52 = vmul.f32 1.442695, %v6886_v12  ;;  %v5730_v13 = vadd.f32 %v2818_v45, %v2771_v46  ;;  %v5732_v14 = vadd.f32 %v2892_v56, %v2845_v6  ;;  %v2692_v45 = vmul.f32 %v2632_v16, %v5539_v41  ;;  %v2636_v56 = vpop.permute.xlu1 %2635 }
 0x231   : > { %v5718_v38 = vadd.f32 %v2458_v28, %v2411_v32  ;;  %v5726_v22 = vadd.f32 %v2532_v51, %v2485_v63  ;;  %v5728_v48 = vadd.f32 %v2606_v61, %v2559_v0  ;;  %v5734_v30 = vadd.f32 %v2966_v60, %v2919_v40  ;;  %v5745_v32 = vpop.f32.mrb[29].mxu0  ;;  %v5750_v0 = vpop.f32.mrb[24].mxu1 }
 0x232   : > { %3535 = vpow2.f32 %v1775_v52  ;;  %v1736_v28 = vsub.f32 0.0, %v5494_v21  ;;  %v2691_v51 = vmul.f32 %v2628_v47, %v5500_v31  ;;  %v1547_v61 = vadd.f32 %v5438_v62, %v5506_v34  ;;  %6887 = vst [vmem:[#allocation24_spill] sm:$0xff] %v5745_v32  ;;  %v5752_v43 = vpop.f32.mrb[30].mxu0  ;;  %v5756_v34 = vpop.f32.mrb[25].mxu1 }
 0x233   : > { %v1779_v63 = vmul.f32 1.442695, %v1737_v36  ;;  %v2693_v21 = vmul.f32 %v2632_v16, %v5550_v54  ;;  %v1551_v9 = vadd.f32 %v5465_v42, %v5565_v58  ;;  %6888 = vst [vmem:[#allocation25_spill] sm:$0xff] %v5752_v43  ;;  %v2722_v47 = vadd.f32 %v2692_v45, %v2690_v29  ;;  %v5758_v46 = vpop.f32.mrb[31].mxu0  ;;  %v5762_v58 = vpop.f32.mrb[26].mxu1  ;;  %v6931_v43 = vld [vmem:[#allocation12_spill] sm:$0xff] }
 0x234   : > { %v1777_v60 = vmul.f32 1.442695, %v1736_v28  ;;  %v1738_v31 = vsub.f32 0.0, %v1547_v61  ;;  %v2694_v62 = vmul.f32 %v2636_v56, %v5600_v4  ;;  %v2695_v41 = vmul.f32 %v2636_v56, %v5606_v2  ;;  %6889 = vst [vmem:[#allocation32_spill] sm:$0xff] %v5758_v46  ;;  %v2640_v40 = vpop.permute.xlu0 %2639  ;;  %v5766_v2 = vpop.f32.mrb[27].mxu1 }
 0x235   : > { %v2743_v6 = vadd.f32 %v2693_v21, %v2691_v51  ;;  %v1739_v54 = vsub.f32 0.0, %v1551_v9  ;;  %v1553_v42 = vadd.f32 %v5473_v15, %v5579_v24  ;;  %v1555_v4 = vadd.f32 %v5478_v3, %v5584_v8 }
 0x236   : > { %3537 = vpow2.f32 %v1777_v60  ;;  %v1781_v16 = vmul.f32 1.442695, %v1738_v31  ;;  %v2723_v59 = vadd.f32 %v2722_v47, %v2694_v62  ;;  %v2696_v36 = vmul.f32 %v2640_v40, %v5610_v7  ;;  %v6890_v60 = vld [vmem:[#allocation158_spill] sm:$0xff] }
 0x237   : > { %3539 = vpow2.f32 %v1779_v63  ;;  %v1783_v12 = vmul.f32 1.442695, %v1739_v54  ;;  %v2744_v52 = vadd.f32 %v2743_v6, %v2695_v41  ;;  %v1740_v28 = vsub.f32 0.0, %v1553_v42 }
 0x238   : > { %3541 = vpow2.f32 %v1781_v16  ;;  %v1741_v29 = vsub.f32 0.0, %v1555_v4  ;;  %v2697_v15 = vmul.f32 %v2640_v40, %v5614_v35  ;;  %v1557_v24 = vadd.f32 %v5485_v20, %v5588_v49  ;;  %v6891_v35 = vld [vmem:[#allocation159_spill] sm:$0xff]  ;;  %v5784_v49 = vpop.f32.mrb[28].mxu1 }
 0x239   : > { %3543 = vpow2.f32 %v1783_v12  ;;  %v1785_v51 = vmul.f32 1.442695, %v1740_v28  ;;  %v2724_v61 = vadd.f32 %v2723_v59, %v2696_v36  ;;  %v1561_v8 = vadd.f32 %v5541_v27, %v5629_v55  ;;  %v6892_v27 = vld [vmem:[#allocation8_spill] sm:$0xff]  ;;  %v5788_v41 = vpop.f32.mrb[29].mxu1  ;;  %v6898_v59 = vld [vmem:[#allocation73_spill] sm:$0xff]  ;;  %v6900_v12 = vld [vmem:[#allocation74_spill] sm:$0xff] }
 0x23a   : > { %v1787_v3 = vmul.f32 1.442695, %v1741_v29  ;;  %v5774_v45 = vadd.f32 %v2744_v52, %v2697_v15  ;;  %v1742_v56 = vsub.f32 0.0, %v1557_v24  ;;  %v1563_v7 = vadd.f32 %v6890_v60, %v5642_v53  ;;  %6894 = vst [vmem:[#allocation68_spill] sm:$0xff] %v5788_v41  ;;  %v6902_v36 = vld [vmem:[#allocation75_spill] sm:$0xff]  ;;  %v5804_v24 = vpop.permute.xlu1 %2643 }
 0x23b   : > { %3545 = vpow2.f32 %v1785_v51  ;;  %v1743_v21 = vsub.f32 0.0, %v1561_v8  ;;  %v1565_v9 = vadd.f32 %v6891_v35, %v5647_v19  ;;  %v5782_v20 = vadd.f32 %v5581_v50, %v5651_v37  ;;  %v6895_v19 = vld [vmem:[#allocation160_spill] sm:$0xff]  ;;  %v5795_v50 = vpop.f32.mrb[30].mxu1  ;;  %v6897_v37 = vld [vmem:[#allocation90_spill] sm:$0xff] }
 0x23c   : > { %v3536_v63 = vpop.eup %3535  ;;  %v6893_v55 = vsub.f32 1.0, %v6892_v27  ;;  %3547 = vpow2.f32 %v1787_v3  ;;  %v1789_v47 = vmul.f32 1.442695, %v1742_v56  ;;  %v1744_v62 = vsub.f32 0.0, %v1563_v7  ;;  %6896 = vst [vmem:[#allocation69_spill] sm:$0xff] %v5795_v50  ;;  %v5806_v51 = vpop.f32.mrb[31].mxu1 }
 0x23d   : > { %v1791_v53 = vmul.f32 1.442695, %v1743_v21  ;;  %v1745_v6 = vsub.f32 0.0, %v1565_v9  ;;  %v5793_v42 = vadd.f32 %v6895_v19, %v5681_v44  ;;  %v6899_v4 = vunpack.c.l.bf16 %v6898_v59  ;;  %6904 = vst [vmem:[#allocation70_spill] sm:$0xff] %v5806_v51  ;;  %v6905_v35 = vld [vmem:[#allocation40_spill] sm:$0xff]  ;;  %v6906_v27 = vld [vmem:[#allocation41_spill] sm:$0xff] }
 0x23e   : > { %v1831_v31 = vmul.f32 %v3536_v63, %v6893_v55  ;;  %v6901_v52 = vunpack.c.l.bf16 %v6900_v12  ;;  %v6903_v29 = vunpack.c.l.bf16 %v6902_v36  ;;  %3549 = vpow2.f32 %v1789_v47  ;;  %v6907_v19 = vld [vmem:[#allocation43_spill] sm:$0xff]  ;;  %v6928_v51 = vld [vmem:[#allocation52_spill] sm:$0xff] }
 0x23f   : > { %v5810_v56 = vmul.f32 1.442695, %v1744_v62  ;;  %3551 = vpow2.f32 %v1791_v53  ;;  %v6915_v53 = vunpack.c.h.bf16 %v6902_v36  ;;  %v6947_v50 = vld [vmem:[#allocation84_spill] sm:$0xff] }
 0x240   : > { %v2380_v16 = vmul.f32 %v6897_v37, %v1831_v31  ;;  %v2412_v40 = vmul.f32 %v6899_v4, %v1831_v31  ;;  %v2486_v28 = vmul.f32 %v6901_v52, %v1831_v31  ;;  %v2560_v15 = vmul.f32 %v6903_v29, %v1831_v31  ;;  %v3538_v8 = vpop.eup %3537  ;;  %v6908_v4 = vld [vmem:[#allocation9_spill] sm:$0xff] }
 0x241   : > { %v2989_v44 = vadd.f32 %v5679_v39, %v1831_v31  ;;  %v2698_v3 = vmul.f32 %v5804_v24, %v1831_v31  ;;  %v3540_v60 = vpop.eup %3539  ;;  %v6909_v39 = vsub.f32 1.0, %v6908_v4  ;;  %v6910_v31 = vld [vmem:[#allocation6_spill] sm:$0xff]  ;;  %v6919_v4 = vld [vmem:[#allocation51_spill] sm:$0xff]  ;;  %v6948_v32 = vunpack.c.l.bf16 %v6947_v50 }
 0x242   : > { %v2439_v7 = vadd.f32 %v5685_v10, %v2412_v40  ;;  %v2513_v63 = vadd.f32 %v5687_v5, %v2486_v28  ;;  %v2587_v21 = vadd.f32 %v5689_v26, %v2560_v15  ;;  %v2772_v9 = vmul.f32 %v2380_v16, %v6905_v35  ;;  %v3542_v29 = vpop.eup %3541  ;;  %v6912_v15 = vld [vmem:[#allocation91_spill] sm:$0xff] }
 0x243   : > { %v2846_v55 = vmul.f32 %v2380_v16, %v6906_v27  ;;  %v2920_v37 = vmul.f32 %v2380_v16, %v6907_v19  ;;  %v5820_v47 = vmul.f32 %v3538_v8, %v6909_v39  ;;  %v6911_v62 = vsub.f32 1.0, %v6910_v31  ;;  %v3544_v40 = vpop.eup %3543  ;;  %v6918_v19 = vld [vmem:[#allocation46_spill] sm:$0xff] }
 0x244   : > { %v2799_v10 = vadd.f32 %v5697_v33, %v2772_v9  ;;  %v5827_v5 = vadd.f32 %v2724_v61, %v2698_v3  ;;  %v5829_v26 = vmul.f32 1.442695, %v1745_v6  ;;  %v6914_v33 = vunpack.c.h.bf16 %v6900_v12 }
 0x245   : > { %v5824_v52 = vmul.f32 %v3540_v60, %v6911_v62  ;;  %v2873_v28 = vadd.f32 %v5699_v18, %v2846_v55  ;;  %v2947_v16 = vadd.f32 %v5701_v23, %v2920_v37  ;;  %v2381_v8 = vmul.f32 %v6912_v15, %v5820_v47  ;;  %v6916_v23 = vld [vmem:[#allocation93_spill] sm:$0xff]  ;;  %v3546_v9 = vpop.eup %3545  ;;  %v6920_v62 = vld [vmem:[#allocation76_spill] sm:$0xff] }
 0x246   : > { %v6913_v60 = vunpack.c.h.bf16 %v6898_v59  ;;  %v2487_v61 = vmul.f32 %v6914_v33, %v5820_v47  ;;  %v2561_v6 = vmul.f32 %v6915_v53, %v5820_v47  ;;  %v3010_v18 = vadd.f32 %v5722_v17, %v5820_v47  ;;  %v6917_v55 = vld [vmem:[#allocation45_spill] sm:$0xff]  ;;  %v3548_v39 = vpop.eup %3547 }
 0x247   : > { %v2382_v3 = vmul.f32 %v6916_v23, %v5824_v52  ;;  %v2773_v59 = vmul.f32 %v2381_v8, %v6917_v55  ;;  %v2847_v37 = vmul.f32 %v2381_v8, %v6918_v19  ;;  %v2921_v12 = vmul.f32 %v2381_v8, %v6919_v4  ;;  %v6924_v8 = vld [vmem:[#allocation78_spill] sm:$0xff]  ;;  %v6927_v4 = vld [vmem:[#allocation48_spill] sm:$0xff] }
 0x248   : > { %v2413_v35 = vmul.f32 %v6913_v60, %v5820_v47  ;;  %v2534_v31 = vadd.f32 %v5726_v22, %v2487_v61  ;;  %v2608_v36 = vadd.f32 %v5728_v48, %v2561_v6  ;;  %v6921_v17 = vunpack.c.l.bf16 %v6920_v62  ;;  %v6922_v60 = vld [vmem:[#allocation77_spill] sm:$0xff]  ;;  %v6926_v6 = vld [vmem:[#allocation47_spill] sm:$0xff]  ;;  %v3550_v54 = vpop.eup %3549 }
 0x249   : > { %v6923_v33 = vunpack.c.l.bf16 %v6922_v60  ;;  %v2968_v23 = vadd.f32 %v5734_v30, %v2921_v12  ;;  %v6925_v55 = vunpack.c.l.bf16 %v6924_v8  ;;  %v2774_v19 = vmul.f32 %v2382_v3, %v6926_v6 }
 0x24a   : > { %v2460_v27 = vadd.f32 %v5718_v38, %v2413_v35  ;;  %v2414_v15 = vmul.f32 %v6921_v17, %v5824_v52  ;;  %v2820_v38 = vadd.f32 %v5730_v13, %v2773_v59  ;;  %v2894_v35 = vadd.f32 %v5732_v14, %v2847_v37  ;;  %v6929_v59 = vld [vmem:[#allocation7_spill] sm:$0xff] }
 0x24b   : > { %v2488_v53 = vmul.f32 %v6923_v33, %v5824_v52  ;;  %v2562_v22 = vmul.f32 %v6925_v55, %v5824_v52  ;;  %v2848_v17 = vmul.f32 %v2382_v3, %v6927_v4  ;;  %v2922_v33 = vmul.f32 %v2382_v3, %v6928_v51 }
 0x24c   : > { %v2440_v61 = vadd.f32 %v2439_v7, %v2414_v15  ;;  %v2990_v13 = vadd.f32 %v2989_v44, %v5824_v52  ;;  %v6930_v14 = vsub.f32 1.0, %v6929_v59  ;;  %v2800_v30 = vadd.f32 %v2799_v10, %v2774_v19  ;;  %v6940_v19 = vld [vmem:[#allocation82_spill] sm:$0xff]  ;;  %v6942_v59 = vld [vmem:[#allocation49_spill] sm:$0xff] }
 0x24d   : > { %v2514_v48 = vadd.f32 %v2513_v63, %v2488_v53  ;;  %v2588_v46 = vadd.f32 %v2587_v21, %v2562_v22  ;;  %v2874_v12 = vadd.f32 %v2873_v28, %v2848_v17  ;;  %v6932_v55 = vsub.f32 1.0, %v6931_v43  ;;  %v6933_v63 = vld [vmem:[#allocation13_spill] sm:$0xff]  ;;  %v5890_v28 = vpop.eup %3551 }
 0x24e   : > { %v5872_v37 = vmul.f32 %v3542_v29, %v6930_v14  ;;  %v6934_v15 = vsub.f32 1.0, %v6933_v63  ;;  %v2948_v6 = vadd.f32 %v2947_v16, %v2922_v33  ;;  %v6935_v21 = vld [vmem:[#allocation97_spill] sm:$0xff]  ;;  %v6936_v44 = vunpack.c.h.bf16 %v6920_v62  ;;  %v6939_v16 = vld [vmem:[#allocation102_spill] sm:$0xff] }
 0x24f   : > { %v5876_v7 = vmul.f32 %v3544_v40, %v6932_v55  ;;  %v6937_v29 = vunpack.c.h.bf16 %v6922_v60  ;;  %v6938_v43 = vunpack.c.h.bf16 %v6924_v8  ;;  %v6941_v4 = vunpack.c.l.bf16 %v6940_v19  ;;  %v6943_v14 = vld [vmem:[#allocation50_spill] sm:$0xff] }
 0x250   : > { %v5880_v53 = vmul.f32 %v3546_v9, %v6934_v15  ;;  %v2383_v51 = vmul.f32 %v6935_v21, %v5872_v37  ;;  %v2415_v3 = vmul.f32 %v6936_v44, %v5872_v37  ;;  %v3011_v9 = vadd.f32 %v3010_v18, %v5872_v37  ;;  %v6944_v15 = vld [vmem:[#allocation53_spill] sm:$0xff]  ;;  %v6945_v44 = vld [vmem:[#allocation83_spill] sm:$0xff] }
 0x251   : > { %v2489_v10 = vmul.f32 %v6937_v29, %v5872_v37  ;;  %v2563_v40 = vmul.f32 %v6938_v43, %v5872_v37  ;;  %v2384_v22 = vmul.f32 %v6939_v16, %v5876_v7  ;;  %v2416_v62 = vmul.f32 %v6941_v4, %v5876_v7 }
 0x252   : > { %v2461_v17 = vadd.f32 %v2460_v27, %v2415_v3  ;;  %v2775_v60 = vmul.f32 %v2383_v51, %v6942_v59  ;;  %v2849_v55 = vmul.f32 %v2383_v51, %v6943_v14  ;;  %v2923_v21 = vmul.f32 %v2383_v51, %v6944_v15  ;;  %v6949_v27 = vld [vmem:[#allocation54_spill] sm:$0xff]  ;;  %v6950_v59 = vld [vmem:[#allocation55_spill] sm:$0xff]  ;;  %v6952_v15 = vld [vmem:[#allocation109_spill] sm:$0xff] }
 0x253   : > { %v2535_v33 = vadd.f32 %v2534_v31, %v2489_v10  ;;  %v2609_v63 = vadd.f32 %v2608_v36, %v2563_v40  ;;  %v2441_v8 = vadd.f32 %v2440_v61, %v2416_v62  ;;  %v6946_v18 = vunpack.c.l.bf16 %v6945_v44  ;;  %v6951_v36 = vld [vmem:[#allocation60_spill] sm:$0xff] }
 0x254   : > { %v2821_v43 = vadd.f32 %v2820_v38, %v2775_v60  ;;  %v2895_v16 = vadd.f32 %v2894_v35, %v2849_v55  ;;  %v2564_v4 = vmul.f32 %v6948_v32, %v5876_v7  ;;  %v2776_v31 = vmul.f32 %v2384_v22, %v6949_v27 }
 0x255   : > { %v2490_v29 = vmul.f32 %v6946_v18, %v5876_v7  ;;  %v2969_v3 = vadd.f32 %v2968_v23, %v2923_v21  ;;  %v2850_v14 = vmul.f32 %v2384_v22, %v6950_v59  ;;  %v2924_v40 = vmul.f32 %v2384_v22, %v6951_v36 }
 0x256   : > { %v2589_v51 = vadd.f32 %v2588_v46, %v2564_v4  ;;  %v2801_v61 = vadd.f32 %v2800_v30, %v2776_v31  ;;  %v2991_v62 = vadd.f32 %v2990_v13, %v5876_v7  ;;  %v2385_v38 = vmul.f32 %v6952_v15, %v5880_v53  ;;  %v6956_v30 = vld [vmem:[#allocation56_spill] sm:$0xff]  ;;  %v6957_v13 = vld [vmem:[#allocation57_spill] sm:$0xff]  ;;  %v6961_v15 = vld [vmem:[#allocation110_spill] sm:$0xff] }
 0x257   : > { %v2515_v10 = vadd.f32 %v2514_v48, %v2490_v29  ;;  %v2875_v35 = vadd.f32 %v2874_v12, %v2850_v14  ;;  %v2949_v60 = vadd.f32 %v2948_v6, %v2924_v40  ;;  %v6953_v32 = vunpack.c.h.bf16 %v6940_v19  ;;  %v6958_v29 = vld [vmem:[#allocation64_spill] sm:$0xff]  ;;  %v6959_v19 = vld [vmem:[#allocation10_spill] sm:$0xff] }
 0x258   : > { %v6954_v23 = vunpack.c.h.bf16 %v6945_v44  ;;  %v6955_v22 = vunpack.c.h.bf16 %v6947_v50  ;;  %v2777_v21 = vmul.f32 %v2385_v38, %v6956_v30  ;;  %v2851_v18 = vmul.f32 %v2385_v38, %v6957_v13  ;;  %v6964_v30 = vld [vmem:[#allocation104_spill] sm:$0xff] }
 0x259   : > { %v2417_v55 = vmul.f32 %v6953_v32, %v5880_v53  ;;  %v2925_v4 = vmul.f32 %v2385_v38, %v6958_v29  ;;  %v3012_v27 = vadd.f32 %v3011_v9, %v5880_v53  ;;  %v6960_v31 = vsub.f32 1.0, %v6959_v19  ;;  %v6962_v32 = vld [vmem:[#allocation103_spill] sm:$0xff] }
 0x25a   : > { %v2491_v48 = vmul.f32 %v6954_v23, %v5880_v53  ;;  %v2565_v46 = vmul.f32 %v6955_v22, %v5880_v53  ;;  %v2822_v44 = vadd.f32 %v2821_v43, %v2777_v21  ;;  %v2896_v36 = vadd.f32 %v2895_v16, %v2851_v18  ;;  %v6966_v38 = vld [vmem:[#allocation115_spill] sm:$0xff]  ;;  %v6970_v21 = vld [vmem:[#allocation58_spill] sm:$0xff] }
 0x25b   : > { %v2462_v12 = vadd.f32 %v2461_v17, %v2417_v55  ;;  %v1837_v59 = vmul.f32 %v3548_v39, %v6960_v31  ;;  %v2970_v40 = vadd.f32 %v2969_v3, %v2925_v4  ;;  %v6963_v23 = vunpack.c.l.bf16 %v6962_v32  ;;  %v2648_v55 = vpop.permute.xlu0 %2647  ;;  %v6971_v4 = vld [vmem:[#allocation59_spill] sm:$0xff] }
 0x25c   : > { %v2536_v6 = vadd.f32 %v2535_v33, %v2491_v48  ;;  %v2610_v14 = vadd.f32 %v2609_v63, %v2565_v46  ;;  %v6965_v13 = vunpack.c.l.bf16 %v6964_v30  ;;  %v6967_v17 = vunpack.c.l.bf16 %v6966_v38  ;;  %v6968_v48 = vld [vmem:[#allocation11_spill] sm:$0xff] }
 0x25d   : > { %v2386_v50 = vmul.f32 %v6961_v15, %v1837_v59  ;;  %v2418_v22 = vmul.f32 %v6963_v23, %v1837_v59  ;;  %v2992_v9 = vadd.f32 %v2991_v62, %v1837_v59  ;;  %v6969_v29 = vsub.f32 1.0, %v6968_v48  ;;  %v6972_v31 = vld [vmem:[#allocation67_spill] sm:$0xff]  ;;  %v6973_v23 = vld [vmem:[#allocation116_spill] sm:$0xff] }
 0x25e   : > { %v2492_v41 = vmul.f32 %v6965_v13, %v1837_v59  ;;  %v2566_v33 = vmul.f32 %v6967_v17, %v1837_v59  ;;  %v2699_v63 = vmul.f32 %v5804_v24, %v5820_v47  ;;  %v2700_v43 = vmul.f32 %v2648_v55, %v5824_v52 }
 0x25f   : > { %v1838_v39 = vmul.f32 %v3550_v54, %v6969_v29  ;;  %v2442_v16 = vadd.f32 %v2441_v8, %v2418_v22  ;;  %v2778_v18 = vmul.f32 %v2386_v50, %v6970_v21  ;;  %v2852_v19 = vmul.f32 %v2386_v50, %v6971_v4  ;;  %v6977_v22 = vld [vmem:[#allocation65_spill] sm:$0xff]  ;;  %v6979_v21 = vld [vmem:[#allocation72_spill] sm:$0xff] }
 0x260   : > { %v2516_v3 = vadd.f32 %v2515_v10, %v2492_v41  ;;  %v2590_v46 = vadd.f32 %v2589_v51, %v2566_v33  ;;  %v2926_v15 = vmul.f32 %v2386_v50, %v6972_v31  ;;  %v6974_v62 = vunpack.c.h.bf16 %v6962_v32  ;;  %v6978_v32 = vld [vmem:[#allocation66_spill] sm:$0xff] }
 0x261   : > { %v2387_v13 = vmul.f32 %v6973_v23, %v1838_v39  ;;  %v2802_v54 = vadd.f32 %v2801_v61, %v2778_v18  ;;  %v6975_v48 = vunpack.c.h.bf16 %v6964_v30  ;;  %v6976_v47 = vunpack.c.h.bf16 %v6966_v38 }
 0x262   : > { %v2419_v17 = vmul.f32 %v6974_v62, %v1838_v39  ;;  %v5953_v41 = vadd.f32 %v3012_v27, %v1838_v39  ;;  %v2876_v8 = vadd.f32 %v2875_v35, %v2852_v19  ;;  %v2950_v10 = vadd.f32 %v2949_v60, %v2926_v15  ;;  %v2652_v60 = vpop.permute.xlu1 %2651  ;;  %v2656_v15 = vpop.permute.xlu0 %2655  ;;  %v6987_v62 = vld [vmem:[#allocation122_spill] sm:$0xff] }
 0x263   : > { %v2493_v24 = vmul.f32 %v6975_v48, %v1838_v39  ;;  %v2567_v52 = vmul.f32 %v6976_v47, %v1838_v39  ;;  %v2779_v50 = vmul.f32 %v2387_v13, %v6977_v22  ;;  %v2853_v61 = vmul.f32 %v2387_v13, %v6978_v32  ;;  %v6989_v47 = vld [vmem:[#allocation79_spill] sm:$0xff]  ;;  %v6990_v22 = vld [vmem:[#allocation80_spill] sm:$0xff]  ;;  %v6991_v32 = vld [vmem:[#allocation81_spill] sm:$0xff] }
 0x264   : > { %v5955_v51 = vadd.f32 %v2462_v12, %v2419_v17  ;;  %v2927_v30 = vmul.f32 %v2387_v13, %v6979_v21  ;;  %v2746_v38 = vadd.f32 %v5774_v45, %v2699_v63  ;;  %v2701_v27 = vmul.f32 %v2648_v55, %v5872_v37  ;;  %v6982_v37 = vld [vmem:[#allocation133_spill] sm:$0xff]  ;;  %v6983_v55 = vld [vmem:[#allocation118_spill] sm:$0xff] }
 0x265   : > { %v5958_v33 = vadd.f32 %v2536_v6, %v2493_v24  ;;  %v5960_v29 = vadd.f32 %v2610_v14, %v2567_v52  ;;  %v5964_v18 = vadd.f32 %v2822_v44, %v2779_v50  ;;  %v2726_v35 = vadd.f32 %v5827_v5, %v2700_v43  ;;  %v6980_v6 = vld [vmem:[#allocation16_spill] sm:$0xff] }
 0x266   : > { %v5969_v12 = vadd.f32 %v2896_v36, %v2853_v61  ;;  %v5971_v4 = vadd.f32 %v2970_v40, %v2927_v30  ;;  %v6981_v14 = vsub.f32 1.0, %v6980_v6  ;;  %v2702_v31 = vmul.f32 %v2652_v60, %v5876_v7  ;;  %v6985_v40 = vld [vmem:[#allocation119_spill] sm:$0xff]  ;;  %v2660_v30 = vpop.permute.xlu1 %2659  ;;  %v6993_v6 = vld [vmem:[#allocation5_spill] sm:$0xff] }
 0x267   : > { %v2747_v44 = vadd.f32 %v2746_v38, %v2701_v27  ;;  %v2703_v23 = vmul.f32 %v2652_v60, %v5880_v53  ;;  %3553 = vpow2.f32 %v5810_v56  ;;  %v2704_v45 = vmul.f32 %v2656_v15, %v1837_v59 }
 0x268   : > { %v1839_v19 = vmul.f32 %v5890_v28, %v6981_v14  ;;  %v6984_v36 = vunpack.c.l.bf16 %v6983_v55  ;;  %v6986_v43 = vunpack.c.l.bf16 %v6985_v40  ;;  %v6988_v17 = vunpack.c.l.bf16 %v6987_v62 }
 0x269   : > { %v2727_v7 = vadd.f32 %v2726_v35, %v2702_v31  ;;  %v2748_v24 = vadd.f32 %v2747_v44, %v2703_v23  ;;  %3555 = vpow2.f32 %v5829_v26  ;;  %v2705_v21 = vmul.f32 %v2656_v15, %v1838_v39  ;;  %v6010_v31 = vld [vmem:[%s4763_s17 + $0x1f0] sm:$0xff]  ;;  %v6997_v23 = vld [vmem:[#allocation21_spill] sm:$0xff] }
 0x26a   : > { %v2388_v5 = vmul.f32 %v6982_v37, %v1839_v19  ;;  %v2420_v63 = vmul.f32 %v6984_v36, %v1839_v19  ;;  %v2494_v13 = vmul.f32 %v6986_v43, %v1839_v19  ;;  %v2568_v28 = vmul.f32 %v6988_v17, %v1839_v19  ;;  %v6998_v37 = vld [vmem:[#allocation22_spill] sm:$0xff]  ;;  %v7000_v17 = vld [vmem:[#allocation156_spill] sm:$0xff] }
 0x26b   : > { %v5986_v48 = vadd.f32 %v2992_v9, %v1839_v19  ;;  %v2728_v9 = vadd.f32 %v2727_v7, %v2704_v45  ;;  %v6992_v26 = vsub.f32 0.0, %v5782_v20  ;;  %v2706_v27 = vmul.f32 %v2660_v30, %v1839_v19  ;;  %v6994_v20 = vld [vmem:[#allocation61_spill] sm:$0xff] }
 0x26c   : > { %v5989_v53 = vadd.f32 %v2442_v16, %v2420_v63  ;;  %v5991_v56 = vadd.f32 %v2516_v3, %v2494_v13  ;;  %v5993_v59 = vadd.f32 %v2590_v46, %v2568_v28  ;;  %v2780_v52 = vmul.f32 %v2388_v5, %v6989_v47  ;;  %v6999_v13 = vld [vmem:[#allocation155_spill] sm:$0xff]  ;;  %v7001_v28 = vld [vmem:[#allocation17_spill] sm:$0xff] }
 0x26d   : > { %v2854_v50 = vmul.f32 %v2388_v5, %v6990_v22  ;;  %v2928_v61 = vmul.f32 %v2388_v5, %v6991_v32  ;;  %v1797_v16 = vmul.f32 1.442695, %v6992_v26  ;;  %v1747_v3 = vsub.f32 0.0, %v5793_v42  ;;  %v6995_v42 = vld [vmem:[#allocation62_spill] sm:$0xff] }
 0x26e   : > { %v5998_v38 = vadd.f32 %v2802_v54, %v2780_v52  ;;  %v2749_v60 = vadd.f32 %v2748_v24, %v2705_v21  ;;  %v1573_v14 = vadd.f32 %v6993_v6, %v5693_v1  ;;  %v6012_v39 = vadd.f32 %v2728_v9, %v2706_v27  ;;  %v7003_v52 = vld [vmem:[#allocation152_spill] sm:$0xff] }
 0x26f   : > { %v6003_v35 = vadd.f32 %v2876_v8, %v2854_v50  ;;  %v6005_v46 = vadd.f32 %v2950_v10, %v2928_v61  ;;  %3557 = vpow2.f32 %v1797_v16  ;;  %v1799_v54 = vmul.f32 1.442695, %v1747_v3  ;;  %v6996_v10 = vld [vmem:[#allocation63_spill] sm:$0xff]  ;;  %v7005_v21 = vld [vmem:[#allocation136_spill] sm:$0xff] }
 0x270   : > { %v1575_v15 = vadd.f32 %v6994_v20, %v5706_v25  ;;  %v1748_v19 = vsub.f32 0.0, %v1573_v14  ;;  %v1577_v8 = vadd.f32 %v6995_v42, %v5716_v57  ;;  %v1581_v44 = vadd.f32 %v6996_v10, %v5750_v0  ;;  %v7009_v20 = vld [vmem:[#allocation14_spill] sm:$0xff] }
 0x271   : > { %v6022_v45 = vadd.f32 %v6997_v23, %v5756_v34  ;;  %3559 = vpow2.f32 %v1799_v54  ;;  %v6026_v5 = vadd.f32 %v6998_v37, %v5762_v58  ;;  %v6029_v36 = vunpack.c.l.bf16 %v6010_v31  ;;  %v3554_v25 = vpop.eup %3553  ;;  %v7013_v37 = vld [vmem:[#allocation92_spill] sm:$0xff] }
 0x272   : > { %v1749_v1 = vsub.f32 0.0, %v1575_v15  ;;  %v1801_v63 = vmul.f32 1.442695, %v1748_v19  ;;  %v1750_v43 = vsub.f32 0.0, %v1577_v8  ;;  %v1751_v57 = vsub.f32 0.0, %v1581_v44  ;;  %v7011_v44 = vld [vmem:[#allocation85_spill] sm:$0xff] }
 0x273   : > { %v6033_v0 = vadd.f32 %v7000_v17, %v6999_v13  ;;  %v7002_v34 = vsub.f32 1.0, %v7001_v28  ;;  %v1752_v47 = vsub.f32 0.0, %v6022_v45  ;;  %v7004_v58 = vmax.f32 %v7003_v52, 1e-24  ;;  %v3556_v22 = vpop.eup %3555  ;;  %v7017_v17 = vld [vmem:[#allocation125_spill] sm:$0xff] }
 0x274   : > { %v1803_v24 = vmul.f32 1.442695, %v1749_v1  ;;  %v1805_v50 = vmul.f32 1.442695, %v1750_v43  ;;  %v6040_v32 = vmul.f32 1.442695, %v1751_v57  ;;  %v7006_v26 = vunpack.c.h.bf16 %v6983_v55 }
 0x275   : > { %v1840_v7 = vmul.f32 %v3554_v25, %v7002_v34  ;;  %3561 = vrsqrt.f32 %v7004_v58  ;;  %v1753_v61 = vsub.f32 0.0, %v6026_v5  ;;  %v7007_v27 = vunpack.c.h.bf16 %v6985_v40  ;;  %v7012_v40 = vld [vmem:[#allocation86_spill] sm:$0xff]  ;;  %v7014_v25 = vld [vmem:[#allocation137_spill] sm:$0xff]  ;;  %v7073_v5 = vld [vmem:[#allocation31_spill] sm:$0xff] }
 0x276   : > { %3563 = vpow2.f32 %v1801_v63  ;;  %v7008_v6 = vunpack.c.h.bf16 %v6987_v62  ;;  %v7010_v15 = vsub.f32 1.0, %v7009_v20  ;;  %v7024_v20 = vld [vmem:[#allocation15_spill] sm:$0xff] }
 0x277   : > { %v2389_v9 = vmul.f32 %v7005_v21, %v1840_v7  ;;  %v2421_v16 = vmul.f32 %v7006_v26, %v1840_v7  ;;  %v2495_v3 = vmul.f32 %v7007_v27, %v1840_v7  ;;  %v3014_v54 = vadd.f32 %v5953_v41, %v1840_v7  ;;  %v7015_v41 = vld [vmem:[#allocation124_spill] sm:$0xff] }
 0x278   : > { %v2569_v14 = vmul.f32 %v7008_v6, %v1840_v7  ;;  %v1841_v19 = vmul.f32 %v3556_v22, %v7010_v15  ;;  %v2707_v42 = vmul.f32 %v2660_v30, %v1840_v7  ;;  %3565 = vpow2.f32 %v1803_v24  ;;  %v7021_v22 = vld [vmem:[#allocation88_spill] sm:$0xff] }
 0x279   : > { %v2464_v8 = vadd.f32 %v5955_v51, %v2421_v16  ;;  %v2538_v10 = vadd.f32 %v5958_v33, %v2495_v3  ;;  %v2781_v23 = vmul.f32 %v2389_v9, %v7011_v44  ;;  %v2855_v1 = vmul.f32 %v2389_v9, %v7012_v40  ;;  %v3558_v13 = vpop.eup %3557  ;;  %v7019_v33 = vld [vmem:[#allocation126_spill] sm:$0xff]  ;;  %v7022_v16 = vld [vmem:[#allocation89_spill] sm:$0xff]  ;;  %v7026_v40 = vld [vmem:[#allocation20_spill] sm:$0xff] }
 0x27a   : > { %v2612_v55 = vadd.f32 %v5960_v29, %v2569_v14  ;;  %v2929_v62 = vmul.f32 %v2389_v9, %v7013_v37  ;;  %v2390_v63 = vmul.f32 %v7014_v25, %v1841_v19  ;;  %v7016_v43 = vunpack.c.l.bf16 %v7015_v41  ;;  %v7023_v3 = vld [vmem:[#allocation94_spill] sm:$0xff]  ;;  %v2664_v14 = vpop.permute.xlu0 %2663 }
 0x27b   : > { %v2824_v30 = vadd.f32 %v5964_v18, %v2781_v23  ;;  %v7018_v51 = vunpack.c.l.bf16 %v7017_v17  ;;  %v7020_v34 = vunpack.c.l.bf16 %v7019_v33  ;;  %v2994_v7 = vadd.f32 %v5986_v48, %v1841_v19  ;;  %v3560_v9 = vpop.eup %3559 }
 0x27c   : > { %v2422_v57 = vmul.f32 %v7016_v43, %v1841_v19  ;;  %v2898_v24 = vadd.f32 %v5969_v12, %v2855_v1  ;;  %v2972_v52 = vadd.f32 %v5971_v4, %v2929_v62  ;;  %v2782_v21 = vmul.f32 %v2390_v63, %v7021_v22  ;;  %v7028_v62 = vld [vmem:[#allocation141_spill] sm:$0xff]  ;;  %v7033_v22 = vld [vmem:[#allocation95_spill] sm:$0xff] }
 0x27d   : > { %v2496_v28 = vmul.f32 %v7018_v51, %v1841_v19  ;;  %v2570_v29 = vmul.f32 %v7020_v34, %v1841_v19  ;;  %v2856_v27 = vmul.f32 %v2390_v63, %v7022_v16  ;;  %v2930_v6 = vmul.f32 %v2390_v63, %v7023_v3  ;;  %v7035_v16 = vld [vmem:[#allocation107_spill] sm:$0xff]  ;;  %v7036_v3 = vld [vmem:[#allocation129_spill] sm:$0xff] }
 0x27e   : > { %v2444_v58 = vadd.f32 %v5989_v53, %v2422_v57  ;;  %v2804_v48 = vadd.f32 %v5998_v38, %v2782_v21  ;;  %v7025_v12 = vsub.f32 1.0, %v7024_v20  ;;  %v2750_v4 = vadd.f32 %v2749_v60, %v2707_v42 }
 0x27f   : > { %v2518_v26 = vadd.f32 %v5991_v56, %v2496_v28  ;;  %v2592_v18 = vadd.f32 %v5993_v59, %v2570_v29  ;;  %v2708_v44 = vmul.f32 %v2664_v14, %v1841_v19  ;;  %v6079_v53 = vpop.eup %3561  ;;  %v2878_v23 = vadd.f32 %v6003_v35, %v2856_v27 }
 0x280   : > { %v1842_v15 = vmul.f32 %v3558_v13, %v7025_v12  ;;  %v2952_v56 = vadd.f32 %v6005_v46, %v2930_v6  ;;  %v7027_v59 = vsub.f32 1.0, %v7026_v40  ;;  %3567 = vpow2.f32 %v1805_v50  ;;  %v3564_v37 = vpop.eup %3563  ;;  %v7032_v13 = vld [vmem:[#allocation143_spill] sm:$0xff] }
 0x281   : > { %v7029_v38 = vunpack.c.h.bf16 %v7015_v41  ;;  %v7030_v43 = vunpack.c.h.bf16 %v7017_v17  ;;  %v7031_v19 = vunpack.c.h.bf16 %v7019_v33  ;;  %v2730_v46 = vadd.f32 %v6012_v39, %v2708_v44  ;;  %v7034_v41 = vld [vmem:[#allocation96_spill] sm:$0xff]  ;;  %v7040_v12 = vld [vmem:[#allocation131_spill] sm:$0xff] }
 0x282   : > { %v1843_v1 = vmul.f32 %v3560_v9, %v7027_v59  ;;  %v2391_v25 = vmul.f32 %v7028_v62, %v1842_v15  ;;  %v3015_v57 = vadd.f32 %v3014_v54, %v1842_v15  ;;  %v2709_v35 = vmul.f32 %v2664_v14, %v1842_v15  ;;  %v3566_v28 = vpop.eup %3565  ;;  %v7038_v14 = vld [vmem:[#allocation130_spill] sm:$0xff]  ;;  %v7043_v62 = vld [vmem:[#allocation99_spill] sm:$0xff] }
 0x283   : > { %v2423_v63 = vmul.f32 %v7029_v38, %v1842_v15  ;;  %v2497_v60 = vmul.f32 %v7030_v43, %v1842_v15  ;;  %v2571_v42 = vmul.f32 %v7031_v19, %v1842_v15  ;;  %v7037_v33 = vunpack.c.l.bf16 %v7036_v3  ;;  %v7044_v43 = vld [vmem:[#allocation108_spill] sm:$0xff]  ;;  %v2668_v19 = vpop.permute.xlu1 %2667 }
 0x284   : > { %v2392_v51 = vmul.f32 %v7032_v13, %v1843_v1  ;;  %v2783_v21 = vmul.f32 %v2391_v25, %v7033_v22  ;;  %v2857_v9 = vmul.f32 %v2391_v25, %v7034_v41  ;;  %v2931_v17 = vmul.f32 %v2391_v25, %v7035_v16  ;;  %v7045_v13 = vld [vmem:[#allocation23_spill] sm:$0xff]  ;;  %v7047_v16 = vld [vmem:[#allocation18_spill] sm:$0xff] }
 0x285   : > { %v2465_v50 = vadd.f32 %v2464_v8, %v2423_v63  ;;  %v2539_v34 = vadd.f32 %v2538_v10, %v2497_v60  ;;  %v2613_v29 = vadd.f32 %v2612_v55, %v2571_v42  ;;  %v2751_v27 = vadd.f32 %v2750_v4, %v2709_v35  ;;  %v7042_v8 = vld [vmem:[#allocation98_spill] sm:$0xff] }
 0x286   : > { %v2424_v6 = vmul.f32 %v7037_v33, %v1843_v1  ;;  %v2825_v54 = vadd.f32 %v2824_v30, %v2783_v21  ;;  %v7039_v20 = vunpack.c.l.bf16 %v7038_v14  ;;  %v7041_v15 = vunpack.c.l.bf16 %v7040_v12 }
 0x287   : > { %v2784_v10 = vmul.f32 %v2392_v51, %v7042_v8  ;;  %v2899_v55 = vadd.f32 %v2898_v24, %v2857_v9  ;;  %v2973_v40 = vadd.f32 %v2972_v52, %v2931_v17  ;;  %v2858_v38 = vmul.f32 %v2392_v51, %v7043_v62  ;;  %v7053_v17 = vld [vmem:[#allocation145_spill] sm:$0xff] }
 0x288   : > { %v2498_v39 = vmul.f32 %v7039_v20, %v1843_v1  ;;  %v2572_v44 = vmul.f32 %v7041_v15, %v1843_v1  ;;  %v2445_v59 = vadd.f32 %v2444_v58, %v2424_v6  ;;  %v2932_v60 = vmul.f32 %v2392_v51, %v7044_v43  ;;  %v7059_v43 = vld [vmem:[#allocation135_spill] sm:$0xff] }
 0x289   : > { %v2805_v4 = vadd.f32 %v2804_v48, %v2784_v10  ;;  %v2879_v30 = vadd.f32 %v2878_v23, %v2858_v38  ;;  %v2995_v42 = vadd.f32 %v2994_v7, %v1843_v1  ;;  %v2710_v35 = vmul.f32 %v2668_v19, %v1843_v1  ;;  %v7057_v10 = vld [vmem:[#allocation134_spill] sm:$0xff] }
 0x28a   : > { %v2519_v63 = vadd.f32 %v2518_v26, %v2498_v39  ;;  %v2593_v25 = vadd.f32 %v2592_v18, %v2572_v44  ;;  %v7046_v22 = vsub.f32 1.0, %v7045_v13  ;;  %v2953_v41 = vadd.f32 %v2952_v56, %v2932_v60  ;;  %v3568_v58 = vpop.eup %3567  ;;  %v7049_v18 = vld [vmem:[#allocation144_spill] sm:$0xff] }
 0x28b   : > { %v7048_v33 = vsub.f32 1.0, %v7047_v16  ;;  %3569 = vpow2.f32 %v6040_v32  ;;  %v1809_v52 = vmul.f32 1.442695, %v1752_v47  ;;  %v2731_v26 = vadd.f32 %v2730_v46, %v2710_v35  ;;  %v7054_v47 = vld [vmem:[#allocation100_spill] sm:$0xff]  ;;  %v7055_v46 = vld [vmem:[#allocation101_spill] sm:$0xff]  ;;  %v7064_v16 = vld [vmem:[#allocation106_spill] sm:$0xff] }
 0x28c   : > { %v1844_v21 = vmul.f32 %v3564_v37, %v7046_v22  ;;  %v7050_v23 = vunpack.c.h.bf16 %v7036_v3  ;;  %v7051_v1 = vunpack.c.h.bf16 %v7038_v14  ;;  %v7052_v56 = vunpack.c.h.bf16 %v7040_v12  ;;  %v7056_v3 = vld [vmem:[#allocation111_spill] sm:$0xff]  ;;  %v7063_v22 = vld [vmem:[#allocation105_spill] sm:$0xff] }
 0x28d   : > { %v1845_v24 = vmul.f32 %v3566_v28, %v7048_v33  ;;  %v7058_v14 = vunpack.c.l.bf16 %v7057_v10  ;;  %v7060_v60 = vunpack.c.l.bf16 %v7059_v43  ;;  %3571 = vpow2.f32 %v1809_v52 }
 0x28e   : > { %v2393_v48 = vmul.f32 %v7049_v18, %v1844_v21  ;;  %v2425_v7 = vmul.f32 %v7050_v23, %v1844_v21  ;;  %v2499_v51 = vmul.f32 %v7051_v1, %v1844_v21  ;;  %v2573_v37 = vmul.f32 %v7052_v56, %v1844_v21  ;;  %v7065_v18 = vld [vmem:[#allocation112_spill] sm:$0xff] }
 0x28f   : > { %v2711_v9 = vmul.f32 %v2668_v19, %v1844_v21  ;;  %v3016_v28 = vadd.f32 %v3015_v57, %v1844_v21  ;;  %v2394_v32 = vmul.f32 %v7053_v17, %v1845_v24  ;;  %v2426_v62 = vmul.f32 %v7058_v14, %v1845_v24  ;;  %v7061_v19 = vld [vmem:[#allocation138_spill] sm:$0xff] }
 0x290   : > { %v2466_v6 = vadd.f32 %v2465_v50, %v2425_v7  ;;  %v2540_v45 = vadd.f32 %v2539_v34, %v2499_v51  ;;  %v2785_v20 = vmul.f32 %v2393_v48, %v7054_v47  ;;  %v2859_v39 = vmul.f32 %v2393_v48, %v7055_v46  ;;  %v2672_v7 = vpop.permute.xlu0 %2671  ;;  %v7066_v51 = vld [vmem:[#allocation19_spill] sm:$0xff]  ;;  %v7069_v47 = vld [vmem:[#allocation150_spill] sm:$0xff] }
 0x291   : > { %v2614_v15 = vadd.f32 %v2613_v29, %v2573_v37  ;;  %v2752_v44 = vadd.f32 %v2751_v27, %v2711_v9  ;;  %v2933_v8 = vmul.f32 %v2393_v48, %v7056_v3  ;;  %v2500_v57 = vmul.f32 %v7060_v60, %v1845_v24  ;;  %v7075_v3 = vld [vmem:[#allocation113_spill] sm:$0xff] }
 0x292   : > { %v2826_v38 = vadd.f32 %v2825_v54, %v2785_v20  ;;  %v2900_v12 = vadd.f32 %v2899_v55, %v2859_v39  ;;  %v7062_v35 = vunpack.c.l.bf16 %v7061_v19  ;;  %v2446_v13 = vadd.f32 %v2445_v59, %v2426_v62  ;;  %v7068_v59 = vld [vmem:[#allocation28_spill] sm:$0xff]  ;;  %v7077_v60 = vld [vmem:[#allocation117_spill] sm:$0xff] }
 0x293   : > { %v2974_v34 = vadd.f32 %v2973_v40, %v2933_v8  ;;  %v2786_v21 = vmul.f32 %v2394_v32, %v7063_v22  ;;  %v2860_v29 = vmul.f32 %v2394_v32, %v7064_v16  ;;  %v2520_v27 = vadd.f32 %v2519_v63, %v2500_v57  ;;  %v7076_v8 = vld [vmem:[#allocation114_spill] sm:$0xff]  ;;  %v7078_v57 = vld [vmem:[#allocation153_spill] sm:$0xff] }
 0x294   : > { %v2574_v50 = vmul.f32 %v7062_v35, %v1845_v24  ;;  %v2934_v48 = vmul.f32 %v2394_v32, %v7065_v18  ;;  %v2996_v23 = vadd.f32 %v2995_v42, %v1845_v24  ;;  %v2712_v1 = vmul.f32 %v2672_v7, %v1845_v24  ;;  %v7079_v22 = vld [vmem:[#allocation146_spill] sm:$0xff] }
 0x295   : > { %v2806_v54 = vadd.f32 %v2805_v4, %v2786_v21  ;;  %v2880_v55 = vadd.f32 %v2879_v30, %v2860_v29  ;;  %v7067_v56 = vsub.f32 1.0, %v7066_v51  ;;  %v1811_v40 = vmul.f32 1.442695, %v1753_v61  ;;  %v3570_v63 = vpop.eup %3569 }
 0x296   : > { %v2594_v33 = vadd.f32 %v2593_v25, %v2574_v50  ;;  %v2954_v9 = vadd.f32 %v2953_v41, %v2934_v48  ;;  %v1587_v17 = vadd.f32 %v7068_v59, %v5766_v2  ;;  %v2732_v25 = vadd.f32 %v2731_v26, %v2712_v1  ;;  %v2676_v50 = vpop.permute.xlu1 %2675  ;;  %v7085_v1 = vld [vmem:[#allocation120_spill] sm:$0xff]  ;;  %v7087_v59 = vld [vmem:[#allocation123_spill] sm:$0xff] }
 0x297   : > { %v1846_v37 = vmul.f32 %v3568_v58, %v7067_v56  ;;  %v7070_v42 = vunpack.c.h.bf16 %v7057_v10  ;;  %v7071_v30 = vunpack.c.h.bf16 %v7059_v43  ;;  %v7072_v58 = vunpack.c.h.bf16 %v7061_v19 }
 0x298   : > { %v7074_v61 = vsub.f32 1.0, %v7073_v5  ;;  %v7080_v21 = vunpack.c.l.bf16 %v7079_v22  ;;  %3573 = vpow2.f32 %v1811_v40  ;;  %v3572_v5 = vpop.eup %3571 }
 0x299   : > { %v2395_v32 = vmul.f32 %v7069_v47, %v1846_v37  ;;  %v2427_v4 = vmul.f32 %v7070_v42, %v1846_v37  ;;  %v2501_v24 = vmul.f32 %v7071_v30, %v1846_v37  ;;  %v2575_v41 = vmul.f32 %v7072_v58, %v1846_v37  ;;  %v6166_v47 = vld [vmem:[%s4763_s17 + $0x68] sm:$0xff] }
 0x29a   : > { %v2713_v52 = vmul.f32 %v2672_v7, %v1846_v37  ;;  %v3017_v20 = vadd.f32 %v3016_v28, %v1846_v37  ;;  %v1847_v46 = vmul.f32 %v3570_v63, %v7074_v61  ;;  %v1897_v61 = vunpack.c.l.bf16 %v6166_v47 }
 0x29b   : > { %v2467_v39 = vadd.f32 %v2466_v6, %v2427_v4  ;;  %v2541_v2 = vadd.f32 %v2540_v45, %v2501_v24  ;;  %v2787_v26 = vmul.f32 %v2395_v32, %v7075_v3  ;;  %v2861_v14 = vmul.f32 %v2395_v32, %v7076_v8  ;;  %v7081_v45 = vld [vmem:[#allocation147_spill] sm:$0xff]  ;;  %v6181_v24 = vld [vmem:[%s4763_s17 + $0x168] sm:$0xff] }
 0x29c   : > { %v2615_v62 = vadd.f32 %v2614_v15, %v2575_v41  ;;  %v2753_v10 = vadd.f32 %v2752_v44, %v2713_v52  ;;  %v2935_v43 = vmul.f32 %v2395_v32, %v7077_v60  ;;  %v2396_v19 = vmul.f32 %v7078_v57, %v1847_v46  ;;  %v7083_v15 = vld [vmem:[#allocation151_spill] sm:$0xff]  ;;  %v6169_v32 = vld [vmem:[%s4763_s17 + $0xe8] sm:$0xff] }
 0x29d   : > { %v2827_v35 = vadd.f32 %v2826_v38, %v2787_v26  ;;  %v2901_v28 = vadd.f32 %v2900_v12, %v2861_v14  ;;  %v2428_v6 = vmul.f32 %v7080_v21, %v1847_v46  ;;  %v7082_v16 = vunpack.c.l.bf16 %v7081_v45  ;;  %v7086_v12 = vld [vmem:[#allocation121_spill] sm:$0xff]  ;;  %v3270_v52 = vld [vmem:[%s4763_s17 + $0x2f0] sm:$0xff] }
 0x29e   : > { %v2975_v18 = vadd.f32 %v2974_v34, %v2935_v43  ;;  %v7084_v44 = vunpack.c.l.bf16 %v7083_v15  ;;  %v2714_v7 = vmul.f32 %v2676_v50, %v1847_v46  ;;  %v2788_v51 = vmul.f32 %v2396_v19, %v7085_v1  ;;  %v3254_v34 = vld [vmem:[%s4763_s17 + $0x270] sm:$0xff]  ;;  %v7090_v14 = vld [vmem:[#allocation157_spill] sm:$0xff]  ;;  %v7095_v1 = vld [vmem:[#allocation128_spill] sm:$0xff] }
 0x29f   : > { %v2502_v29 = vmul.f32 %v7082_v16, %v1847_v46  ;;  %v6159_v56 = vadd.f32 %v2446_v13, %v2428_v6  ;;  %v2862_v37 = vmul.f32 %v2396_v19, %v7086_v12  ;;  %v2936_v63 = vmul.f32 %v2396_v19, %v7087_v59 }
 0x2a0   : > { %v2576_v48 = vmul.f32 %v7084_v44, %v1847_v46  ;;  %v6174_v4 = vadd.f32 %v2732_v25, %v2714_v7  ;;  %v6176_v30 = vadd.f32 %v2806_v54, %v2788_v51  ;;  %v6178_v13 = vadd.f32 %v2996_v23, %v1847_v46  ;;  %v7088_v23 = vld [vmem:[#allocation33_spill] sm:$0xff] }
 0x2a1   : > { %v6161_v38 = vadd.f32 %v2520_v27, %v2502_v29  ;;  %v6183_v27 = vadd.f32 %v2880_v55, %v2862_v37  ;;  %v6185_v58 = vadd.f32 %v2954_v9, %v2936_v63  ;;  %v1754_v41 = vsub.f32 0.0, %v1587_v17 }
 0x2a2   : > { %v6172_v42 = vadd.f32 %v2594_v33, %v2576_v48  ;;  %v1946_v33 = vunpack.c.l.bf16 %v6169_v32  ;;  %v2335_v25 = vmax.f32 %v6033_v0, 1e-24  ;;  %v6191_v54 = vunpack.c.l.bf16 %v3254_v34  ;;  %v7094_v48 = vld [vmem:[#allocation127_spill] sm:$0xff] }
 0x2a3   : > { %v7089_v46 = vsub.f32 1.0, %v7088_v23  ;;  %v1995_v55 = vunpack.c.l.bf16 %v6181_v24  ;;  %v1813_v26 = vmul.f32 1.442695, %v1754_v41  ;;  %v1591_v9 = vadd.f32 %v5738_v11, %v5784_v49 }
 0x2a4   : > { %v1898_v40 = vunpack.c.h.bf16 %v6166_v47  ;;  %v1947_v17 = vunpack.c.h.bf16 %v6169_v32  ;;  %3575 = vrsqrt.f32 %v2335_v25  ;;  %v6200_v8 = vunpack.c.l.bf16 %v3270_v52  ;;  %v7098_v25 = vld [vmem:[#allocation24_spill] sm:$0xff] }
 0x2a5   : > { %v1848_v3 = vmul.f32 %v3572_v5, %v7089_v46  ;;  %v7091_v60 = vunpack.c.h.bf16 %v7079_v22  ;;  %v7092_v57 = vunpack.c.h.bf16 %v7081_v45  ;;  %v7093_v21 = vunpack.c.h.bf16 %v7083_v15  ;;  %v7096_v15 = vld [vmem:[#allocation132_spill] sm:$0xff]  ;;  %v3574_v46 = vpop.eup %3573 }
 0x2a6   : > { %3577 = vpow2.f32 %v1813_v26  ;;  %v1755_v16 = vsub.f32 0.0, %v1591_v9  ;;  %v7097_v5 = vld [vmem:[#allocation68_spill] sm:$0xff] }
 0x2a7   : > { %v2397_v0 = vmul.f32 %v7090_v14, %v1848_v3  ;;  %v2429_v43 = vmul.f32 %v7091_v60, %v1848_v3  ;;  %v2503_v19 = vmul.f32 %v7092_v57, %v1848_v3  ;;  %v2577_v11 = vmul.f32 %v7093_v21, %v1848_v3  ;;  %v7099_v14 = vld [vmem:[#allocation26_spill] sm:$0xff] }
 0x2a8   : > { %v2715_v49 = vmul.f32 %v2676_v50, %v1848_v3  ;;  %v6209_v6 = vadd.f32 %v3017_v20, %v1848_v3  ;;  %v1815_v37 = vmul.f32 1.442695, %v1755_v16  ;;  %v6223_v50 = vld [vmem:[%s4763_s17 + $0x70] sm:$0xff]  ;;  %v1593_v23 = vadd.f32 %v7098_v25, %v7097_v5 }
 0x2a9   : > { %v6211_v29 = vadd.f32 %v2467_v39, %v2429_v43  ;;  %v6213_v44 = vadd.f32 %v2541_v2, %v2503_v19  ;;  %v6215_v22 = vadd.f32 %v2615_v62, %v2577_v11  ;;  %v2789_v7 = vmul.f32 %v2397_v0, %v7094_v48  ;;  %v6226_v20 = vld [vmem:[%s4763_s17 + $0xf0] sm:$0xff]  ;;  %v7102_v11 = vld [vmem:[#allocation25_spill] sm:$0xff]  ;;  %v2680_v48 = vpop.permute.xlu0 %2679 }
 0x2aa   : > { %v6218_v45 = vadd.f32 %v2753_v10, %v2715_v49  ;;  %v2863_v51 = vmul.f32 %v2397_v0, %v7095_v1  ;;  %v2937_v12 = vmul.f32 %v2397_v0, %v7096_v15  ;;  %v6231_v39 = vld [vmem:[%s4763_s17 + $0x170] sm:$0xff]  ;;  %v2176_v2 = vmul.f32 %v6029_v36, %v6029_v36 }
 0x2ab   : > { %v6228_v59 = vadd.f32 %v2827_v35, %v2789_v7  ;;  %v2208_v62 = vmul.f32 %v6191_v54, %v6191_v54  ;;  %v2272_v10 = vmul.f32 %v6200_v8, %v6200_v8  ;;  %3579 = vpow2.f32 %v1815_v37  ;;  %v7103_v5 = vld [vmem:[#allocation139_spill] sm:$0xff] }
 0x2ac   : > { %v2902_v63 = vadd.f32 %v2901_v28, %v2863_v51  ;;  %v2976_v41 = vadd.f32 %v2975_v18, %v2937_v12  ;;  %v1996_v35 = vunpack.c.h.bf16 %v6181_v24  ;;  %v1899_v3 = vunpack.c.l.bf16 %v6223_v50  ;;  %v7101_v24 = vld [vmem:[#allocation69_spill] sm:$0xff] }
 0x2ad   : > { %v1948_v26 = vunpack.c.l.bf16 %v6226_v20  ;;  %v2240_v9 = vadd.f32 %v2208_v62, %v2176_v2  ;;  %v7100_v0 = vsub.f32 1.0, %v7099_v14  ;;  %v1997_v43 = vunpack.c.l.bf16 %v6231_v39 }
 0x2ae   : > { %v1756_v57 = vsub.f32 0.0, %v1593_v23  ;;  %v6248_v28 = vunpack.c.h.bf16 %v6010_v31  ;;  %v6250_v19 = vunpack.c.h.bf16 %v3254_v34  ;;  %v6252_v21 = vunpack.c.h.bf16 %v3270_v52  ;;  %v3576_v16 = vpop.eup %3575 }
 0x2af   : > { %v1849_v60 = vmul.f32 %v3574_v46, %v7100_v0  ;;  %v2304_v18 = vadd.f32 %v2272_v10, %v2240_v9  ;;  %v1595_v49 = vadd.f32 %v7102_v11, %v7101_v24  ;;  %v7106_v46 = vld [vmem:[#allocation27_spill] sm:$0xff] }
 0x2b0   : > { %v1817_v2 = vmul.f32 1.442695, %v1756_v57  ;;  %v3578_v62 = vpop.eup %3577  ;;  %v7107_v9 = vsub.f32 1.0, %v7106_v46 }
 0x2b1   : > { %v2398_v7 = vmul.f32 %v6079_v53, %v1849_v60  ;;  %v2430_v1 = vmul.f32 %v1897_v61, %v1849_v60  ;;  %v2504_v51 = vmul.f32 %v1946_v33, %v1849_v60  ;;  %v2578_v15 = vmul.f32 %v1995_v55, %v1849_v60  ;;  %v7104_v53 = vld [vmem:[#allocation140_spill] sm:$0xff]  ;;  %v7105_v33 = vld [vmem:[#allocation142_spill] sm:$0xff] }
 0x2b2   : > { %v2716_v12 = vmul.f32 %v2680_v48, %v1849_v60  ;;  %v2998_v37 = vadd.f32 %v6178_v13, %v1849_v60  ;;  %v2336_v31 = vmax.f32 %v2304_v18, 1e-24  ;;  %v1850_v13 = vmul.f32 %v3578_v62, %v7107_v9 }
 0x2b3   : > { %v2448_v34 = vadd.f32 %v6159_v56, %v2430_v1  ;;  %v2522_v52 = vadd.f32 %v6161_v38, %v2504_v51  ;;  %v2596_v10 = vadd.f32 %v6172_v42, %v2578_v15  ;;  %v2790_v25 = vmul.f32 %v2398_v7, %v7103_v5 }
 0x2b4   : > { %v2734_v23 = vadd.f32 %v6174_v4, %v2716_v12  ;;  %v2864_v61 = vmul.f32 %v2398_v7, %v7104_v53  ;;  %v2938_v55 = vmul.f32 %v2398_v7, %v7105_v33  ;;  %3581 = vrsqrt.f32 %v2336_v31  ;;  %v3239_v33 = vld [vmem:[%s4763_s17 + $0x1f8] sm:$0xff] }
 0x2b5   : > { %v6268_v14 = vadd.f32 %v6176_v30, %v2790_v25  ;;  %v2177_v56 = vmul.f32 %v6248_v28, %v6248_v28  ;;  %v2209_v38 = vmul.f32 %v6250_v19, %v6250_v19  ;;  %v2399_v0 = vmul.f32 %v3576_v16, %v1850_v13  ;;  %v3580_v57 = vpop.eup %3579  ;;  %v7110_v16 = vld [vmem:[#allocation154_spill] sm:$0xff] }
 0x2b6   : > { %v6275_v42 = vadd.f32 %v6183_v27, %v2864_v61  ;;  %v6278_v4 = vadd.f32 %v6185_v58, %v2938_v55  ;;  %v2431_v60 = vmul.f32 %v1898_v40, %v1850_v13  ;;  %v2505_v30 = vmul.f32 %v1947_v17, %v1850_v13  ;;  %v7108_v27 = vld [vmem:[#allocation148_spill] sm:$0xff]  ;;  %v7109_v58 = vld [vmem:[#allocation149_spill] sm:$0xff]  ;;  %v7111_v17 = vld [vmem:[#allocation35_spill] sm:$0xff] }
 0x2b7   : > { %v2579_v18 = vmul.f32 %v1996_v35, %v1850_v13  ;;  %v2717_v24 = vmul.f32 %v2680_v48, %v1850_v13  ;;  %v6285_v11 = vadd.f32 %v6209_v6, %v1850_v13  ;;  %v2791_v1 = vmul.f32 %v2399_v0, %v7108_v27  ;;  %v2684_v35 = vpop.permute.xlu1 %2683  ;;  %v3255_v55 = vld [vmem:[%s4763_s17 + $0x278] sm:$0xff] }
 0x2b8   : > { %v6288_v7 = vadd.f32 %v6211_v29, %v2431_v60  ;;  %v2865_v51 = vmul.f32 %v2399_v0, %v7109_v58  ;;  %v2939_v15 = vmul.f32 %v2399_v0, %v7110_v16  ;;  %v6294_v47 = vadd.f32 %v6213_v44, %v2505_v30  ;;  %v6350_v58 = vld [vmem:[%s4763_s17 + $0xf8] sm:$0xff] }
 0x2b9   : > { %v6297_v32 = vadd.f32 %v6215_v22, %v2579_v18  ;;  %v6300_v40 = vadd.f32 %v6218_v45, %v2717_v24  ;;  %v7112_v6 = vsub.f32 1.0, %v7111_v17  ;;  %v6305_v48 = vadd.f32 %v6228_v59, %v2791_v1  ;;  %v3271_v59 = vld [vmem:[%s4763_s17 + $0x2f8] sm:$0xff] }
 0x2ba   : > { %v6307_v12 = vadd.f32 %v2902_v63, %v2865_v51  ;;  %v6309_v44 = vadd.f32 %v2976_v41, %v2939_v15  ;;  %3583 = vpow2.f32 %v1817_v2  ;;  %v2241_v25 = vadd.f32 %v2209_v38, %v2177_v56  ;;  %v7113_v2 = vld [vmem:[#allocation36_spill] sm:$0xff] }
 0x2bb   : > { %v1851_v29 = vmul.f32 %v3580_v57, %v7112_v6  ;;  %v2273_v53 = vmul.f32 %v6252_v21, %v6252_v21  ;;  %v1757_v61 = vsub.f32 0.0, %v1595_v49  ;;  %3585 = vpow2.f32 %v7113_v2  ;;  %v6344_v18 = vld [vmem:[%s4763_s17 + $0x78] sm:$0xff] }
 0x2bc   : > { %v6327_v9 = vunpack.c.l.bf16 %v3239_v33  ;;  %v6329_v49 = vunpack.c.l.bf16 %v3255_v55  ;;  %v6331_v13 = vunpack.c.l.bf16 %v3271_v59  ;;  %v1900_v24 = vunpack.c.h.bf16 %v6223_v50  ;;  %v6353_v51 = vld [vmem:[%s4763_s17 + $0x178] sm:$0xff] }
 0x2bd   : > { %v2432_v22 = vmul.f32 %v1899_v3, %v1851_v29  ;;  %v2506_v31 = vmul.f32 %v1948_v26, %v1851_v29  ;;  %v2580_v62 = vmul.f32 %v1997_v43, %v1851_v29  ;;  %v2718_v5 = vmul.f32 %v2684_v35, %v1851_v29 }
 0x2be   : > { %v6311_v45 = vadd.f32 %v2998_v37, %v1851_v29  ;;  %v2305_v26 = vadd.f32 %v2273_v53, %v2241_v25  ;;  %v1819_v43 = vmul.f32 1.442695, %v1757_v61  ;;  %v3582_v37 = vpop.eup %3581  ;;  %v2178_v56 = vmul.f32 %v6327_v9, %v6327_v9 }
 0x2bf   : > { %v6318_v46 = vadd.f32 %v2448_v34, %v2432_v22  ;;  %v6320_v63 = vadd.f32 %v2522_v52, %v2506_v31  ;;  %v6322_v41 = vadd.f32 %v2596_v10, %v2580_v62  ;;  %v6324_v3 = vadd.f32 %v2734_v23, %v2718_v5  ;;  %v7114_v10 = vld [vmem:[#allocation44_spill] sm:$0xff] }
 0x2c0   : > { %v2400_v34 = vmul.f32 %v3582_v37, %v1851_v29  ;;  %v2337_v52 = vmax.f32 %v2305_v26, 1e-24  ;;  %3587 = vpow2.f32 %v1819_v43  ;;  %v1724_v23 = vsub.f32 1.0, %v7114_v10  ;;  %v7116_v29 = vld [vmem:[#allocation70_spill] sm:$0xff]  ;;  %v7117_v22 = vld [vmem:[#allocation32_spill] sm:$0xff] }
 0x2c1   : > { %v2210_v38 = vmul.f32 %v6329_v49, %v6329_v49  ;;  %v2274_v0 = vmul.f32 %v6331_v13, %v6331_v13  ;;  %v1949_v27 = vunpack.c.h.bf16 %v6226_v20  ;;  %v1998_v1 = vunpack.c.h.bf16 %v6231_v39 }
 0x2c2   : > { %v2792_v60 = vmul.f32 %v2400_v34, %v6029_v36  ;;  %v2866_v57 = vmul.f32 %v2400_v34, %v6191_v54  ;;  %v2940_v30 = vmul.f32 %v2400_v34, %v6200_v8  ;;  %3589 = vrsqrt.f32 %v2337_v52  ;;  %v7115_v36 = vld [vmem:[#allocation42_spill] sm:$0xff] }
 0x2c3   : > { %v2242_v16 = vadd.f32 %v2210_v38, %v2178_v56  ;;  %v1725_v17 = vsub.f32 1.0, %v7115_v36  ;;  %v1901_v39 = vunpack.c.l.bf16 %v6344_v18  ;;  %v1597_v31 = vadd.f32 %v7117_v22, %v7116_v29 }
 0x2c4   : > { %v3584_v15 = vpop.eup %3583  ;;  %v6357_v54 = vadd.f32 %v6268_v14, %v2792_v60  ;;  %v6360_v8 = vadd.f32 %v6275_v42, %v2866_v57  ;;  %v6363_v50 = vadd.f32 %v6278_v4, %v2940_v30  ;;  %v1950_v62 = vunpack.c.l.bf16 %v6350_v58 }
 0x2c5   : > { %v1852_v20 = vmul.f32 %v3584_v15, %v1724_v23  ;;  %v2306_v6 = vadd.f32 %v2274_v0, %v2242_v16  ;;  %v1999_v5 = vunpack.c.l.bf16 %v6353_v51  ;;  %v6370_v25 = vunpack.c.h.bf16 %v3239_v33  ;;  %v6379_v34 = vpop.eup %3585  ;;  %v6400_v0 = vpop.permute.xlu0 %2687 }
 0x2c6   : > { %v6372_v14 = vunpack.c.h.bf16 %v3255_v55  ;;  %v1758_v37 = vsub.f32 0.0, %v1597_v31  ;;  %v6377_v2 = vunpack.c.h.bf16 %v3271_v59 }
 0x2c7   : > { %v2433_v42 = vmul.f32 %v1900_v24, %v1852_v20  ;;  %v2507_v53 = vmul.f32 %v1949_v27, %v1852_v20  ;;  %v2581_v61 = vmul.f32 %v1998_v1, %v1852_v20  ;;  %v2719_v4 = vmul.f32 %v2684_v35, %v1852_v20 }
 0x2c8   : > { %v6375_v26 = vadd.f32 %v6285_v11, %v1852_v20  ;;  %v2338_v43 = vmax.f32 %v2306_v6, 1e-24  ;;  %v1821_v10 = vmul.f32 1.442695, %v1758_v37  ;;  %v2179_v59 = vmul.f32 %v6370_v25, %v6370_v25 }
 0x2c9   : > { %v6382_v52 = vadd.f32 %v6288_v7, %v2433_v42  ;;  %v6385_v33 = vadd.f32 %v6294_v47, %v2507_v53  ;;  %v6388_v55 = vadd.f32 %v6297_v32, %v2581_v61  ;;  %v6391_v35 = vadd.f32 %v6300_v40, %v2719_v4 }
 0x2ca   : > { %v3588_v11 = vpop.eup %3587  ;;  %3591 = vrsqrt.f32 %v2338_v43  ;;  %v2211_v23 = vmul.f32 %v6372_v14, %v6372_v14  ;;  %v2275_v47 = vmul.f32 %v6377_v2, %v6377_v2  ;;  %v1726_v32 = vsub.f32 1.0, %v6379_v34 }
 0x2cb   : > { %v1853_v7 = vmul.f32 %v3588_v11, %v1725_v17  ;;  %3593 = vpow2.f32 %v1821_v10 }
 0x2cc   : > { %v3590_v56 = vpop.eup %3589  ;;  %v2243_v38 = vadd.f32 %v2211_v23, %v2179_v59 }
 0x2cd   : > { %v2401_v40 = vmul.f32 %v3590_v56, %v1852_v20  ;;  %v2434_v60 = vmul.f32 %v1901_v39, %v1853_v7  ;;  %v2508_v57 = vmul.f32 %v1950_v62, %v1853_v7  ;;  %v2582_v30 = vmul.f32 %v1999_v5, %v1853_v7 }
 0x2ce   : > { %v2720_v24 = vmul.f32 %v6400_v0, %v1853_v7  ;;  %v3000_v27 = vadd.f32 %v6311_v45, %v1853_v7  ;;  %v2307_v1 = vadd.f32 %v2275_v47, %v2243_v38 }
 0x2cf   : > { %v2793_v16 = vmul.f32 %v2401_v40, %v6248_v28  ;;  %v2867_v15 = vmul.f32 %v2401_v40, %v6250_v19  ;;  %v2941_v36 = vmul.f32 %v2401_v40, %v6252_v21  ;;  %v2450_v17 = vadd.f32 %v6318_v46, %v2434_v60 }
 0x2d0   : > { %v2524_v6 = vadd.f32 %v6320_v63, %v2508_v57  ;;  %v2598_v20 = vadd.f32 %v6322_v41, %v2582_v30  ;;  %v2736_v39 = vadd.f32 %v6324_v3, %v2720_v24  ;;  %v3001_v29 = vrot.slane %v3000_v27, 4 }
 0x2d1   : > { %v6412_v22 = vadd.f32 %v6305_v48, %v2793_v16  ;;  %v6415_v45 = vadd.f32 %v6307_v12, %v2867_v15  ;;  %v6418_v28 = vadd.f32 %v6309_v44, %v2941_v36  ;;  %v2451_v19 = vrot.slane %v2450_v17, 4 }
 0x2d2   : > { %v2525_v21 = vrot.slane %v2524_v6, 4  ;;  %v2599_v31 = vrot.slane %v2598_v20, 4  ;;  %v2737_v46 = vrot.slane %v2736_v39, 4  ;;  %v3002_v62 = vadd.f32 %v3001_v29, %v3000_v27 }
 0x2d3   : > { %v2452_v63 = vadd.f32 %v2451_v19, %v2450_v17  ;;  %v1902_v41 = vunpack.c.h.bf16 %v6344_v18  ;;  %v2339_v3 = vmax.f32 %v2307_v1, 1e-24  ;;  %v1951_v44 = vunpack.c.h.bf16 %v6350_v58 }
 0x2d4   : > { %v3592_v5 = vpop.eup %3591  ;;  %v2526_v42 = vadd.f32 %v2525_v21, %v2524_v6  ;;  %v2600_v48 = vadd.f32 %v2599_v31, %v2598_v20  ;;  %v2738_v53 = vadd.f32 %v2737_v46, %v2736_v39  ;;  %v3003_v61 = vrot.slane %v3002_v62, 2 }
 0x2d5   : > { %v2402_v12 = vmul.f32 %v3592_v5, %v1853_v7  ;;  %v2453_v4 = vrot.slane %v2452_v63, 2  ;;  %3595 = vrsqrt.f32 %v2339_v3  ;;  %v3594_v56 = vpop.eup %3593 }
 0x2d6   : > { %v2527_v43 = vrot.slane %v2526_v42, 2  ;;  %v2601_v37 = vrot.slane %v2600_v48, 2  ;;  %v2739_v11 = vrot.slane %v2738_v53, 2  ;;  %v3004_v10 = vadd.f32 %v3003_v61, %v3002_v62 }
 0x2d7   : > { %v2454_v59 = vadd.f32 %v2453_v4, %v2452_v63  ;;  %v2794_v18 = vmul.f32 %v2402_v12, %v6327_v9  ;;  %v2868_v23 = vmul.f32 %v2402_v12, %v6329_v49  ;;  %v2942_v47 = vmul.f32 %v2402_v12, %v6331_v13 }
 0x2d8   : > { %v2528_v38 = vadd.f32 %v2527_v43, %v2526_v42  ;;  %v2602_v7 = vadd.f32 %v2601_v37, %v2600_v48  ;;  %v2740_v40 = vadd.f32 %v2739_v11, %v2738_v53  ;;  %v3005_v60 = vrot.slane %v3004_v10, 1 }
 0x2d9   : > { %v2455_v57 = vrot.slane %v2454_v59, 1  ;;  %v2810_v58 = vadd.f32 %v6357_v54, %v2794_v18  ;;  %v2884_v30 = vadd.f32 %v6360_v8, %v2868_v23  ;;  %v2958_v24 = vadd.f32 %v6363_v50, %v2942_v47 }
 0x2da   : > { %v2529_v9 = vrot.slane %v2528_v38, 1  ;;  %v2603_v49 = vrot.slane %v2602_v7, 1  ;;  %v2741_v27 = vrot.slane %v2740_v40, 1  ;;  %v2000_v13 = vunpack.c.h.bf16 %v6353_v51 }
 0x2db   : > { %v2456_v1 = vadd.f32 %v2455_v57, %v2454_v59  ;;  %v2811_v16 = vrot.slane %v2810_v58, 4  ;;  %v2885_v15 = vrot.slane %v2884_v30, 4  ;;  %v2959_v36 = vrot.slane %v2958_v24, 4 }
 0x2dc   : > { %v2530_v17 = vadd.f32 %v2529_v9, %v2528_v38  ;;  %v2604_v6 = vadd.f32 %v2603_v49, %v2602_v7  ;;  %v6433_v54 = vadd.f32 %v3005_v60, %v3004_v10  ;;  %v6437_v8 = vmul.f32 %v3594_v56, %v1726_v32 }
 0x2dd   : > { %v2742_v50 = vadd.f32 %v2741_v27, %v2740_v40  ;;  %v2812_v20 = vadd.f32 %v2811_v16, %v2810_v58  ;;  %v2886_v39 = vadd.f32 %v2885_v15, %v2884_v30  ;;  %v2960_v29 = vadd.f32 %v2959_v36, %v2958_v24 }
 0x2de   : > { %v3029_v51 = vsel %vm3028_vm8, %v2456_v1, %v2530_v17  ;;  %v2435_v19 = vmul.f32 %v1902_v41, %v6437_v8  ;;  %v2509_v21 = vmul.f32 %v1951_v44, %v6437_v8  ;;  %v2583_v31 = vmul.f32 %v2000_v13, %v6437_v8 }
 0x2df   : > { %v3596_v34 = vpop.eup %3595  ;;  %v2813_v32 = vrot.slane %v2812_v20, 2  ;;  %v2887_v46 = vrot.slane %v2886_v39, 2  ;;  %v2961_v62 = vrot.slane %v2960_v29, 2  ;;  %v3032_v63 = vsel %vm3031_vm9, %v3029_v51, %v2604_v6 }
 0x2e0   : > { %v3035_v3 = vsel %vm3034_vm10, %v3032_v63, %v2742_v50  ;;  %v2403_v5 = vmul.f32 %v3596_v34, %v6437_v8  ;;  %v2471_v42 = vadd.f32 %v6382_v52, %v2435_v19  ;;  %v2545_v48 = vadd.f32 %v6385_v33, %v2509_v21 }
 0x2e1   : > { %v2814_v41 = vadd.f32 %v2813_v32, %v2812_v20  ;;  %v2888_v53 = vadd.f32 %v2887_v46, %v2886_v39  ;;  %v2962_v61 = vadd.f32 %v2961_v62, %v2960_v29  ;;  %v2619_v12 = vadd.f32 %v6388_v55, %v2583_v31 }
 0x2e2   : > { %v2472_v4 = vrot.slane %v2471_v42, 4  ;;  %v2546_v44 = vrot.slane %v2545_v48, 4  ;;  %v2721_v43 = vmul.f32 %v6400_v0, %v6437_v8  ;;  %v2795_v37 = vmul.f32 %v2403_v5, %v6370_v25 }
 0x2e3   : > { %v2815_v11 = vrot.slane %v2814_v41, 1  ;;  %v2889_v52 = vrot.slane %v2888_v53, 1  ;;  %v2963_v10 = vrot.slane %v2962_v61, 1  ;;  %v2620_v33 = vrot.slane %v2619_v12, 4 }
 0x2e4   : > { %v2473_v59 = vadd.f32 %v2472_v4, %v2471_v42  ;;  %v2547_v18 = vadd.f32 %v2546_v44, %v2545_v48  ;;  %v2757_v23 = vadd.f32 %v6391_v35, %v2721_v43  ;;  %v2831_v47 = vadd.f32 %v6412_v22, %v2795_v37 }
 0x2e5   : > { %v2816_v56 = vadd.f32 %v2815_v11, %v2814_v41  ;;  %v2890_v55 = vadd.f32 %v2889_v52, %v2888_v53  ;;  %v2964_v38 = vadd.f32 %v2963_v10, %v2962_v61  ;;  %v2621_v7 = vadd.f32 %v2620_v33, %v2619_v12 }
 0x2e6   : > { %v2474_v40 = vrot.slane %v2473_v59, 2  ;;  %v2548_v60 = vrot.slane %v2547_v18, 2  ;;  %v2758_v0 = vrot.slane %v2757_v23, 4  ;;  %v2832_v57 = vrot.slane %v2831_v47, 4 }
 0x2e7   : > { %v3038_v25 = vsel %vm3037_vm11, %v3035_v3, %v2816_v56  ;;  %v2622_v58 = vrot.slane %v2621_v7, 2  ;;  %v2869_v30 = vmul.f32 %v2403_v5, %v6372_v14  ;;  %v2943_v24 = vmul.f32 %v2403_v5, %v6377_v2 }
 0x2e8   : > { %v3041_v35 = vsel %vm3040_vm12, %v3038_v25, %v2890_v55  ;;  %v2475_v22 = vadd.f32 %v2474_v40, %v2473_v59  ;;  %v2549_v9 = vadd.f32 %v2548_v60, %v2547_v18  ;;  %v2759_v49 = vadd.f32 %v2758_v0, %v2757_v23 }
 0x2e9   : > { %v3044_v27 = vsel %vm3043_vm13, %v3041_v35, %v2964_v38  ;;  %v2623_v13 = vadd.f32 %v2622_v58, %v2621_v7  ;;  %v2833_v1 = vadd.f32 %v2832_v57, %v2831_v47  ;;  %v2905_v16 = vadd.f32 %v6415_v45, %v2869_v30 }
 0x2ea   : > { %v3047_v14 = vsel %vm3046_vm14, %v3044_v27, %v6433_v54  ;;  %v2476_v2 = vrot.slane %v2475_v22, 1  ;;  %v2550_v15 = vrot.slane %v2549_v9, 1  ;;  %v2760_v36 = vrot.slane %v2759_v49, 2 }
 0x2eb   : > { %3049 = vst [vmem:[%s6467_s10] sm:$0xff] %v3047_v14  ;;  %v2624_v17 = vrot.slane %v2623_v13, 1  ;;  %v2834_v6 = vrot.slane %v2833_v1, 2  ;;  %v2906_v50 = vrot.slane %v2905_v16, 4  ;;  %v2979_v20 = vadd.f32 %v6418_v28, %v2943_v24 }
 0x2ec   : > { %v2477_v39 = vadd.f32 %v2476_v2, %v2475_v22  ;;  %v2551_v29 = vadd.f32 %v2550_v15, %v2549_v9  ;;  %v2761_v51 = vadd.f32 %v2760_v36, %v2759_v49  ;;  %v3021_v19 = vadd.f32 %v6375_v26, %v6437_v8 }
 0x2ed   : > { %v2625_v21 = vadd.f32 %v2624_v17, %v2623_v13  ;;  %v2835_v45 = vadd.f32 %v2834_v6, %v2833_v1  ;;  %v2907_v31 = vadd.f32 %v2906_v50, %v2905_v16  ;;  %v2980_v34 = vrot.slane %v2979_v20, 4 }
 0x2ee   : > { %v2762_v54 = vrot.slane %v2761_v51, 1  ;;  %v3022_v32 = vrot.slane %v3021_v19, 4  ;;  %v3030_v46 = vsel %vm3028_vm8, %v2477_v39, %v2551_v29 }
 0x2ef   : > { %v2836_v62 = vrot.slane %v2835_v45, 1  ;;  %v2908_v63 = vrot.slane %v2907_v31, 2  ;;  %v2981_v3 = vadd.f32 %v2980_v34, %v2979_v20  ;;  %v3033_v5 = vsel %vm3031_vm9, %v3030_v46, %v2625_v21 }
 0x2f0   : > { %v2763_v28 = vadd.f32 %v2762_v54, %v2761_v51  ;;  %v3023_v42 = vadd.f32 %v3022_v32, %v3021_v19 }
 0x2f1   : > { %v2837_v48 = vadd.f32 %v2836_v62, %v2835_v45  ;;  %v2909_v41 = vadd.f32 %v2908_v63, %v2907_v31  ;;  %v2982_v53 = vrot.slane %v2981_v3, 2 }
 0x2f2   : > { %v3024_v26 = vrot.slane %v3023_v42, 2  ;;  %v3036_v8 = vsel %vm3034_vm10, %v3033_v5, %v2763_v28 }
 0x2f3   : > { %v2910_v61 = vrot.slane %v2909_v41, 1  ;;  %v2983_v12 = vadd.f32 %v2982_v53, %v2981_v3  ;;  %v3039_v4 = vsel %vm3037_vm11, %v3036_v8, %v2837_v48 }
 0x2f4   : > { %v3025_v44 = vadd.f32 %v3024_v26, %v3023_v42 }
 0x2f5   : > { %v2911_v43 = vadd.f32 %v2910_v61, %v2909_v41  ;;  %v2984_v37 = vrot.slane %v2983_v12, 1 }
 0x2f6   : > { %v3026_v11 = vrot.slane %v3025_v44, 1 }
 0x2f7   : > { %v2985_v52 = vadd.f32 %v2984_v37, %v2983_v12  ;;  %v3042_v10 = vsel %vm3040_vm12, %v3039_v4, %v2911_v43 }
 0x2f8   : > { %v3027_v33 = vadd.f32 %v3026_v11, %v3025_v44 }
 0x2f9   : > { %v3045_v59 = vsel %vm3043_vm13, %v3042_v10, %v2985_v52 }
 0x2fa   : > { %v3048_v18 = vsel %vm3046_vm14, %v3045_v59, %v3027_v33 }
 0x2fb   : > { %3050 = vst [vmem:[%s6467_s10 + $0x8] sm:$0xff] %v3048_v18 }
 0x2fc PF: > { %p12_p9 = scmp.ge.s32.totalorder %s3669_s20, 4   ;;  %s7118_s17 = smov %s3615_s18 }
 0x2fd   : > { %s7119_s18 = smov %s3678_s23  ;;  %s7120_s19 = smov %s3669_s20 }
 0x2fe   :  { %14 = sbr.rel (!%p12_p9) target bundleno = 4 (0x4), region = 145 }

</bundles_post_ra>
